<compile_context>
chip_gen: v7x
topology: tpu7x:2x2x1
jax: 0.10.0
libtpu: 0.0.40
codegen_flags: <defaults>
</compile_context>

<pallas_src>
import functools
import math

import jax
import jax.numpy as jnp
from jax.experimental import pallas as pl
from jax.experimental.pallas import tpu as pltpu


# ----------------------------------------------------------------------------
# Per-layer kernel body (invoked once per grid step l = 0 .. nlayers-1)
# ----------------------------------------------------------------------------
def _decoder_layer_kernel(
    tgt_ref, mem_ref, pe_ref, in_w_ref, in_b_ref,
    sa_wqkv_ref, sa_bqkv_ref, sa_wo_ref, sa_bo_ref,
    ca_wq_ref, ca_bq_ref, ca_wkv_ref, ca_bkv_ref, ca_wo_ref, ca_bo_ref,
    ff_w1_ref, ff_b1_ref, ff_w2_ref, ff_b2_ref,
    ln1_g_ref, ln1_b_ref, ln2_g_ref, ln2_b_ref, ln3_g_ref, ln3_b_ref,
    out_ref,
    x_ref, tmp_ref,
    *, nhead, B, T, S, eps):
    D = x_ref.shape[1]
    dh = D // nhead
    HT = nhead * T
    scale = 1.0 / math.sqrt(dh)
    bf16 = jnp.bfloat16

    def mm(x_f32, w_bf16, b_f32):
        # bf16 MXU inputs, f32 accumulation, f32 bias add.
        y = jnp.dot(x_f32.astype(bf16), w_bf16, preferred_element_type=jnp.float32)
        return y + b_f32

    def layernorm(h, g, b):
        mu = jnp.mean(h, axis=-1, keepdims=True)
        c = h - mu
        var = jnp.mean(c * c, axis=-1, keepdims=True)
        return c * jax.lax.rsqrt(var + eps) * g + b

    def gelu(y):
        c = 0.7978845608028654  # sqrt(2/pi)
        return 0.5 * y * (1.0 + jnp.tanh(c * (y + 0.044715 * y * y * y)))

    # Head-block-diagonal row mask: mask[h*T + q, d] = 1 iff lane d belongs to head h.
    lane = jax.lax.broadcasted_iota(jnp.int32, (T, D), 1)
    head_mask = jnp.concatenate(
        [jnp.where((lane >= h * dh) & (lane < (h + 1) * dh),
                   jnp.float32(1.0), jnp.float32(0.0)) for h in range(nhead)],
        axis=0)                                                         # (H*T, D)

    # Causal mask for self-attention, replicated per head along rows -> (H*T, T).
    qr = jax.lax.broadcasted_iota(jnp.int32, (T, T), 0)
    kc = jax.lax.broadcasted_iota(jnp.int32, (T, T), 1)
    causal_tt = jnp.where(kc <= qr, jnp.float32(0.0), jnp.float32(-1e30))
    causal = jnp.concatenate([causal_tt] * nhead, axis=0)               # (H*T, T)

    def packed_heads_attn(q_all, k_all, v_all, kv_len, add_mask):
        """q_all: (B*T, D) f32; k_all/v_all: (B*kv_len, D) f32.

        Writes the per-row concatenated head outputs (pre-Wo) into tmp_ref.
        Per batch: 3 well-shaped MXU matmuls instead of 3*nhead tiny ones.
        """
        for b in range(B):
            qb = q_all[b * T:(b + 1) * T, :]
            kb = k_all[b * kv_len:(b + 1) * kv_len, :].astype(bf16)
            vb = v_all[b * kv_len:(b + 1) * kv_len, :].astype(bf16)
            # Replicate Q per head along rows and mask to that head's lanes so the full-D
            # contraction yields per-head scores (other heads' lanes contribute exact 0).
            q_exp = (jnp.concatenate([qb] * nhead, axis=0) * head_mask).astype(bf16)
            s = jax.lax.dot_general(                                     # (H*T, kv_len) f32
                q_exp, kb, (((1,), (1,)), ((), ())),
                preferred_element_type=jnp.float32) * scale
            if add_mask is not None:
                s = s + add_mask
            # Row softmax in f32 (EUP exp + approx reciprocal).
            mx = jnp.max(s, axis=-1, keepdims=True)
            p = jnp.exp(s - mx)
            p = p * pl.reciprocal(jnp.sum(p, axis=-1, keepdims=True), approx=True)
            o = jnp.dot(p.astype(bf16), vb, preferred_element_type=jnp.float32)  # (H*T, D)
            o = o * head_mask
            # Sum the head row-blocks -> concatenated head outputs per query row (T, D).
            o_cat = o[0:T, :]
            for h in range(1, nhead):
                o_cat = o_cat + o[h * T:(h + 1) * T, :]
            tmp_ref[b * T:(b + 1) * T, :] = o_cat

    # ---- first grid step: input embedding + positional encoding into the carry ----
    @pl.when(pl.program_id(0) == 0)
    def _():
        x0 = jnp.dot(tgt_ref[...].astype(bf16), in_w_ref[...],
                     preferred_element_type=jnp.float32)
        x_ref[...] = x0 + in_b_ref[...] + pe_ref[...]

    x = x_ref[...]                                                       # (B*T, D) f32
    mem = mem_ref[...]                                                   # (B*S, D) f32

    # ---- self-attention (fused QKV) + residual + norm1 (post-norm) ----
    qkv = mm(x, sa_wqkv_ref[0], sa_bqkv_ref[0])                          # (B*T, 3D)
    packed_heads_attn(qkv[:, 0:D], qkv[:, D:2 * D], qkv[:, 2 * D:3 * D], T, causal)
    sa = mm(tmp_ref[...], sa_wo_ref[0], sa_bo_ref[0])                    # (B*T, D)
    x = layernorm(x + sa, ln1_g_ref[0], ln1_b_ref[0])

    # ---- cross-attention (fused KV) + residual + norm2 ----
    q = mm(x, ca_wq_ref[0], ca_bq_ref[0])                                # (B*T, D)
    kv = mm(mem, ca_wkv_ref[0], ca_bkv_ref[0])                           # (B*S, 2D)
    packed_heads_attn(q, kv[:, 0:D], kv[:, D:2 * D], S, None)
    ca = mm(tmp_ref[...], ca_wo_ref[0], ca_bo_ref[0])
    x = layernorm(x + ca, ln2_g_ref[0], ln2_b_ref[0])

    # ---- feed-forward + residual + norm3 ----
    h = gelu(mm(x, ff_w1_ref[0], ff_b1_ref[0]))
    h = mm(h, ff_w2_ref[0], ff_b2_ref[0])
    x = layernorm(x + h, ln3_g_ref[0], ln3_b_ref[0])

    x_ref[...] = x                                                       # carry to next layer

    @pl.when(pl.program_id(0) == pl.num_programs(0) - 1)
    def _():
        out_ref[...] = x.astype(out_ref.dtype)


# ----------------------------------------------------------------------------
# Host-side parameter preparation: transpose to (in, out), stack per layer,
# store the big weight stacks in bf16 (biases / LN / pe stay f32).
# ----------------------------------------------------------------------------
def prepare_kernel_params(params):
    D = params["in_w"].shape[0]
    layers = params["layers"]
    bf16 = jnp.bfloat16

    def stack(fn, dtype=jnp.float32):
        return jnp.stack([fn(lp) for lp in layers], axis=0).astype(dtype)

    row = lambda v: v.reshape(1, -1)
    return {
        "in_w": params["in_w"].T.astype(bf16),              # (I, D) bf16
        "in_b": row(params["in_b"]),                        # (1, D) f32
        "pe": params["pe"],                                 # (max_len, 1, D) f32
        "sa_wqkv": stack(lambda p: p["sa_in_w"].T, bf16),   # (L, D, 3D)
        "sa_bqkv": stack(lambda p: row(p["sa_in_b"])),      # (L, 1, 3D)
        "sa_wo": stack(lambda p: p["sa_out_w"].T, bf16),    # (L, D, D)
        "sa_bo": stack(lambda p: row(p["sa_out_b"])),       # (L, 1, D)
        "ca_wq": stack(lambda p: p["ca_in_w"][:D].T, bf16),
        "ca_bq": stack(lambda p: row(p["ca_in_b"][:D])),
        "ca_wkv": stack(lambda p: p["ca_in_w"][D:].T, bf16),
        "ca_bkv": stack(lambda p: row(p["ca_in_b"][D:])),
        "ca_wo": stack(lambda p: p["ca_out_w"].T, bf16),
        "ca_bo": stack(lambda p: row(p["ca_out_b"])),
        "ff_w1": stack(lambda p: p["ff1_w"].T, bf16),       # (L, D, F)
        "ff_b1": stack(lambda p: row(p["ff1_b"])),          # (L, 1, F)
        "ff_w2": stack(lambda p: p["ff2_w"].T, bf16),       # (L, F, D)
        "ff_b2": stack(lambda p: row(p["ff2_b"])),          # (L, 1, D)
        "ln1_g": stack(lambda p: row(p["ln1_g"])),
        "ln1_b": stack(lambda p: row(p["ln1_b"])),
        "ln2_g": stack(lambda p: row(p["ln2_g"])),
        "ln2_b": stack(lambda p: row(p["ln2_b"])),
        "ln3_g": stack(lambda p: row(p["ln3_g"])),
        "ln3_b": stack(lambda p: row(p["ln3_b"])),
    }


def transformer_decoder_v1_forward(target, memory, kp, *, nhead):
    T, B, I = target.shape
    S = memory.shape[0]
    D = kp["in_w"].shape[1]
    L = kp["sa_wqkv"].shape[0]

    # Layout plumbing (tiny, XLA side): batch-major 2-D activations, lane dim = D.
    tgt2d = target.transpose(1, 0, 2).reshape(B * T, I)
    mem2d = memory.transpose(1, 0, 2).reshape(B * S, D)
    pe2d = jnp.tile(kp["pe"][:T, 0, :] * 0.1, (B, 1))       # (B*T, D): pe[:T] * 0.1 per batch

    def resident(a):   # stays in VMEM for the whole grid (block index constant)
        return pl.BlockSpec(a.shape, lambda l: (0,) * a.ndim)

    def per_layer(a):  # one layer slice per grid step -> double-buffered weight prefetch
        return pl.BlockSpec((1,) + a.shape[1:], lambda l: (l,) + (0,) * (a.ndim - 1))

    resident_ops = (tgt2d, mem2d, pe2d, kp["in_w"], kp["in_b"])
    layer_ops = (kp["sa_wqkv"], kp["sa_bqkv"], kp["sa_wo"], kp["sa_bo"],
                 kp["ca_wq"], kp["ca_bq"], kp["ca_wkv"], kp["ca_bkv"],
                 kp["ca_wo"], kp["ca_bo"],
                 kp["ff_w1"], kp["ff_b1"], kp["ff_w2"], kp["ff_b2"],
                 kp["ln1_g"], kp["ln1_b"], kp["ln2_g"], kp["ln2_b"],
                 kp["ln3_g"], kp["ln3_b"])

    out2d = pl.pallas_call(
        functools.partial(_decoder_layer_kernel, nhead=nhead, B=B, T=T, S=S, eps=1e-5),
        out_shape=jax.ShapeDtypeStruct((B * T, D), jnp.float32),
        grid=(L,),
        in_specs=[resident(a) for a in resident_ops] + [per_layer(a) for a in layer_ops],
        out_specs=pl.BlockSpec((B * T, D), lambda l: (0, 0)),
        scratch_shapes=[pltpu.VMEM((B * T, D), jnp.float32),   # x carry across layers
                        pltpu.VMEM((B * T, D), jnp.float32)],  # attention staging buffer
        compiler_params=pltpu.CompilerParams(
            dimension_semantics=("arbitrary",),
            vmem_limit_bytes=32 * 1024 * 1024),
    )(*resident_ops, *layer_ops)
    return out2d.reshape(B, T, D).transpose(1, 0, 2)        # back to seq-first (T, B, D)


# ----------------------------------------------------------------------------
# Deterministic parameter init (synthetic; shapes follow the PyTorch module)
# ----------------------------------------------------------------------------
def make_positional_encoding(max_len, d_model):
    position = jnp.arange(max_len, dtype=jnp.float32)[:, None]
    div_term = jnp.exp(jnp.arange(0, d_model, 2, dtype=jnp.float32)
                       * (-math.log(10000.0) / d_model))
    pe = jnp.zeros((max_len, d_model), jnp.float32)
    pe = pe.at[:, 0::2].set(jnp.sin(position * div_term))
    pe = pe.at[:, 1::2].set(jnp.cos(position * div_term))
    return pe[:, None, :]  # (max_len, 1, d_model)


def init_params(key, inputdim, dmodel, nhead, dff, nlayers, max_len=500):
    def dense(k, out_f, in_f):
        kw, kb = jax.random.split(k)
        lim = 1.0 / math.sqrt(in_f)
        w = jax.random.uniform(kw, (out_f, in_f), jnp.float32, -lim, lim)
        b = jax.random.uniform(kb, (out_f,), jnp.float32, -lim, lim)
        return w, b

    keys = jax.random.split(key, nlayers + 1)
    in_w, in_b = dense(keys[0], dmodel, inputdim)
    ones = jnp.ones((dmodel,), jnp.float32)
    zeros = jnp.zeros((dmodel,), jnp.float32)
    layers = []
    for li in range(nlayers):
        lk = jax.random.split(keys[li + 1], 6)
        sa_in_w, sa_in_b = dense(lk[0], 3 * dmodel, dmodel)
        sa_out_w, sa_out_b = dense(lk[1], dmodel, dmodel)
        ca_in_w, ca_in_b = dense(lk[2], 3 * dmodel, dmodel)
        ca_out_w, ca_out_b = dense(lk[3], dmodel, dmodel)
        ff1_w, ff1_b = dense(lk[4], dff, dmodel)
        ff2_w, ff2_b = dense(lk[5], dmodel, dff)
        layers.append(dict(
            sa_in_w=sa_in_w, sa_in_b=sa_in_b, sa_out_w=sa_out_w, sa_out_b=sa_out_b,
            ca_in_w=ca_in_w, ca_in_b=ca_in_b, ca_out_w=ca_out_w, ca_out_b=ca_out_b,
            ff1_w=ff1_w, ff1_b=ff1_b, ff2_w=ff2_w, ff2_b=ff2_b,
            ln1_g=ones, ln1_b=zeros, ln2_g=ones, ln2_b=zeros, ln3_g=ones, ln3_b=zeros))
    return {"in_w": in_w, "in_b": in_b,
            "pe": make_positional_encoding(max_len, dmodel),
            "layers": layers}


# ----------------------------------------------------------------------------
# Pure-JAX reference (mirrors the PyTorch forward, seq-first layout).
# matmul_dtype=bfloat16 reproduces the kernel's mixed-precision matmuls (structural check);
# matmul_dtype=float32 is the original-module numerics (semantic check, looser tol).
# ----------------------------------------------------------------------------
def reference_forward(target, memory, params, *, nhead, matmul_dtype=jnp.float32):
    T, B, _ = target.shape
    D = params["in_w"].shape[0]
    dh = D // nhead
    scale = 1.0 / math.sqrt(dh)
    md = matmul_dtype

    def linear(x, w, b):
        return jnp.dot(x.astype(md), w.T.astype(md),
                       preferred_element_type=jnp.float32) + b

    def gelu(y):
        c = 0.7978845608028654
        return 0.5 * y * (1.0 + jnp.tanh(c * (y + 0.044715 * y ** 3)))

    def layernorm(h, g, b, eps=1e-5):
        m = h.mean(-1, keepdims=True)
        v = ((h - m) ** 2).mean(-1, keepdims=True)
        return (h - m) / jnp.sqrt(v + eps) * g + b

    def mha(q_in, kv_in, in_w, in_b, out_w, out_b, mask):
        Tq, Tk = q_in.shape[0], kv_in.shape[0]
        q = linear(q_in, in_w[:D], in_b[:D])
        k = linear(kv_in, in_w[D:2 * D], in_b[D:2 * D])
        v = linear(kv_in, in_w[2 * D:], in_b[2 * D:])
        q = q.reshape(Tq, B * nhead, dh).transpose(1, 0, 2)
        k = k.reshape(Tk, B * nhead, dh).transpose(1, 0, 2)
        v = v.reshape(Tk, B * nhead, dh).transpose(1, 0, 2)
        s = jnp.einsum("bqd,bkd->bqk", q.astype(md), k.astype(md),
                       preferred_element_type=jnp.float32) * scale
        if mask is not None:
            s = s + mask
        p = jax.nn.softmax(s, axis=-1)
        o = jnp.einsum("bqk,bkd->bqd", p.astype(md), v.astype(md),
                       preferred_element_type=jnp.float32)
        o = o.transpose(1, 0, 2).reshape(Tq, B, D)
        return linear(o, out_w, out_b)

    x = linear(target, params["in_w"], params["in_b"])
    x = x + params["pe"][:T] * 0.1
    idx = jnp.arange(T)
    mask = jnp.where(idx[:, None] >= idx[None, :], 0.0, -jnp.inf)
    for p in params["layers"]:
        sa = mha(x, x, p["sa_in_w"], p["sa_in_b"], p["sa_out_w"], p["sa_out_b"], mask)
        x = layernorm(x + sa, p["ln1_g"], p["ln1_b"])
        ca = mha(x, memory, p["ca_in_w"], p["ca_in_b"], p["ca_out_w"], p["ca_out_b"], None)
        x = layernorm(x + ca, p["ln2_g"], p["ln2_b"])
        h = gelu(linear(x, p["ff1_w"], p["ff1_b"]))
        h = linear(h, p["ff2_w"], p["ff2_b"])
        x = layernorm(x + h, p["ln3_g"], p["ln3_b"])
    return x


# ----------------------------------------------------------------------------
if __name__ == "__main__":
    # Small shapes consistent with the module (dmodel scaled 256->128, 4->2 layers).
    T, S, B = 8, 16, 2
    INPUTDIM, DMODEL, NHEAD, DFF, NLAYERS = 32, 128, 4, 256, 2

    key = jax.random.PRNGKey(0)
    k_params, k_tgt, k_mem = jax.random.split(key, 3)
    params = init_params(k_params, INPUTDIM, DMODEL, NHEAD, DFF, NLAYERS)
    kparams = prepare_kernel_params(params)

    target = jax.random.normal(k_tgt, (T, B, INPUTDIM), jnp.float32)
    memory = jax.random.normal(k_mem, (S, B, DMODEL), jnp.float32)

    fwd = jax.jit(functools.partial(transformer_decoder_v1_forward, nhead=NHEAD))
    out = fwd(target, memory, kparams)
    jax.block_until_ready(out)

    assert out.shape == (T, B, DMODEL)
    assert bool(jnp.all(jnp.isfinite(out)))

    # Structural check: reference with the same bf16-matmul / f32-accumulate recipe.
    ref_bf16 = reference_forward(target, memory, params, nhead=NHEAD,
                                 matmul_dtype=jnp.bfloat16)
    err_bf16 = float(jnp.max(jnp.abs(out - ref_bf16)))
    assert err_bf16 < 3e-2, f"structural mismatch vs bf16-matmul reference: {err_bf16}"

    # Semantic check vs full-f32 module numerics (looser: bf16 matmuls + approx recip + tanh-GELU).
    ref_f32 = reference_forward(target, memory, params, nhead=NHEAD,
                                matmul_dtype=jnp.float32)
    err_f32 = float(jnp.max(jnp.abs(out - ref_f32)))
    assert err_f32 < 2e-1, f"mismatch vs f32 reference: {err_f32}"

    print("KERNEL_OK")
</pallas_src>

<mosaic_0001>
module attributes {stable_mosaic.version = 11 : i64} {
  func.func @_decoder_layer_kernel(%arg0: i32, %arg1: memref<16x32xf32, #tpu.memory_space<vmem>>, %arg2: memref<32x128xf32, #tpu.memory_space<vmem>>, %arg3: memref<16x128xf32, #tpu.memory_space<vmem>>, %arg4: memref<32x128xbf16, #tpu.memory_space<vmem>>, %arg5: memref<1x128xf32, #tpu.memory_space<vmem>>, %arg6: memref<1x128x384xbf16, #tpu.memory_space<vmem>>, %arg7: memref<1x1x384xf32, #tpu.memory_space<vmem>>, %arg8: memref<1x128x128xbf16, #tpu.memory_space<vmem>>, %arg9: memref<1x1x128xf32, #tpu.memory_space<vmem>>, %arg10: memref<1x128x128xbf16, #tpu.memory_space<vmem>>, %arg11: memref<1x1x128xf32, #tpu.memory_space<vmem>>, %arg12: memref<1x128x256xbf16, #tpu.memory_space<vmem>>, %arg13: memref<1x1x256xf32, #tpu.memory_space<vmem>>, %arg14: memref<1x128x128xbf16, #tpu.memory_space<vmem>>, %arg15: memref<1x1x128xf32, #tpu.memory_space<vmem>>, %arg16: memref<1x128x256xbf16, #tpu.memory_space<vmem>>, %arg17: memref<1x1x256xf32, #tpu.memory_space<vmem>>, %arg18: memref<1x256x128xbf16, #tpu.memory_space<vmem>>, %arg19: memref<1x1x128xf32, #tpu.memory_space<vmem>>, %arg20: memref<1x1x128xf32, #tpu.memory_space<vmem>>, %arg21: memref<1x1x128xf32, #tpu.memory_space<vmem>>, %arg22: memref<1x1x128xf32, #tpu.memory_space<vmem>>, %arg23: memref<1x1x128xf32, #tpu.memory_space<vmem>>, %arg24: memref<1x1x128xf32, #tpu.memory_space<vmem>>, %arg25: memref<1x1x128xf32, #tpu.memory_space<vmem>>, %arg26: memref<16x128xf32, #tpu.memory_space<vmem>>, %arg27: memref<16x128xf32, #tpu.memory_space<vmem>>, %arg28: memref<16x128xf32, #tpu.memory_space<vmem>>) attributes {dimension_semantics = [#tpu.dimension_semantics<arbitrary>], iteration_bounds = array<i64: 2>, scalar_prefetch = 0 : i64, scratch_operands = 2 : i64, tpu.core_type = #tpu.core_type<tc>, window_params = [{pipeline_mode = #tpu.pipeline_mode<synchronous>, transform_indices = @transform_0, window_bounds = array<i64: 16, 32>}, {pipeline_mode = #tpu.pipeline_mode<synchronous>, transform_indices = @transform_1, window_bounds = array<i64: 32, 128>}, {pipeline_mode = #tpu.pipeline_mode<synchronous>, transform_indices = @transform_2, window_bounds = array<i64: 16, 128>}, {pipeline_mode = #tpu.pipeline_mode<synchronous>, transform_indices = @transform_3, window_bounds = array<i64: 32, 128>}, {pipeline_mode = #tpu.pipeline_mode<synchronous>, transform_indices = @transform_4, window_bounds = array<i64: 1, 128>}, {transform_indices = @transform_5, window_bounds = array<i64: 1, 128, 384>}, {transform_indices = @transform_6, window_bounds = array<i64: 1, 1, 384>}, {transform_indices = @transform_7, window_bounds = array<i64: 1, 128, 128>}, {transform_indices = @transform_8, window_bounds = array<i64: 1, 1, 128>}, {transform_indices = @transform_9, window_bounds = array<i64: 1, 128, 128>}, {transform_indices = @transform_10, window_bounds = array<i64: 1, 1, 128>}, {transform_indices = @transform_11, window_bounds = array<i64: 1, 128, 256>}, {transform_indices = @transform_12, window_bounds = array<i64: 1, 1, 256>}, {transform_indices = @transform_13, window_bounds = array<i64: 1, 128, 128>}, {transform_indices = @transform_14, window_bounds = array<i64: 1, 1, 128>}, {transform_indices = @transform_15, window_bounds = array<i64: 1, 128, 256>}, {transform_indices = @transform_16, window_bounds = array<i64: 1, 1, 256>}, {transform_indices = @transform_17, window_bounds = array<i64: 1, 256, 128>}, {transform_indices = @transform_18, window_bounds = array<i64: 1, 1, 128>}, {transform_indices = @transform_19, window_bounds = array<i64: 1, 1, 128>}, {transform_indices = @transform_20, window_bounds = array<i64: 1, 1, 128>}, {transform_indices = @transform_21, window_bounds = array<i64: 1, 1, 128>}, {transform_indices = @transform_22, window_bounds = array<i64: 1, 1, 128>}, {transform_indices = @transform_23, window_bounds = array<i64: 1, 1, 128>}, {transform_indices = @transform_24, window_bounds = array<i64: 1, 1, 128>}, {pipeline_mode = #tpu.pipeline_mode<synchronous>, transform_indices = @transform_25, window_bounds = array<i64: 16, 128>}]} {
    %0 = tpu.iota {dimensions = array<i32: 1>} : vector<8x128xi32>
    %c0_i32 = arith.constant 0 : i32
    %1 = vector.broadcast %c0_i32 : i32 to vector<8x128xi32>
    %2 = arith.cmpi sge, %0, %1 : vector<8x128xi32>
    %c32_i32 = arith.constant 32 : i32
    %3 = vector.broadcast %c32_i32 : i32 to vector<8x128xi32>
    %4 = arith.cmpi slt, %0, %3 : vector<8x128xi32>
    %5 = arith.andi %2, %4 : vector<8x128xi1>
    %cst = arith.constant 1.000000e+00 : f32
    %cst_0 = arith.constant 0.000000e+00 : f32
    %6 = vector.broadcast %cst : f32 to vector<8x128xf32>
    %7 = vector.broadcast %cst_0 : f32 to vector<8x128xf32>
    %8 = arith.select %5, %6, %7 : vector<8x128xi1>, vector<8x128xf32>
    %c32_i32_1 = arith.constant 32 : i32
    %9 = vector.broadcast %c32_i32_1 : i32 to vector<8x128xi32>
    %10 = arith.cmpi sge, %0, %9 : vector<8x128xi32>
    %c64_i32 = arith.constant 64 : i32
    %11 = vector.broadcast %c64_i32 : i32 to vector<8x128xi32>
    %12 = arith.cmpi slt, %0, %11 : vector<8x128xi32>
    %13 = arith.andi %10, %12 : vector<8x128xi1>
    %cst_2 = arith.constant 1.000000e+00 : f32
    %cst_3 = arith.constant 0.000000e+00 : f32
    %14 = vector.broadcast %cst_2 : f32 to vector<8x128xf32>
    %15 = vector.broadcast %cst_3 : f32 to vector<8x128xf32>
    %16 = arith.select %13, %14, %15 : vector<8x128xi1>, vector<8x128xf32>
    %c64_i32_4 = arith.constant 64 : i32
    %17 = vector.broadcast %c64_i32_4 : i32 to vector<8x128xi32>
    %18 = arith.cmpi sge, %0, %17 : vector<8x128xi32>
    %c96_i32 = arith.constant 96 : i32
    %19 = vector.broadcast %c96_i32 : i32 to vector<8x128xi32>
    %20 = arith.cmpi slt, %0, %19 : vector<8x128xi32>
    %21 = arith.andi %18, %20 : vector<8x128xi1>
    %cst_5 = arith.constant 1.000000e+00 : f32
    %cst_6 = arith.constant 0.000000e+00 : f32
    %22 = vector.broadcast %cst_5 : f32 to vector<8x128xf32>
    %23 = vector.broadcast %cst_6 : f32 to vector<8x128xf32>
    %24 = arith.select %21, %22, %23 : vector<8x128xi1>, vector<8x128xf32>
    %c96_i32_7 = arith.constant 96 : i32
    %25 = vector.broadcast %c96_i32_7 : i32 to vector<8x128xi32>
    %26 = arith.cmpi sge, %0, %25 : vector<8x128xi32>
    %c128_i32 = arith.constant 128 : i32
    %27 = vector.broadcast %c128_i32 : i32 to vector<8x128xi32>
    %28 = arith.cmpi slt, %0, %27 : vector<8x128xi32>
    %29 = arith.andi %26, %28 : vector<8x128xi1>
    %cst_8 = arith.constant 1.000000e+00 : f32
    %cst_9 = arith.constant 0.000000e+00 : f32
    %30 = vector.broadcast %cst_8 : f32 to vector<8x128xf32>
    %31 = vector.broadcast %cst_9 : f32 to vector<8x128xf32>
    %32 = arith.select %29, %30, %31 : vector<8x128xi1>, vector<8x128xf32>
    %33 = tpu.concatenate %8, %16, %24, %32 in 0 : vector<8x128xf32>, vector<8x128xf32>, vector<8x128xf32>, vector<8x128xf32> -> vector<32x128xf32>
    %34 = tpu.iota {dimensions = array<i32: 0>} : vector<8x8xi32>
    %35 = tpu.iota {dimensions = array<i32: 1>} : vector<8x8xi32>
    %36 = arith.cmpi sle, %35, %34 : vector<8x8xi32>
    %cst_10 = arith.constant 0.000000e+00 : f32
    %cst_11 = arith.constant -1.000000e+30 : f32
    %37 = vector.broadcast %cst_10 : f32 to vector<8x8xf32>
    %38 = vector.broadcast %cst_11 : f32 to vector<8x8xf32>
    %39 = arith.select %36, %37, %38 : vector<8x8xi1>, vector<8x8xf32>
    %40 = tpu.concatenate %39, %39, %39, %39 in 0 : vector<8x8xf32>, vector<8x8xf32>, vector<8x8xf32>, vector<8x8xf32> -> vector<32x8xf32>
    %c0_i32_12 = arith.constant 0 : i32
    %41 = arith.cmpi eq, %arg0, %c0_i32_12 : i32
    %42 = arith.extui %41 : i1 to i32
    %c0_i32_13 = arith.constant 0 : i32
    %43 = arith.cmpi ne, %42, %c0_i32_13 : i32
    scf.if %43 {
      %c0_137 = arith.constant 0 : index
      %c0_138 = arith.constant 0 : index
      %331 = vector.load %arg1[%c0_137, %c0_138] : memref<16x32xf32, #tpu.memory_space<vmem>>, vector<16x32xf32>
      %332 = arith.truncf %331 : vector<16x32xf32> to vector<16x32xbf16>
      %c0_139 = arith.constant 0 : index
      %c0_140 = arith.constant 0 : index
      %333 = vector.load %arg4[%c0_139, %c0_140] : memref<32x128xbf16, #tpu.memory_space<vmem>>, vector<32x128xbf16>
      %cst_141 = arith.constant dense<0.000000e+00> : vector<16x128xf32>
      %334 = tpu.matmul %332, %333, %cst_141 {dimension_numbers = #tpu.dot_dimension_numbers<[1], [0], [0], [1], [0, 0, 1, 1], [], []>} : vector<16x32xbf16>, vector<32x128xbf16>, vector<16x128xf32> -> vector<16x128xf32>
      %c0_142 = arith.constant 0 : index
      %c0_143 = arith.constant 0 : index
      %335 = vector.load %arg5[%c0_142, %c0_143] : memref<1x128xf32, #tpu.memory_space<vmem>>, vector<1x128xf32>
      %336 = vector.broadcast %335 : vector<1x128xf32> to vector<16x128xf32>
      %337 = arith.addf %334, %336 : vector<16x128xf32>
      %c0_144 = arith.constant 0 : index
      %c0_145 = arith.constant 0 : index
      %338 = vector.load %arg3[%c0_144, %c0_145] : memref<16x128xf32, #tpu.memory_space<vmem>>, vector<16x128xf32>
      %339 = arith.addf %337, %338 : vector<16x128xf32>
      %c0_146 = arith.constant 0 : index
      %c0_147 = arith.constant 0 : index
      %340 = vector.load %arg27[%c0_146, %c0_147] : memref<16x128xf32, #tpu.memory_space<vmem>>, vector<16x128xf32>
      tpu.vector_store %arg27[%c0_146, %c0_147], %339 {strides = array<i32>} : memref<16x128xf32, #tpu.memory_space<vmem>>, vector<16x128xf32>,
    } else {
    }
    %c0 = arith.constant 0 : index
    %c0_14 = arith.constant 0 : index
    %44 = vector.load %arg27[%c0, %c0_14] : memref<16x128xf32, #tpu.memory_space<vmem>>, vector<16x128xf32>
    %c0_15 = arith.constant 0 : index
    %c0_16 = arith.constant 0 : index
    %45 = vector.load %arg2[%c0_15, %c0_16] : memref<32x128xf32, #tpu.memory_space<vmem>>, vector<32x128xf32>
    %c0_17 = arith.constant 0 : index
    %c0_18 = arith.constant 0 : index
    %c0_19 = arith.constant 0 : index
    %46 = vector.load %arg6[%c0_17, %c0_18, %c0_19] : memref<1x128x384xbf16, #tpu.memory_space<vmem>>, vector<1x128x384xbf16>
    %47 = vector.shape_cast %46 : vector<1x128x384xbf16> to vector<128x384xbf16>
    %c0_20 = arith.constant 0 : index
    %c0_21 = arith.constant 0 : index
    %c0_22 = arith.constant 0 : index
    %48 = vector.load %arg7[%c0_20, %c0_21, %c0_22] : memref<1x1x384xf32, #tpu.memory_space<vmem>>, vector<1x1x384xf32>
    %49 = vector.shape_cast %48 : vector<1x1x384xf32> to vector<1x384xf32>
    %50 = arith.truncf %44 : vector<16x128xf32> to vector<16x128xbf16>
    %cst_23 = arith.constant dense<0.000000e+00> : vector<16x384xf32>
    %51 = tpu.matmul %50, %47, %cst_23 {dimension_numbers = #tpu.dot_dimension_numbers<[1], [0], [0], [1], [0, 0, 1, 1], [], []>} : vector<16x128xbf16>, vector<128x384xbf16>, vector<16x384xf32> -> vector<16x384xf32>
    %52 = vector.broadcast %49 : vector<1x384xf32> to vector<16x384xf32>
    %53 = arith.addf %51, %52 : vector<16x384xf32>
    %54 = vector.extract_strided_slice %53 {offsets = [0, 0], sizes = [16, 128], strides = [1, 1]} : vector<16x384xf32> to vector<16x128xf32>
    %55 = vector.extract_strided_slice %53 {offsets = [0, 128], sizes = [16, 128], strides = [1, 1]} : vector<16x384xf32> to vector<16x128xf32>
    %56 = vector.extract_strided_slice %53 {offsets = [0, 256], sizes = [16, 128], strides = [1, 1]} : vector<16x384xf32> to vector<16x128xf32>
    %57 = vector.extract_strided_slice %54 {offsets = [0, 0], sizes = [8, 128], strides = [1, 1]} : vector<16x128xf32> to vector<8x128xf32>
    %58 = vector.extract_strided_slice %55 {offsets = [0, 0], sizes = [8, 128], strides = [1, 1]} : vector<16x128xf32> to vector<8x128xf32>
    %59 = arith.truncf %58 : vector<8x128xf32> to vector<8x128xbf16>
    %60 = vector.extract_strided_slice %56 {offsets = [0, 0], sizes = [8, 128], strides = [1, 1]} : vector<16x128xf32> to vector<8x128xf32>
    %61 = arith.truncf %60 : vector<8x128xf32> to vector<8x128xbf16>
    %62 = tpu.concatenate %57, %57, %57, %57 in 0 : vector<8x128xf32>, vector<8x128xf32>, vector<8x128xf32>, vector<8x128xf32> -> vector<32x128xf32>
    %63 = arith.mulf %62, %33 : vector<32x128xf32>
    %64 = arith.truncf %63 : vector<32x128xf32> to vector<32x128xbf16>
    %cst_24 = arith.constant dense<0.000000e+00> : vector<32x8xf32>
    %65 = tpu.matmul %64, %59, %cst_24 {dimension_numbers = #tpu.dot_dimension_numbers<[1], [1], [0], [0], [0, 0, 1, 0], [], []>} : vector<32x128xbf16>, vector<8x128xbf16>, vector<32x8xf32> -> vector<32x8xf32>
    %cst_25 = arith.constant 0.176776692 : f32
    %66 = vector.broadcast %cst_25 : f32 to vector<32x8xf32>
    %67 = arith.mulf %65, %66 : vector<32x8xf32>
    %68 = arith.addf %67, %40 : vector<32x8xf32>
    %cst_26 = arith.constant dense<0xFF800000> : vector<32xf32>
    %69 = vector.multi_reduction <maximumf>, %68, %cst_26 [1] : vector<32x8xf32> to vector<32xf32>
    %70 = vector.shape_cast %69 : vector<32xf32> to vector<32x1xf32>
    %71 = vector.broadcast %70 : vector<32x1xf32> to vector<32x8xf32>
    %72 = arith.subf %68, %71 : vector<32x8xf32>
    %73 = math.exp %72 : vector<32x8xf32>
    %cst_27 = arith.constant dense<0.000000e+00> : vector<32xf32>
    %74 = vector.multi_reduction <add>, %73, %cst_27 [1] : vector<32x8xf32> to vector<32xf32>
    %75 = vector.shape_cast %74 : vector<32xf32> to vector<32x1xf32>
    %76 = tpu.reciprocal %75 {approx = true} : vector<32x1xf32> -> vector<32x1xf32>
    %77 = vector.broadcast %76 : vector<32x1xf32> to vector<32x8xf32>
    %78 = arith.mulf %73, %77 : vector<32x8xf32>
    %79 = arith.truncf %78 : vector<32x8xf32> to vector<32x8xbf16>
    %cst_28 = arith.constant dense<0.000000e+00> : vector<32x128xf32>
    %80 = tpu.matmul %79, %61, %cst_28 {dimension_numbers = #tpu.dot_dimension_numbers<[1], [0], [0], [1], [0, 0, 1, 1], [], []>} : vector<32x8xbf16>, vector<8x128xbf16>, vector<32x128xf32> -> vector<32x128xf32>
    %81 = arith.mulf %80, %33 : vector<32x128xf32>
    %82 = vector.extract_strided_slice %81 {offsets = [0, 0], sizes = [8, 128], strides = [1, 1]} : vector<32x128xf32> to vector<8x128xf32>
    %83 = vector.extract_strided_slice %81 {offsets = [8, 0], sizes = [8, 128], strides = [1, 1]} : vector<32x128xf32> to vector<8x128xf32>
    %84 = arith.addf %82, %83 : vector<8x128xf32>
    %85 = vector.extract_strided_slice %81 {offsets = [16, 0], sizes = [8, 128], strides = [1, 1]} : vector<32x128xf32> to vector<8x128xf32>
    %86 = arith.addf %84, %85 : vector<8x128xf32>
    %87 = vector.extract_strided_slice %81 {offsets = [24, 0], sizes = [8, 128], strides = [1, 1]} : vector<32x128xf32> to vector<8x128xf32>
    %88 = arith.addf %86, %87 : vector<8x128xf32>
    %c0_29 = arith.constant 0 : index
    %c0_30 = arith.constant 0 : index
    %89 = vector.load %arg28[%c0_29, %c0_30] : memref<16x128xf32, #tpu.memory_space<vmem>>, vector<8x128xf32>
    tpu.vector_store %arg28[%c0_29, %c0_30], %88 {strides = array<i32>} : memref<16x128xf32, #tpu.memory_space<vmem>>, vector<8x128xf32>,
    %90 = vector.extract_strided_slice %54 {offsets = [8, 0], sizes = [8, 128], strides = [1, 1]} : vector<16x128xf32> to vector<8x128xf32>
    %91 = vector.extract_strided_slice %55 {offsets = [8, 0], sizes = [8, 128], strides = [1, 1]} : vector<16x128xf32> to vector<8x128xf32>
    %92 = arith.truncf %91 : vector<8x128xf32> to vector<8x128xbf16>
    %93 = vector.extract_strided_slice %56 {offsets = [8, 0], sizes = [8, 128], strides = [1, 1]} : vector<16x128xf32> to vector<8x128xf32>
    %94 = arith.truncf %93 : vector<8x128xf32> to vector<8x128xbf16>
    %95 = tpu.concatenate %90, %90, %90, %90 in 0 : vector<8x128xf32>, vector<8x128xf32>, vector<8x128xf32>, vector<8x128xf32> -> vector<32x128xf32>
    %96 = arith.mulf %95, %33 : vector<32x128xf32>
    %97 = arith.truncf %96 : vector<32x128xf32> to vector<32x128xbf16>
    %cst_31 = arith.constant dense<0.000000e+00> : vector<32x8xf32>
    %98 = tpu.matmul %97, %92, %cst_31 {dimension_numbers = #tpu.dot_dimension_numbers<[1], [1], [0], [0], [0, 0, 1, 0], [], []>} : vector<32x128xbf16>, vector<8x128xbf16>, vector<32x8xf32> -> vector<32x8xf32>
    %cst_32 = arith.constant 0.176776692 : f32
    %99 = vector.broadcast %cst_32 : f32 to vector<32x8xf32>
    %100 = arith.mulf %98, %99 : vector<32x8xf32>
    %101 = arith.addf %100, %40 : vector<32x8xf32>
    %cst_33 = arith.constant dense<0xFF800000> : vector<32xf32>
    %102 = vector.multi_reduction <maximumf>, %101, %cst_33 [1] : vector<32x8xf32> to vector<32xf32>
    %103 = vector.shape_cast %102 : vector<32xf32> to vector<32x1xf32>
    %104 = vector.broadcast %103 : vector<32x1xf32> to vector<32x8xf32>
    %105 = arith.subf %101, %104 : vector<32x8xf32>
    %106 = math.exp %105 : vector<32x8xf32>
    %cst_34 = arith.constant dense<0.000000e+00> : vector<32xf32>
    %107 = vector.multi_reduction <add>, %106, %cst_34 [1] : vector<32x8xf32> to vector<32xf32>
    %108 = vector.shape_cast %107 : vector<32xf32> to vector<32x1xf32>
    %109 = tpu.reciprocal %108 {approx = true} : vector<32x1xf32> -> vector<32x1xf32>
    %110 = vector.broadcast %109 : vector<32x1xf32> to vector<32x8xf32>
    %111 = arith.mulf %106, %110 : vector<32x8xf32>
    %112 = arith.truncf %111 : vector<32x8xf32> to vector<32x8xbf16>
    %cst_35 = arith.constant dense<0.000000e+00> : vector<32x128xf32>
    %113 = tpu.matmul %112, %94, %cst_35 {dimension_numbers = #tpu.dot_dimension_numbers<[1], [0], [0], [1], [0, 0, 1, 1], [], []>} : vector<32x8xbf16>, vector<8x128xbf16>, vector<32x128xf32> -> vector<32x128xf32>
    %114 = arith.mulf %113, %33 : vector<32x128xf32>
    %115 = vector.extract_strided_slice %114 {offsets = [0, 0], sizes = [8, 128], strides = [1, 1]} : vector<32x128xf32> to vector<8x128xf32>
    %116 = vector.extract_strided_slice %114 {offsets = [8, 0], sizes = [8, 128], strides = [1, 1]} : vector<32x128xf32> to vector<8x128xf32>
    %117 = arith.addf %115, %116 : vector<8x128xf32>
    %118 = vector.extract_strided_slice %114 {offsets = [16, 0], sizes = [8, 128], strides = [1, 1]} : vector<32x128xf32> to vector<8x128xf32>
    %119 = arith.addf %117, %118 : vector<8x128xf32>
    %120 = vector.extract_strided_slice %114 {offsets = [24, 0], sizes = [8, 128], strides = [1, 1]} : vector<32x128xf32> to vector<8x128xf32>
    %121 = arith.addf %119, %120 : vector<8x128xf32>
    %c8 = arith.constant 8 : index
    %c0_36 = arith.constant 0 : index
    %122 = vector.load %arg28[%c8, %c0_36] : memref<16x128xf32, #tpu.memory_space<vmem>>, vector<8x128xf32>
    tpu.vector_store %arg28[%c8, %c0_36], %121 {strides = array<i32>} : memref<16x128xf32, #tpu.memory_space<vmem>>, vector<8x128xf32>,
    %c0_37 = arith.constant 0 : index
    %c0_38 = arith.constant 0 : index
    %123 = vector.load %arg28[%c0_37, %c0_38] : memref<16x128xf32, #tpu.memory_space<vmem>>, vector<16x128xf32>
    %c0_39 = arith.constant 0 : index
    %c0_40 = arith.constant 0 : index
    %c0_41 = arith.constant 0 : index
    %124 = vector.load %arg8[%c0_39, %c0_40, %c0_41] : memref<1x128x128xbf16, #tpu.memory_space<vmem>>, vector<1x128x128xbf16>
    %125 = vector.shape_cast %124 : vector<1x128x128xbf16> to vector<128x128xbf16>
    %c0_42 = arith.constant 0 : index
    %c0_43 = arith.constant 0 : index
    %c0_44 = arith.constant 0 : index
    %126 = vector.load %arg9[%c0_42, %c0_43, %c0_44] : memref<1x1x128xf32, #tpu.memory_space<vmem>>, vector<1x1x128xf32>
    %127 = vector.shape_cast %126 : vector<1x1x128xf32> to vector<1x128xf32>
    %128 = arith.truncf %123 : vector<16x128xf32> to vector<16x128xbf16>
    %cst_45 = arith.constant dense<0.000000e+00> : vector<16x128xf32>
    %129 = tpu.matmul %128, %125, %cst_45 {dimension_numbers = #tpu.dot_dimension_numbers<[1], [0], [0], [1], [0, 0, 1, 1], [], []>} : vector<16x128xbf16>, vector<128x128xbf16>, vector<16x128xf32> -> vector<16x128xf32>
    %130 = vector.broadcast %127 : vector<1x128xf32> to vector<16x128xf32>
    %131 = arith.addf %129, %130 : vector<16x128xf32>
    %132 = arith.addf %44, %131 : vector<16x128xf32>
    %c0_46 = arith.constant 0 : index
    %c0_47 = arith.constant 0 : index
    %c0_48 = arith.constant 0 : index
    %133 = vector.load %arg20[%c0_46, %c0_47, %c0_48] : memref<1x1x128xf32, #tpu.memory_space<vmem>>, vector<1x1x128xf32>
    %134 = vector.shape_cast %133 : vector<1x1x128xf32> to vector<1x128xf32>
    %c0_49 = arith.constant 0 : index
    %c0_50 = arith.constant 0 : index
    %c0_51 = arith.constant 0 : index
    %135 = vector.load %arg21[%c0_49, %c0_50, %c0_51] : memref<1x1x128xf32, #tpu.memory_space<vmem>>, vector<1x1x128xf32>
    %136 = vector.shape_cast %135 : vector<1x1x128xf32> to vector<1x128xf32>
    %cst_52 = arith.constant dense<0.000000e+00> : vector<16xf32>
    %137 = vector.multi_reduction <add>, %132, %cst_52 [1] : vector<16x128xf32> to vector<16xf32>
    %138 = vector.shape_cast %137 : vector<16xf32> to vector<16x1xf32>
    %cst_53 = arith.constant 1.280000e+02 : f32
    %139 = vector.broadcast %cst_53 : f32 to vector<16x1xf32>
    %140 = arith.divf %138, %139 : vector<16x1xf32>
    %141 = vector.broadcast %140 : vector<16x1xf32> to vector<16x128xf32>
    %142 = arith.subf %132, %141 : vector<16x128xf32>
    %143 = arith.mulf %142, %142 : vector<16x128xf32>
    %cst_54 = arith.constant dense<0.000000e+00> : vector<16xf32>
    %144 = vector.multi_reduction <add>, %143, %cst_54 [1] : vector<16x128xf32> to vector<16xf32>
    %145 = vector.shape_cast %144 : vector<16xf32> to vector<16x1xf32>
    %cst_55 = arith.constant 1.280000e+02 : f32
    %146 = vector.broadcast %cst_55 : f32 to vector<16x1xf32>
    %147 = arith.divf %145, %146 : vector<16x1xf32>
    %cst_56 = arith.constant 9.99999974E-6 : f32
    %148 = vector.broadcast %cst_56 : f32 to vector<16x1xf32>
    %149 = arith.addf %147, %148 : vector<16x1xf32>
    %150 = math.rsqrt %149 : vector<16x1xf32>
    %151 = vector.broadcast %150 : vector<16x1xf32> to vector<16x128xf32>
    %152 = arith.mulf %142, %151 : vector<16x128xf32>
    %153 = vector.broadcast %134 : vector<1x128xf32> to vector<16x128xf32>
    %154 = arith.mulf %152, %153 : vector<16x128xf32>
    %155 = vector.broadcast %136 : vector<1x128xf32> to vector<16x128xf32>
    %156 = arith.addf %154, %155 : vector<16x128xf32>
    %c0_57 = arith.constant 0 : index
    %c0_58 = arith.constant 0 : index
    %c0_59 = arith.constant 0 : index
    %157 = vector.load %arg10[%c0_57, %c0_58, %c0_59] : memref<1x128x128xbf16, #tpu.memory_space<vmem>>, vector<1x128x128xbf16>
    %158 = vector.shape_cast %157 : vector<1x128x128xbf16> to vector<128x128xbf16>
    %c0_60 = arith.constant 0 : index
    %c0_61 = arith.constant 0 : index
    %c0_62 = arith.constant 0 : index
    %159 = vector.load %arg11[%c0_60, %c0_61, %c0_62] : memref<1x1x128xf32, #tpu.memory_space<vmem>>, vector<1x1x128xf32>
    %160 = vector.shape_cast %159 : vector<1x1x128xf32> to vector<1x128xf32>
    %161 = arith.truncf %156 : vector<16x128xf32> to vector<16x128xbf16>
    %cst_63 = arith.constant dense<0.000000e+00> : vector<16x128xf32>
    %162 = tpu.matmul %161, %158, %cst_63 {dimension_numbers = #tpu.dot_dimension_numbers<[1], [0], [0], [1], [0, 0, 1, 1], [], []>} : vector<16x128xbf16>, vector<128x128xbf16>, vector<16x128xf32> -> vector<16x128xf32>
    %163 = vector.broadcast %160 : vector<1x128xf32> to vector<16x128xf32>
    %164 = arith.addf %162, %163 : vector<16x128xf32>
    %c0_64 = arith.constant 0 : index
    %c0_65 = arith.constant 0 : index
    %c0_66 = arith.constant 0 : index
    %165 = vector.load %arg12[%c0_64, %c0_65, %c0_66] : memref<1x128x256xbf16, #tpu.memory_space<vmem>>, vector<1x128x256xbf16>
    %166 = vector.shape_cast %165 : vector<1x128x256xbf16> to vector<128x256xbf16>
    %c0_67 = arith.constant 0 : index
    %c0_68 = arith.constant 0 : index
    %c0_69 = arith.constant 0 : index
    %167 = vector.load %arg13[%c0_67, %c0_68, %c0_69] : memref<1x1x256xf32, #tpu.memory_space<vmem>>, vector<1x1x256xf32>
    %168 = vector.shape_cast %167 : vector<1x1x256xf32> to vector<1x256xf32>
    %169 = arith.truncf %45 : vector<32x128xf32> to vector<32x128xbf16>
    %cst_70 = arith.constant dense<0.000000e+00> : vector<32x256xf32>
    %170 = tpu.matmul %169, %166, %cst_70 {dimension_numbers = #tpu.dot_dimension_numbers<[1], [0], [0], [1], [0, 0, 1, 1], [], []>} : vector<32x128xbf16>, vector<128x256xbf16>, vector<32x256xf32> -> vector<32x256xf32>
    %171 = vector.broadcast %168 : vector<1x256xf32> to vector<32x256xf32>
    %172 = arith.addf %170, %171 : vector<32x256xf32>
    %173 = vector.extract_strided_slice %172 {offsets = [0, 0], sizes = [32, 128], strides = [1, 1]} : vector<32x256xf32> to vector<32x128xf32>
    %174 = vector.extract_strided_slice %172 {offsets = [0, 128], sizes = [32, 128], strides = [1, 1]} : vector<32x256xf32> to vector<32x128xf32>
    %175 = vector.extract_strided_slice %164 {offsets = [0, 0], sizes = [8, 128], strides = [1, 1]} : vector<16x128xf32> to vector<8x128xf32>
    %176 = vector.extract_strided_slice %173 {offsets = [0, 0], sizes = [16, 128], strides = [1, 1]} : vector<32x128xf32> to vector<16x128xf32>
    %177 = arith.truncf %176 : vector<16x128xf32> to vector<16x128xbf16>
    %178 = vector.extract_strided_slice %174 {offsets = [0, 0], sizes = [16, 128], strides = [1, 1]} : vector<32x128xf32> to vector<16x128xf32>
    %179 = arith.truncf %178 : vector<16x128xf32> to vector<16x128xbf16>
    %180 = tpu.concatenate %175, %175, %175, %175 in 0 : vector<8x128xf32>, vector<8x128xf32>, vector<8x128xf32>, vector<8x128xf32> -> vector<32x128xf32>
    %181 = arith.mulf %180, %33 : vector<32x128xf32>
    %182 = arith.truncf %181 : vector<32x128xf32> to vector<32x128xbf16>
    %cst_71 = arith.constant dense<0.000000e+00> : vector<32x16xf32>
    %183 = tpu.matmul %182, %177, %cst_71 {dimension_numbers = #tpu.dot_dimension_numbers<[1], [1], [0], [0], [0, 0, 1, 0], [], []>} : vector<32x128xbf16>, vector<16x128xbf16>, vector<32x16xf32> -> vector<32x16xf32>
    %cst_72 = arith.constant 0.176776692 : f32
    %184 = vector.broadcast %cst_72 : f32 to vector<32x16xf32>
    %185 = arith.mulf %183, %184 : vector<32x16xf32>
    %cst_73 = arith.constant dense<0xFF800000> : vector<32xf32>
    %186 = vector.multi_reduction <maximumf>, %185, %cst_73 [1] : vector<32x16xf32> to vector<32xf32>
    %187 = vector.shape_cast %186 : vector<32xf32> to vector<32x1xf32>
    %188 = vector.broadcast %187 : vector<32x1xf32> to vector<32x16xf32>
    %189 = arith.subf %185, %188 : vector<32x16xf32>
    %190 = math.exp %189 : vector<32x16xf32>
    %cst_74 = arith.constant dense<0.000000e+00> : vector<32xf32>
    %191 = vector.multi_reduction <add>, %190, %cst_74 [1] : vector<32x16xf32> to vector<32xf32>
    %192 = vector.shape_cast %191 : vector<32xf32> to vector<32x1xf32>
    %193 = tpu.reciprocal %192 {approx = true} : vector<32x1xf32> -> vector<32x1xf32>
    %194 = vector.broadcast %193 : vector<32x1xf32> to vector<32x16xf32>
    %195 = arith.mulf %190, %194 : vector<32x16xf32>
    %196 = arith.truncf %195 : vector<32x16xf32> to vector<32x16xbf16>
    %cst_75 = arith.constant dense<0.000000e+00> : vector<32x128xf32>
    %197 = tpu.matmul %196, %179, %cst_75 {dimension_numbers = #tpu.dot_dimension_numbers<[1], [0], [0], [1], [0, 0, 1, 1], [], []>} : vector<32x16xbf16>, vector<16x128xbf16>, vector<32x128xf32> -> vector<32x128xf32>
    %198 = arith.mulf %197, %33 : vector<32x128xf32>
    %199 = vector.extract_strided_slice %198 {offsets = [0, 0], sizes = [8, 128], strides = [1, 1]} : vector<32x128xf32> to vector<8x128xf32>
    %200 = vector.extract_strided_slice %198 {offsets = [8, 0], sizes = [8, 128], strides = [1, 1]} : vector<32x128xf32> to vector<8x128xf32>
    %201 = arith.addf %199, %200 : vector<8x128xf32>
    %202 = vector.extract_strided_slice %198 {offsets = [16, 0], sizes = [8, 128], strides = [1, 1]} : vector<32x128xf32> to vector<8x128xf32>
    %203 = arith.addf %201, %202 : vector<8x128xf32>
    %204 = vector.extract_strided_slice %198 {offsets = [24, 0], sizes = [8, 128], strides = [1, 1]} : vector<32x128xf32> to vector<8x128xf32>
    %205 = arith.addf %203, %204 : vector<8x128xf32>
    %c0_76 = arith.constant 0 : index
    %c0_77 = arith.constant 0 : index
    %206 = vector.load %arg28[%c0_76, %c0_77] : memref<16x128xf32, #tpu.memory_space<vmem>>, vector<8x128xf32>
    tpu.vector_store %arg28[%c0_76, %c0_77], %205 {strides = array<i32>} : memref<16x128xf32, #tpu.memory_space<vmem>>, vector<8x128xf32>,
    %207 = vector.extract_strided_slice %164 {offsets = [8, 0], sizes = [8, 128], strides = [1, 1]} : vector<16x128xf32> to vector<8x128xf32>
    %208 = vector.extract_strided_slice %173 {offsets = [16, 0], sizes = [16, 128], strides = [1, 1]} : vector<32x128xf32> to vector<16x128xf32>
    %209 = arith.truncf %208 : vector<16x128xf32> to vector<16x128xbf16>
    %210 = vector.extract_strided_slice %174 {offsets = [16, 0], sizes = [16, 128], strides = [1, 1]} : vector<32x128xf32> to vector<16x128xf32>
    %211 = arith.truncf %210 : vector<16x128xf32> to vector<16x128xbf16>
    %212 = tpu.concatenate %207, %207, %207, %207 in 0 : vector<8x128xf32>, vector<8x128xf32>, vector<8x128xf32>, vector<8x128xf32> -> vector<32x128xf32>
    %213 = arith.mulf %212, %33 : vector<32x128xf32>
    %214 = arith.truncf %213 : vector<32x128xf32> to vector<32x128xbf16>
    %cst_78 = arith.constant dense<0.000000e+00> : vector<32x16xf32>
    %215 = tpu.matmul %214, %209, %cst_78 {dimension_numbers = #tpu.dot_dimension_numbers<[1], [1], [0], [0], [0, 0, 1, 0], [], []>} : vector<32x128xbf16>, vector<16x128xbf16>, vector<32x16xf32> -> vector<32x16xf32>
    %cst_79 = arith.constant 0.176776692 : f32
    %216 = vector.broadcast %cst_79 : f32 to vector<32x16xf32>
    %217 = arith.mulf %215, %216 : vector<32x16xf32>
    %cst_80 = arith.constant dense<0xFF800000> : vector<32xf32>
    %218 = vector.multi_reduction <maximumf>, %217, %cst_80 [1] : vector<32x16xf32> to vector<32xf32>
    %219 = vector.shape_cast %218 : vector<32xf32> to vector<32x1xf32>
    %220 = vector.broadcast %219 : vector<32x1xf32> to vector<32x16xf32>
    %221 = arith.subf %217, %220 : vector<32x16xf32>
    %222 = math.exp %221 : vector<32x16xf32>
    %cst_81 = arith.constant dense<0.000000e+00> : vector<32xf32>
    %223 = vector.multi_reduction <add>, %222, %cst_81 [1] : vector<32x16xf32> to vector<32xf32>
    %224 = vector.shape_cast %223 : vector<32xf32> to vector<32x1xf32>
    %225 = tpu.reciprocal %224 {approx = true} : vector<32x1xf32> -> vector<32x1xf32>
    %226 = vector.broadcast %225 : vector<32x1xf32> to vector<32x16xf32>
    %227 = arith.mulf %222, %226 : vector<32x16xf32>
    %228 = arith.truncf %227 : vector<32x16xf32> to vector<32x16xbf16>
    %cst_82 = arith.constant dense<0.000000e+00> : vector<32x128xf32>
    %229 = tpu.matmul %228, %211, %cst_82 {dimension_numbers = #tpu.dot_dimension_numbers<[1], [0], [0], [1], [0, 0, 1, 1], [], []>} : vector<32x16xbf16>, vector<16x128xbf16>, vector<32x128xf32> -> vector<32x128xf32>
    %230 = arith.mulf %229, %33 : vector<32x128xf32>
    %231 = vector.extract_strided_slice %230 {offsets = [0, 0], sizes = [8, 128], strides = [1, 1]} : vector<32x128xf32> to vector<8x128xf32>
    %232 = vector.extract_strided_slice %230 {offsets = [8, 0], sizes = [8, 128], strides = [1, 1]} : vector<32x128xf32> to vector<8x128xf32>
    %233 = arith.addf %231, %232 : vector<8x128xf32>
    %234 = vector.extract_strided_slice %230 {offsets = [16, 0], sizes = [8, 128], strides = [1, 1]} : vector<32x128xf32> to vector<8x128xf32>
    %235 = arith.addf %233, %234 : vector<8x128xf32>
    %236 = vector.extract_strided_slice %230 {offsets = [24, 0], sizes = [8, 128], strides = [1, 1]} : vector<32x128xf32> to vector<8x128xf32>
    %237 = arith.addf %235, %236 : vector<8x128xf32>
    %c8_83 = arith.constant 8 : index
    %c0_84 = arith.constant 0 : index
    %238 = vector.load %arg28[%c8_83, %c0_84] : memref<16x128xf32, #tpu.memory_space<vmem>>, vector<8x128xf32>
    tpu.vector_store %arg28[%c8_83, %c0_84], %237 {strides = array<i32>} : memref<16x128xf32, #tpu.memory_space<vmem>>, vector<8x128xf32>,
    %c0_85 = arith.constant 0 : index
    %c0_86 = arith.constant 0 : index
    %239 = vector.load %arg28[%c0_85, %c0_86] : memref<16x128xf32, #tpu.memory_space<vmem>>, vector<16x128xf32>
    %c0_87 = arith.constant 0 : index
    %c0_88 = arith.constant 0 : index
    %c0_89 = arith.constant 0 : index
    %240 = vector.load %arg14[%c0_87, %c0_88, %c0_89] : memref<1x128x128xbf16, #tpu.memory_space<vmem>>, vector<1x128x128xbf16>
    %241 = vector.shape_cast %240 : vector<1x128x128xbf16> to vector<128x128xbf16>
    %c0_90 = arith.constant 0 : index
    %c0_91 = arith.constant 0 : index
    %c0_92 = arith.constant 0 : index
    %242 = vector.load %arg15[%c0_90, %c0_91, %c0_92] : memref<1x1x128xf32, #tpu.memory_space<vmem>>, vector<1x1x128xf32>
    %243 = vector.shape_cast %242 : vector<1x1x128xf32> to vector<1x128xf32>
    %244 = arith.truncf %239 : vector<16x128xf32> to vector<16x128xbf16>
    %cst_93 = arith.constant dense<0.000000e+00> : vector<16x128xf32>
    %245 = tpu.matmul %244, %241, %cst_93 {dimension_numbers = #tpu.dot_dimension_numbers<[1], [0], [0], [1], [0, 0, 1, 1], [], []>} : vector<16x128xbf16>, vector<128x128xbf16>, vector<16x128xf32> -> vector<16x128xf32>
    %246 = vector.broadcast %243 : vector<1x128xf32> to vector<16x128xf32>
    %247 = arith.addf %245, %246 : vector<16x128xf32>
    %248 = arith.addf %156, %247 : vector<16x128xf32>
    %c0_94 = arith.constant 0 : index
    %c0_95 = arith.constant 0 : index
    %c0_96 = arith.constant 0 : index
    %249 = vector.load %arg22[%c0_94, %c0_95, %c0_96] : memref<1x1x128xf32, #tpu.memory_space<vmem>>, vector<1x1x128xf32>
    %250 = vector.shape_cast %249 : vector<1x1x128xf32> to vector<1x128xf32>
    %c0_97 = arith.constant 0 : index
    %c0_98 = arith.constant 0 : index
    %c0_99 = arith.constant 0 : index
    %251 = vector.load %arg23[%c0_97, %c0_98, %c0_99] : memref<1x1x128xf32, #tpu.memory_space<vmem>>, vector<1x1x128xf32>
    %252 = vector.shape_cast %251 : vector<1x1x128xf32> to vector<1x128xf32>
    %cst_100 = arith.constant dense<0.000000e+00> : vector<16xf32>
    %253 = vector.multi_reduction <add>, %248, %cst_100 [1] : vector<16x128xf32> to vector<16xf32>
    %254 = vector.shape_cast %253 : vector<16xf32> to vector<16x1xf32>
    %cst_101 = arith.constant 1.280000e+02 : f32
    %255 = vector.broadcast %cst_101 : f32 to vector<16x1xf32>
    %256 = arith.divf %254, %255 : vector<16x1xf32>
    %257 = vector.broadcast %256 : vector<16x1xf32> to vector<16x128xf32>
    %258 = arith.subf %248, %257 : vector<16x128xf32>
    %259 = arith.mulf %258, %258 : vector<16x128xf32>
    %cst_102 = arith.constant dense<0.000000e+00> : vector<16xf32>
    %260 = vector.multi_reduction <add>, %259, %cst_102 [1] : vector<16x128xf32> to vector<16xf32>
    %261 = vector.shape_cast %260 : vector<16xf32> to vector<16x1xf32>
    %cst_103 = arith.constant 1.280000e+02 : f32
    %262 = vector.broadcast %cst_103 : f32 to vector<16x1xf32>
    %263 = arith.divf %261, %262 : vector<16x1xf32>
    %cst_104 = arith.constant 9.99999974E-6 : f32
    %264 = vector.broadcast %cst_104 : f32 to vector<16x1xf32>
    %265 = arith.addf %263, %264 : vector<16x1xf32>
    %266 = math.rsqrt %265 : vector<16x1xf32>
    %267 = vector.broadcast %266 : vector<16x1xf32> to vector<16x128xf32>
    %268 = arith.mulf %258, %267 : vector<16x128xf32>
    %269 = vector.broadcast %250 : vector<1x128xf32> to vector<16x128xf32>
    %270 = arith.mulf %268, %269 : vector<16x128xf32>
    %271 = vector.broadcast %252 : vector<1x128xf32> to vector<16x128xf32>
    %272 = arith.addf %270, %271 : vector<16x128xf32>
    %c0_105 = arith.constant 0 : index
    %c0_106 = arith.constant 0 : index
    %c0_107 = arith.constant 0 : index
    %273 = vector.load %arg16[%c0_105, %c0_106, %c0_107] : memref<1x128x256xbf16, #tpu.memory_space<vmem>>, vector<1x128x256xbf16>
    %274 = vector.shape_cast %273 : vector<1x128x256xbf16> to vector<128x256xbf16>
    %c0_108 = arith.constant 0 : index
    %c0_109 = arith.constant 0 : index
    %c0_110 = arith.constant 0 : index
    %275 = vector.load %arg17[%c0_108, %c0_109, %c0_110] : memref<1x1x256xf32, #tpu.memory_space<vmem>>, vector<1x1x256xf32>
    %276 = vector.shape_cast %275 : vector<1x1x256xf32> to vector<1x256xf32>
    %277 = arith.truncf %272 : vector<16x128xf32> to vector<16x128xbf16>
    %cst_111 = arith.constant dense<0.000000e+00> : vector<16x256xf32>
    %278 = tpu.matmul %277, %274, %cst_111 {dimension_numbers = #tpu.dot_dimension_numbers<[1], [0], [0], [1], [0, 0, 1, 1], [], []>} : vector<16x128xbf16>, vector<128x256xbf16>, vector<16x256xf32> -> vector<16x256xf32>
    %279 = vector.broadcast %276 : vector<1x256xf32> to vector<16x256xf32>
    %280 = arith.addf %278, %279 : vector<16x256xf32>
    %cst_112 = arith.constant 5.000000e-01 : f32
    %281 = vector.broadcast %cst_112 : f32 to vector<16x256xf32>
    %282 = arith.mulf %281, %280 : vector<16x256xf32>
    %cst_113 = arith.constant 4.471500e-02 : f32
    %283 = vector.broadcast %cst_113 : f32 to vector<16x256xf32>
    %284 = arith.mulf %283, %280 : vector<16x256xf32>
    %285 = arith.mulf %284, %280 : vector<16x256xf32>
    %286 = arith.mulf %285, %280 : vector<16x256xf32>
    %287 = arith.addf %280, %286 : vector<16x256xf32>
    %cst_114 = arith.constant 0.797884583 : f32
    %288 = vector.broadcast %cst_114 : f32 to vector<16x256xf32>
    %289 = arith.mulf %288, %287 : vector<16x256xf32>
    %290 = math.tanh %289 : vector<16x256xf32>
    %cst_115 = arith.constant 1.000000e+00 : f32
    %291 = vector.broadcast %cst_115 : f32 to vector<16x256xf32>
    %292 = arith.addf %291, %290 : vector<16x256xf32>
    %293 = arith.mulf %282, %292 : vector<16x256xf32>
    %c0_116 = arith.constant 0 : index
    %c0_117 = arith.constant 0 : index
    %c0_118 = arith.constant 0 : index
    %294 = vector.load %arg18[%c0_116, %c0_117, %c0_118] : memref<1x256x128xbf16, #tpu.memory_space<vmem>>, vector<1x256x128xbf16>
    %295 = vector.shape_cast %294 : vector<1x256x128xbf16> to vector<256x128xbf16>
    %c0_119 = arith.constant 0 : index
    %c0_120 = arith.constant 0 : index
    %c0_121 = arith.constant 0 : index
    %296 = vector.load %arg19[%c0_119, %c0_120, %c0_121] : memref<1x1x128xf32, #tpu.memory_space<vmem>>, vector<1x1x128xf32>
    %297 = vector.shape_cast %296 : vector<1x1x128xf32> to vector<1x128xf32>
    %298 = arith.truncf %293 : vector<16x256xf32> to vector<16x256xbf16>
    %cst_122 = arith.constant dense<0.000000e+00> : vector<16x128xf32>
    %299 = tpu.matmul %298, %295, %cst_122 {dimension_numbers = #tpu.dot_dimension_numbers<[1], [0], [0], [1], [0, 0, 1, 1], [], []>} : vector<16x256xbf16>, vector<256x128xbf16>, vector<16x128xf32> -> vector<16x128xf32>
    %300 = vector.broadcast %297 : vector<1x128xf32> to vector<16x128xf32>
    %301 = arith.addf %299, %300 : vector<16x128xf32>
    %302 = arith.addf %272, %301 : vector<16x128xf32>
    %c0_123 = arith.constant 0 : index
    %c0_124 = arith.constant 0 : index
    %c0_125 = arith.constant 0 : index
    %303 = vector.load %arg24[%c0_123, %c0_124, %c0_125] : memref<1x1x128xf32, #tpu.memory_space<vmem>>, vector<1x1x128xf32>
    %304 = vector.shape_cast %303 : vector<1x1x128xf32> to vector<1x128xf32>
    %c0_126 = arith.constant 0 : index
    %c0_127 = arith.constant 0 : index
    %c0_128 = arith.constant 0 : index
    %305 = vector.load %arg25[%c0_126, %c0_127, %c0_128] : memref<1x1x128xf32, #tpu.memory_space<vmem>>, vector<1x1x128xf32>
    %306 = vector.shape_cast %305 : vector<1x1x128xf32> to vector<1x128xf32>
    %cst_129 = arith.constant dense<0.000000e+00> : vector<16xf32>
    %307 = vector.multi_reduction <add>, %302, %cst_129 [1] : vector<16x128xf32> to vector<16xf32>
    %308 = vector.shape_cast %307 : vector<16xf32> to vector<16x1xf32>
    %cst_130 = arith.constant 1.280000e+02 : f32
    %309 = vector.broadcast %cst_130 : f32 to vector<16x1xf32>
    %310 = arith.divf %308, %309 : vector<16x1xf32>
    %311 = vector.broadcast %310 : vector<16x1xf32> to vector<16x128xf32>
    %312 = arith.subf %302, %311 : vector<16x128xf32>
    %313 = arith.mulf %312, %312 : vector<16x128xf32>
    %cst_131 = arith.constant dense<0.000000e+00> : vector<16xf32>
    %314 = vector.multi_reduction <add>, %313, %cst_131 [1] : vector<16x128xf32> to vector<16xf32>
    %315 = vector.shape_cast %314 : vector<16xf32> to vector<16x1xf32>
    %cst_132 = arith.constant 1.280000e+02 : f32
    %316 = vector.broadcast %cst_132 : f32 to vector<16x1xf32>
    %317 = arith.divf %315, %316 : vector<16x1xf32>
    %cst_133 = arith.constant 9.99999974E-6 : f32
    %318 = vector.broadcast %cst_133 : f32 to vector<16x1xf32>
    %319 = arith.addf %317, %318 : vector<16x1xf32>
    %320 = math.rsqrt %319 : vector<16x1xf32>
    %321 = vector.broadcast %320 : vector<16x1xf32> to vector<16x128xf32>
    %322 = arith.mulf %312, %321 : vector<16x128xf32>
    %323 = vector.broadcast %304 : vector<1x128xf32> to vector<16x128xf32>
    %324 = arith.mulf %322, %323 : vector<16x128xf32>
    %325 = vector.broadcast %306 : vector<1x128xf32> to vector<16x128xf32>
    %326 = arith.addf %324, %325 : vector<16x128xf32>
    %c0_134 = arith.constant 0 : index
    %c0_135 = arith.constant 0 : index
    %327 = vector.load %arg27[%c0_134, %c0_135] : memref<16x128xf32, #tpu.memory_space<vmem>>, vector<16x128xf32>
    tpu.vector_store %arg27[%c0_134, %c0_135], %326 {strides = array<i32>} : memref<16x128xf32, #tpu.memory_space<vmem>>, vector<16x128xf32>,
    %c1_i32 = arith.constant 1 : i32
    %328 = arith.cmpi eq, %arg0, %c1_i32 : i32
    %329 = arith.extui %328 : i1 to i32
    %c0_i32_136 = arith.constant 0 : i32
    %330 = arith.cmpi ne, %329, %c0_i32_136 : i32
    scf.if %330 {
      %c0_137 = arith.constant 0 : index
      %c0_138 = arith.constant 0 : index
      %331 = vector.load %arg26[%c0_137, %c0_138] : memref<16x128xf32, #tpu.memory_space<vmem>>, vector<16x128xf32>
      tpu.vector_store %arg26[%c0_137, %c0_138], %326 {strides = array<i32>} : memref<16x128xf32, #tpu.memory_space<vmem>>, vector<16x128xf32>,
    } else {
    }
    return
  }
  func.func @transform_0(%arg0: i32) -> (i32, i32) {
    %c0_i32 = arith.constant 0 : i32
    %c0_i32_0 = arith.constant 0 : i32
    %c0_i32_1 = arith.constant 0 : i32
    return %c0_i32, %c0_i32_0 : i32, i32
  }
  func.func @transform_1(%arg0: i32) -> (i32, i32) {
    %c0_i32 = arith.constant 0 : i32
    %c0_i32_0 = arith.constant 0 : i32
    %c0_i32_1 = arith.constant 0 : i32
    return %c0_i32, %c0_i32_0 : i32, i32
  }
  func.func @transform_2(%arg0: i32) -> (i32, i32) {
    %c0_i32 = arith.constant 0 : i32
    %c0_i32_0 = arith.constant 0 : i32
    %c0_i32_1 = arith.constant 0 : i32
    return %c0_i32, %c0_i32_0 : i32, i32
  }
  func.func @transform_3(%arg0: i32) -> (i32, i32) {
    %c0_i32 = arith.constant 0 : i32
    %c0_i32_0 = arith.constant 0 : i32
    %c0_i32_1 = arith.constant 0 : i32
    return %c0_i32, %c0_i32_0 : i32, i32
  }
  func.func @transform_4(%arg0: i32) -> (i32, i32) {
    %c0_i32 = arith.constant 0 : i32
    %c0_i32_0 = arith.constant 0 : i32
    %c0_i32_1 = arith.constant 0 : i32
    return %c0_i32, %c0_i32_0 : i32, i32
  }
  func.func @transform_5(%arg0: i32) -> (i32, i32, i32) {
    %c0_i32 = arith.constant 0 : i32
    %c0_i32_0 = arith.constant 0 : i32
    %c0_i32_1 = arith.constant 0 : i32
    return %arg0, %c0_i32, %c0_i32_0 : i32, i32, i32
  }
  func.func @transform_6(%arg0: i32) -> (i32, i32, i32) {
    %c0_i32 = arith.constant 0 : i32
    %c0_i32_0 = arith.constant 0 : i32
    %c0_i32_1 = arith.constant 0 : i32
    return %arg0, %c0_i32, %c0_i32_0 : i32, i32, i32
  }
  func.func @transform_7(%arg0: i32) -> (i32, i32, i32) {
    %c0_i32 = arith.constant 0 : i32
    %c0_i32_0 = arith.constant 0 : i32
    %c0_i32_1 = arith.constant 0 : i32
    return %arg0, %c0_i32, %c0_i32_0 : i32, i32, i32
  }
  func.func @transform_8(%arg0: i32) -> (i32, i32, i32) {
    %c0_i32 = arith.constant 0 : i32
    %c0_i32_0 = arith.constant 0 : i32
    %c0_i32_1 = arith.constant 0 : i32
    return %arg0, %c0_i32, %c0_i32_0 : i32, i32, i32
  }
  func.func @transform_9(%arg0: i32) -> (i32, i32, i32) {
    %c0_i32 = arith.constant 0 : i32
    %c0_i32_0 = arith.constant 0 : i32
    %c0_i32_1 = arith.constant 0 : i32
    return %arg0, %c0_i32, %c0_i32_0 : i32, i32, i32
  }
  func.func @transform_10(%arg0: i32) -> (i32, i32, i32) {
    %c0_i32 = arith.constant 0 : i32
    %c0_i32_0 = arith.constant 0 : i32
    %c0_i32_1 = arith.constant 0 : i32
    return %arg0, %c0_i32, %c0_i32_0 : i32, i32, i32
  }
  func.func @transform_11(%arg0: i32) -> (i32, i32, i32) {
    %c0_i32 = arith.constant 0 : i32
    %c0_i32_0 = arith.constant 0 : i32
    %c0_i32_1 = arith.constant 0 : i32
    return %arg0, %c0_i32, %c0_i32_0 : i32, i32, i32
  }
  func.func @transform_12(%arg0: i32) -> (i32, i32, i32) {
    %c0_i32 = arith.constant 0 : i32
    %c0_i32_0 = arith.constant 0 : i32
    %c0_i32_1 = arith.constant 0 : i32
    return %arg0, %c0_i32, %c0_i32_0 : i32, i32, i32
  }
  func.func @transform_13(%arg0: i32) -> (i32, i32, i32) {
    %c0_i32 = arith.constant 0 : i32
    %c0_i32_0 = arith.constant 0 : i32
    %c0_i32_1 = arith.constant 0 : i32
    return %arg0, %c0_i32, %c0_i32_0 : i32, i32, i32
  }
  func.func @transform_14(%arg0: i32) -> (i32, i32, i32) {
    %c0_i32 = arith.constant 0 : i32
    %c0_i32_0 = arith.constant 0 : i32
    %c0_i32_1 = arith.constant 0 : i32
    return %arg0, %c0_i32, %c0_i32_0 : i32, i32, i32
  }
  func.func @transform_15(%arg0: i32) -> (i32, i32, i32) {
    %c0_i32 = arith.constant 0 : i32
    %c0_i32_0 = arith.constant 0 : i32
    %c0_i32_1 = arith.constant 0 : i32
    return %arg0, %c0_i32, %c0_i32_0 : i32, i32, i32
  }
  func.func @transform_16(%arg0: i32) -> (i32, i32, i32) {
    %c0_i32 = arith.constant 0 : i32
    %c0_i32_0 = arith.constant 0 : i32
    %c0_i32_1 = arith.constant 0 : i32
    return %arg0, %c0_i32, %c0_i32_0 : i32, i32, i32
  }
  func.func @transform_17(%arg0: i32) -> (i32, i32, i32) {
    %c0_i32 = arith.constant 0 : i32
    %c0_i32_0 = arith.constant 0 : i32
    %c0_i32_1 = arith.constant 0 : i32
    return %arg0, %c0_i32, %c0_i32_0 : i32, i32, i32
  }
  func.func @transform_18(%arg0: i32) -> (i32, i32, i32) {
    %c0_i32 = arith.constant 0 : i32
    %c0_i32_0 = arith.constant 0 : i32
    %c0_i32_1 = arith.constant 0 : i32
    return %arg0, %c0_i32, %c0_i32_0 : i32, i32, i32
  }
  func.func @transform_19(%arg0: i32) -> (i32, i32, i32) {
    %c0_i32 = arith.constant 0 : i32
    %c0_i32_0 = arith.constant 0 : i32
    %c0_i32_1 = arith.constant 0 : i32
    return %arg0, %c0_i32, %c0_i32_0 : i32, i32, i32
  }
  func.func @transform_20(%arg0: i32) -> (i32, i32, i32) {
    %c0_i32 = arith.constant 0 : i32
    %c0_i32_0 = arith.constant 0 : i32
    %c0_i32_1 = arith.constant 0 : i32
    return %arg0, %c0_i32, %c0_i32_0 : i32, i32, i32
  }
  func.func @transform_21(%arg0: i32) -> (i32, i32, i32) {
    %c0_i32 = arith.constant 0 : i32
    %c0_i32_0 = arith.constant 0 : i32
    %c0_i32_1 = arith.constant 0 : i32
    return %arg0, %c0_i32, %c0_i32_0 : i32, i32, i32
  }
  func.func @transform_22(%arg0: i32) -> (i32, i32, i32) {
    %c0_i32 = arith.constant 0 : i32
    %c0_i32_0 = arith.constant 0 : i32
    %c0_i32_1 = arith.constant 0 : i32
    return %arg0, %c0_i32, %c0_i32_0 : i32, i32, i32
  }
  func.func @transform_23(%arg0: i32) -> (i32, i32, i32) {
    %c0_i32 = arith.constant 0 : i32
    %c0_i32_0 = arith.constant 0 : i32
    %c0_i32_1 = arith.constant 0 : i32
    return %arg0, %c0_i32, %c0_i32_0 : i32, i32, i32
  }
  func.func @transform_24(%arg0: i32) -> (i32, i32, i32) {
    %c0_i32 = arith.constant 0 : i32
    %c0_i32_0 = arith.constant 0 : i32
    %c0_i32_1 = arith.constant 0 : i32
    return %arg0, %c0_i32, %c0_i32_0 : i32, i32, i32
  }
  func.func @transform_25(%arg0: i32) -> (i32, i32) {
    %c0_i32 = arith.constant 0 : i32
    %c0_i32_0 = arith.constant 0 : i32
    %c0_i32_1 = arith.constant 0 : i32
    return %c0_i32, %c0_i32_0 : i32, i32
  }
}

</mosaic_0001>

<bundles_post_ra>
// kernel: transformer_decoder_v1_forward.1
= control target key start
LH: loop header
LB: loop body
LE: loop exit
PB: predicated region body
PF: predicated region fallthrough
CT: control target
= control target key end

     0   :  { %s5388_s0 = inlined_call_operand.vmem [shape: f32[16,32], index: 0, kind: input, shape index: {}]   ;;  %s5389_s1 = inlined_call_operand.vmem [shape: f32[32,128], index: 1, kind: input, shape index: {}]   ;;  %s5390_s2 = inlined_call_operand.vmem [shape: f32[16,128], index: 2, kind: input, shape index: {}]   ;;  %s5391_s3 = inlined_call_operand.vmem [shape: bf16[32,128], index: 3, kind: input, shape index: {}]   ;;  %s5392_s4 = inlined_call_operand.vmem [shape: f32[1,128], index: 4, kind: input, shape index: {}]   ;;  %s5393_s5 = inlined_call_operand.hbm [shape: bf16[2,128,384], index: 5, kind: input, shape index: {}]   ;;  %s5394_s6 = inlined_call_operand.vmem [shape: f32[2,1,384], index: 6, kind: input, shape index: {}]   ;;  %s5395_s7 = inlined_call_operand.vmem [shape: bf16[2,128,128], index: 7, kind: input, shape index: {}]   ;;  %s5396_s8 = inlined_call_operand.vmem [shape: f32[2,1,128], index: 8, kind: input, shape index: {}]   ;;  %s5397_s9 = inlined_call_operand.hbm [shape: bf16[2,128,128], index: 9, kind: input, shape index: {}]   ;;  %s5398_s10 = inlined_call_operand.vmem [shape: f32[2,1,128], index: 10, kind: input, shape index: {}]   ;;  %s5399_s11 = inlined_call_operand.hbm [shape: bf16[2,128,256], index: 11, kind: input, shape index: {}]   ;;  %s5400_s12 = inlined_call_operand.vmem [shape: f32[2,1,256], index: 12, kind: input, shape index: {}]   ;;  %s5401_s13 = inlined_call_operand.hbm [shape: bf16[2,128,128], index: 13, kind: input, shape index: {}]   ;;  %s5402_s14 = inlined_call_operand.vmem [shape: f32[2,1,128], index: 14, kind: input, shape index: {}]   ;;  %s5403_s15 = inlined_call_operand.hbm [shape: bf16[2,128,256], index: 15, kind: input, shape index: {}]   ;;  %s5404_s16 = inlined_call_operand.vmem [shape: f32[2,1,256], index: 16, kind: input, shape index: {}]   ;;  %s5405_s17 = inlined_call_operand.hbm [shape: bf16[2,256,128], index: 17, kind: input, shape index: {}]   ;;  %s5406_s18 = inlined_call_operand.vmem [shape: f32[2,1,128], index: 18, kind: input, shape index: {}]   ;;  %s5407_s19 = inlined_call_operand.vmem [shape: f32[2,1,128], index: 19, kind: input, shape index: {}]   ;;  %s5408_s20 = inlined_call_operand.vmem [shape: f32[2,1,128], index: 20, kind: input, shape index: {}]   ;;  %s5409_s21 = inlined_call_operand.vmem [shape: f32[2,1,128], index: 21, kind: input, shape index: {}]   ;;  %s5410_s22 = inlined_call_operand.vmem [shape: f32[2,1,128], index: 22, kind: input, shape index: {}]   ;;  %s5411_s23 = inlined_call_operand.vmem [shape: f32[2,1,128], index: 23, kind: input, shape index: {}]   ;;  %s5412_s24 = inlined_call_operand.vmem [shape: f32[2,1,128], index: 24, kind: input, shape index: {}]   ;;  %s5413_s25 = inlined_call_operand.vmem [shape: f32[16,128], index: 25, kind: output, shape index: {}]  }
   0x1   :  { %5438 = sst [smem:[#allocation26_spill]] %s5388_s0 }
   0x2   :  { %5439 = sst [smem:[#allocation27_spill]] %s5389_s1 }
   0x3   :  { %5440 = sst [smem:[#allocation28_spill]] %s5390_s2 }
   0x4   :  { %5441 = sst [smem:[#allocation29_spill]] %s5391_s3 }
   0x5   :  { %5442 = sst [smem:[#allocation30_spill]] %s5392_s4 }
   0x6   :  { %5443 = sst [smem:[#allocation31_spill]] %s5393_s5 }
   0x7   :  { %5444 = sst [smem:[#allocation32_spill]] %s5394_s6 }
   0x8   :  { %5445 = sst [smem:[#allocation33_spill]] %s5395_s7 }
   0x9   :  { %5446 = sst [smem:[#allocation34_spill]] %s5396_s8 }
   0xa   :  { %5447 = sst [smem:[#allocation35_spill]] %s5397_s9 }
   0xb   :  { %5448 = sst [smem:[#allocation36_spill]] %s5399_s11 }
   0xc   :  { %5449 = sst [smem:[#allocation37_spill]] %s5400_s12 }
   0xd   :  { %5450 = sst [smem:[#allocation38_spill]] %s5401_s13 }
   0xe   :  { %5451 = sst [smem:[#allocation39_spill]] %s5402_s14 }
   0xf   :  { %5452 = sst [smem:[#allocation40_spill]] %s5403_s15 }
  0x10   :  { %5453 = sst [smem:[#allocation41_spill]] %s5404_s16 }
  0x11   :  { %5454 = sst [smem:[#allocation42_spill]] %s5405_s17 }
  0x12   :  { %5455 = sst [smem:[#allocation43_spill]] %s5406_s18 }
  0x13   :  { %5456 = sst [smem:[#allocation44_spill]] %s5407_s19 }
  0x14   :  { %5457 = sst [smem:[#allocation45_spill]] %s5408_s20 }
  0x15   :  { %5458 = sst [smem:[#allocation46_spill]] %s5409_s21 }
  0x16   :  { %5459 = sst [smem:[#allocation47_spill]] %s5410_s22 }
  0x17   :  { %5460 = sst [smem:[#allocation48_spill]] %s5411_s23 }
  0x18   :  { %5461 = sst [smem:[#allocation49_spill]] %s5412_s24 }
  0x19   :  { %5462 = sst [smem:[#allocation50_spill]] %s5413_s25 }
  0x1a   :  { %30 = vsyncpa [#allocation5], 0 }
  0x1b   :  { %32 = vsyncpa [#allocation5 + $0x1], 0 }
  0x1c   :  { %33 = vsyncpa [#allocation7], 0 }
  0x1d   :  { %35 = vsyncpa [#allocation7 + $0x1], 0 }
  0x1e   :  { %36 = vsyncpa [#allocation10], 0 }
  0x1f   :  { %38 = vsyncpa [#allocation10 + $0x1], 0 }
  0x20   :  { %39 = vsyncpa [#allocation13], 0 }
  0x21   :  { %41 = vsyncpa [#allocation13 + $0x1], 0  ;;  %s4579_s29 = smov 0   ;;  %s4581_s2 = smov 0  }
  0x22   :  { %s4583_s6 = smov 0   ;;  %s4585_s30 = smov 0  }
  0x23 LB: > { %5463 = sst [smem:[#allocation18_spill]] %s4421_s2  ;;  %s4598_s7 = sadd.s32 4294967295, %s4429_s30   ;;  %s4429_s30 = sphi %s4585_s30, %s5525_s30   ;;  %s4425_s6 = sphi %s4583_s6, %s5528_s6   ;;  %s4421_s2 = sphi %s4581_s2, %s5527_s2   ;;  %s4417_s29 = sphi %s4579_s29, %s5526_s29  }
  0x24   : > { %5464 = sst [smem:[#allocation19_spill]] %s4425_s6  ;;  %s4601_s3 = sadd.s32 1, %s4429_s30  }
  0x25   : > { %5465 = sst [smem:[#allocation20_spill]] %s4601_s3  ;;  %s156_s26 = ssub.s32 %s4429_s30, %s4601_s3 }
  0x26   : > { %s159_s1 = sadd.s32 1, %s4425_s6  ;;  %p157_p0 = scmp.eq.s32.totalorder %s156_s26, 0 }
  0x27   : > { %p166_p1 = scmp.ne.s32.totalorder %s4425_s6, %s4421_s2  ;;  %p167_p2 = scmp.eq.s32.totalorder %s4429_s30, 0 }
  0x28   : > { %p172_p3 = scmp.ne.s32.totalorder %s4421_s2, %s4417_s29  ;;  %p173_p5 = scmp.eq.s32.totalorder %s4598_s7, 0 }
  0x29   : > { %s4611_s8 = scalar_select %p157_p0, %s4425_s6, %s159_s1  }
  0x2a   : > { %p168_p4 = por %p167_p2, %p166_p1  ;;  %p3952_p6 = scmp.lt.s32.totalorder %s4429_s30, 2 }
  0x2b   : > { %5466 = sst [smem:[#allocation21_spill]] %s4611_s8  ;;  %p4615_p7 = por %p173_p5, %p172_p3 }
  0x2c   : > { %s4620_s4 = sand.u32 1, %s4425_s6   ;;  %p4622_p8 = pnand %p3952_p6, %p168_p4 }
  0x2d   : > { %s5467_s27 = scalar_select %p4615_p7, 1, 0 }
  0x2e   : > { %s5426_s9 = sand.u32 1, %s4429_s30   ;;  %s5424_s5 = sshll.u32 %s4620_s4, 6 }
  0x2f   : > { %s5425_s0 = sshll.u32 %s4429_s30, 10  ;;  %s772_s29 = scalar_lea.vmem [#allocation6], %s5424_s5 }
  0x30   : > { %s779_s26 = sshll.u32 %s772_s29, 4  ;;  %s5469_s3 = sld [smem:[#allocation35_spill]]  ;;  %s4638_s26 = int_to_ptr.vmem [resolvable:$true] %s779_s26 }
  0x31   : > { %s4642_s6 = scalar_lea.sflag [#allocation7], %s5426_s9  ;;  %p4648_p10 = pneg %p4622_p8 }
  0x36   : > { %s4636_s25 = scalar_lea.hbm %s5469_s3, %s5425_s0  ;;  %s4208_s5 = scalar_lea.hbm %s5469_s3, 2048 }
  0x37   : > { %s4203_s24 = scalar_lea.hbm %s4636_s25, 1024  ;;  %p4209_p13 = scmp.lt.u32.totalorder %s4636_s25, %s5469_s3 }
  0x38   : > { %p4204_p9 = scmp.ne.s32.totalorder %s4636_s25, %s4203_s24  ;;  %p4210_p0 = scmp.lt.u32.totalorder %s4208_s5, %s4203_s24 }
  0x39   : > { %p4212_p2 = scmp.lt.u32.totalorder %s4203_s24, %s4636_s25 }
  0x3a   : > { %p4206_p11 = pnand %p4648_p10, %p4204_p9  ;;  %p4211_p1 = por %p4210_p0, %p4209_p13 }
  0x3c   : > { %p4207_p12 = pneg %p4206_p11  ;;  %p4213_p3 = por %p4212_p2, %p4211_p1 }
  0x3e   : > { %p4214_p4 = pnand %p4213_p3, %p4207_p12 }
  0x40   : > { %4217 = shalt.err (!%p4214_p4)
}
  0x41   : > { %s4218_s9 = scalar_lea.vmem %s4638_s26, 1024  ;;  %s4431_s8 = smov [#allocation6]  }
  0x42   : > { %p4219_p5 = scmp.ne.s32.totalorder %s4638_s26, %s4218_s9  ;;  %s4223_s1 = sshll.u32 %s4431_s8, 4  ;;  %s4224_s1 = int_to_ptr.vmem [resolvable:$false] %s4223_s1 }
  0x43   : > { %s4225_s23 = scalar_lea.vmem %s4224_s1, 2048  ;;  %p4226_p11 = scmp.lt.s32.totalorder %s4638_s26, %s4224_s1 }
  0x44   : > { %p4221_p6 = pnand %p4219_p5, %p4648_p10  ;;  %p4227_p7 = scmp.lt.s32.totalorder %s4225_s23, %s4218_s9 }
  0x46   : > { %p4222_p9 = pneg %p4221_p6  ;;  %p4228_p13 = por %p4227_p7, %p4226_p11 }
  0x48   : > { %p4229_p0 = pnand %p4228_p13, %p4222_p9 }
  0x4a   : > { %4232 = shalt.err (!%p4229_p0)
}
  0x4b   : > { %s5429_s24 = smov 64   ;;  %s5431_s5 = smov 4  }
  0x4c   : > { %3939 = dma.hbm_to_vmem [thread:$0]  (!%p4622_p8), %s4636_s25, 1024, %s4638_s26, %s4642_s6, %s5429_s24, %s5429_s24, %s5431_s5  }
  0x4d   : > { %p3556_p7 = scmp.ge.s32.totalorder %s4429_s30, 1  ;;  %p939_p12 = scmp.lt.s32.totalorder %s4429_s30, 3 }
  0x4e   : > { %s5472_s0 = sshll.u32 %s4429_s30, 10  ;;  %s5473_s13 = sld [smem:[#allocation38_spill]] }
  0x4f   : > { %p4677_p1 = pnand %p3556_p7, %p939_p12  ;;  %s5474_s3 = sshll.u32 %s4620_s4, 6 }
  0x50   : > { %s827_s22 = scalar_lea.vmem [#allocation9], %s5474_s3  ;;  %s3917_s25 = smul.u32 192, %s4620_s4 }
  0x51   : > { %s5471_s9 = scalar_select %p4677_p1, 1, 0 }
  0x52   : > { %s834_s21 = sshll.u32 %s827_s22, 4  ;;  %s5475_s26 = sand.u32 1, %s4429_s30   ;;  %s4690_s21 = int_to_ptr.vmem [resolvable:$true] %s834_s21 }
  0x53   : > { %s4695_s24 = scalar_lea.sflag [#allocation10], %s5475_s26 }
  0x54   : > { %s4686_s23 = scalar_lea.hbm %s5473_s13, %s5472_s0  ;;  %s4238_s1 = scalar_lea.hbm %s5473_s13, 2048 }
  0x55   : > { %s4233_s5 = scalar_lea.hbm %s4686_s23, 1024  ;;  %p4239_p5 = scmp.lt.u32.totalorder %s4686_s23, %s5473_s13 }
  0x56   : > { %p4234_p2 = scmp.ne.s32.totalorder %s4686_s23, %s4233_s5  ;;  %p4240_p6 = scmp.lt.u32.totalorder %s4238_s1, %s4233_s5 }
  0x57   : > { %p4242_p11 = scmp.lt.u32.totalorder %s4233_s5, %s4686_s23 }
  0x58   : > { %p4236_p3 = pnand %p4234_p2, %p4648_p10  ;;  %p4241_p9 = por %p4240_p6, %p4239_p5 }
  0x5a   : > { %p4237_p4 = pneg %p4236_p3  ;;  %p4243_p13 = por %p4242_p11, %p4241_p9 }
  0x5c   : > { %p4244_p0 = pnand %p4243_p13, %p4237_p4 }
  0x5e   : > { %4247 = shalt.err (!%p4244_p0)
}
  0x5f   : > { %s4248_s22 = scalar_lea.vmem %s4690_s21, 1024  ;;  %s4434_s3 = smov [#allocation9]  }
  0x60   : > { %p4249_p7 = scmp.ne.s32.totalorder %s4690_s21, %s4248_s22  ;;  %s4253_s26 = sshll.u32 %s4434_s3, 4  ;;  %s4254_s26 = int_to_ptr.vmem [resolvable:$false] %s4253_s26 }
  0x61   : > { %s4255_s19 = scalar_lea.vmem %s4254_s26, 2048  ;;  %p4256_p3 = scmp.lt.s32.totalorder %s4690_s21, %s4254_s26 }
  0x62   : > { %p4251_p12 = pnand %p4249_p7, %p4648_p10  ;;  %p4257_p1 = scmp.lt.s32.totalorder %s4255_s19, %s4248_s22 }
  0x64   : > { %p4252_p2 = pneg %p4251_p12  ;;  %p4258_p5 = por %p4257_p1, %p4256_p3 }
  0x66   : > { %p4259_p6 = pnand %p4258_p5, %p4252_p2 }
  0x68   : > { %4262 = shalt.err (!%p4259_p6)
}
  0x69   : > { %s5476_s20 = smov 4   ;;  %s5477_s5 = smov 64  }
  0x6a   : > { %3945 = dma.hbm_to_vmem [thread:$0]  (!%p4622_p8), %s4686_s23, 1024, %s4690_s21, %s4695_s24, %s5477_s5, %s5477_s5, %s5476_s20  }
  0x6b   : > { %s3918_s0 = smul.u32 3072, %s4429_s30  ;;  %s730_s8 = scalar_lea.vmem [#allocation4], %s3917_s25 }
  0x6c   : > { %s737_s1 = sshll.u32 %s730_s8, 4  ;;  %s5478_s26 = sld [smem:[#allocation31_spill]]  ;;  %s4730_s1 = int_to_ptr.vmem [resolvable:$true] %s737_s1 }
  0x6d   : > { %s4733_s13 = sshll.u32 %s4620_s4, 7  ;;  %s727_s18 = scalar_lea.sflag [#allocation5], %s4620_s4 }
  0x72   : > { %s4728_s19 = scalar_lea.hbm %s5478_s26, %s3918_s0  ;;  %s4268_s25 = scalar_lea.hbm %s5478_s26, 6144 }
  0x73   : > { %s4263_s16 = scalar_lea.hbm %s4728_s19, 3072  ;;  %p4269_p11 = scmp.lt.u32.totalorder %s4728_s19, %s5478_s26 }
  0x74   : > { %p4264_p1 = scmp.ne.s32.totalorder %s4728_s19, %s4263_s16  ;;  %p4270_p13 = scmp.lt.u32.totalorder %s4268_s25, %s4263_s16 }
  0x75   : > { %p4272_p7 = scmp.lt.u32.totalorder %s4263_s16, %s4728_s19 }
  0x76   : > { %p4266_p4 = pnand %p4264_p1, %p4648_p10  ;;  %p4271_p0 = por %p4270_p13, %p4269_p11 }
  0x78   : > { %p4267_p9 = pneg %p4266_p4  ;;  %p4273_p12 = por %p4272_p7, %p4271_p0 }
  0x7a   : > { %p4274_p2 = pnand %p4273_p12, %p4267_p9 }
  0x7c   : > { %4277 = shalt.err (!%p4274_p2)
}
  0x7d   : > { %s4278_s22 = scalar_lea.vmem %s4730_s1, 3072  ;;  %s4435_s3 = smov [#allocation4]  }
  0x7e   : > { %p4279_p3 = scmp.ne.s32.totalorder %s4730_s1, %s4278_s22  ;;  %s4283_s21 = sshll.u32 %s4435_s3, 4  ;;  %s4284_s21 = int_to_ptr.vmem [resolvable:$false] %s4283_s21 }
  0x7f   : > { %s4285_s23 = scalar_lea.vmem %s4284_s21, 6144  ;;  %p4286_p1 = scmp.lt.s32.totalorder %s4730_s1, %s4284_s21 }
  0x80   : > { %p4281_p5 = pnand %p4279_p3, %p4648_p10  ;;  %p4287_p4 = scmp.lt.s32.totalorder %s4285_s23, %s4278_s22 }
  0x82   : > { %p4282_p6 = pneg %p4281_p5  ;;  %p4288_p11 = por %p4287_p4, %p4286_p1 }
  0x84   : > { %p4289_p13 = pnand %p4288_p11, %p4282_p6 }
  0x86   : > { %4292 = shalt.err (!%p4289_p13)
}
  0x87   : > { %s4436_s16 = smov 192   ;;  %s4437_s25 = smov 12  }
  0x88   : > { %3936 = dma.hbm_to_vmem [thread:$0]  (!%p4622_p8), %s4728_s19, 3072, %s4730_s1, %s727_s18, %s4436_s16, %s4436_s16, %s4437_s25  }
  0x89   : > { %s4760_s0 = sshll.u32 %s4429_s30, 11  ;;  %s5479_s11 = sld [smem:[#allocation36_spill]] }
  0x8a   : > { %s799_s21 = scalar_lea.vmem [#allocation8], %s4733_s13 }
  0x8b   : > { %s806_s23 = sshll.u32 %s799_s21, 4  ;;  %s4769_s23 = int_to_ptr.vmem [resolvable:$true] %s806_s23 }
  0x8f   : > { %s4766_s3 = scalar_lea.hbm %s5479_s11, %s4760_s0  ;;  %s4298_s1 = scalar_lea.hbm %s5479_s11, 4096 }
  0x90   : > { %s4293_s26 = scalar_lea.hbm %s4766_s3, 2048  ;;  %p4299_p12 = scmp.lt.u32.totalorder %s4766_s3, %s5479_s11 }
  0x91   : > { %p4294_p9 = scmp.ne.s32.totalorder %s4766_s3, %s4293_s26  ;;  %p4300_p2 = scmp.lt.u32.totalorder %s4298_s1, %s4293_s26 }
  0x92   : > { %p4302_p5 = scmp.lt.u32.totalorder %s4293_s26, %s4766_s3 }
  0x93   : > { %p4296_p0 = pnand %p4294_p9, %p4648_p10  ;;  %p4301_p3 = por %p4300_p2, %p4299_p12 }
  0x95   : > { %p4297_p7 = pneg %p4296_p0  ;;  %p4303_p6 = por %p4302_p5, %p4301_p3 }
  0x97   : > { %p4304_p1 = pnand %p4303_p6, %p4297_p7 }
  0x99   : > { %4307 = shalt.err (!%p4304_p1)
}
  0x9a   : > { %s4308_s25 = scalar_lea.vmem %s4769_s23, 2048  ;;  %s4438_s8 = smov [#allocation8]  }
  0x9b   : > { %p4309_p4 = scmp.ne.s32.totalorder %s4769_s23, %s4308_s25  ;;  %s4313_s22 = sshll.u32 %s4438_s8, 4  ;;  %s4314_s22 = int_to_ptr.vmem [resolvable:$false] %s4313_s22 }
  0x9c   : > { %s4315_s21 = scalar_lea.vmem %s4314_s22, 4096  ;;  %p4316_p9 = scmp.lt.s32.totalorder %s4769_s23, %s4314_s22 }
  0x9d   : > { %p4311_p11 = pnand %p4309_p4, %p4648_p10  ;;  %p4317_p0 = scmp.lt.s32.totalorder %s4315_s21, %s4308_s25 }
  0x9f   : > { %p4312_p13 = pneg %p4311_p11  ;;  %p4318_p12 = por %p4317_p0, %p4316_p9 }
  0xa1   : > { %p4319_p2 = pnand %p4318_p12, %p4312_p13 }
  0xa3   : > { %4322 = shalt.err (!%p4319_p2)
}
  0xa4   : > { %s4439_s26 = smov 128   ;;  %s4440_s18 = smov 8  }
  0xa5   : > { %3942 = dma.hbm_to_vmem [thread:$0]  (!%p4622_p8), %s4766_s3, 2048, %s4769_s23, %s4642_s6, %s4439_s26, %s4439_s26, %s4440_s18  }
  0xa6   : > { %s5480_s15 = sld [smem:[#allocation40_spill]]  ;;  %s854_s16 = scalar_lea.vmem [#allocation11], %s4733_s13 }
  0xa7   : > { %s861_s25 = sshll.u32 %s854_s16, 4  ;;  %s4803_s25 = int_to_ptr.vmem [resolvable:$true] %s861_s25 }
  0xac   : > { %s4800_s19 = scalar_lea.hbm %s5480_s15, %s4760_s0  ;;  %s4328_s3 = scalar_lea.hbm %s5480_s15, 4096 }
  0xad   : > { %s4323_s8 = scalar_lea.hbm %s4800_s19, 2048  ;;  %p4329_p6 = scmp.lt.u32.totalorder %s4800_s19, %s5480_s15 }
  0xae   : > { %p4324_p7 = scmp.ne.s32.totalorder %s4800_s19, %s4323_s8  ;;  %p4330_p1 = scmp.lt.u32.totalorder %s4328_s3, %s4323_s8 }
  0xaf   : > { %p4332_p11 = scmp.lt.u32.totalorder %s4323_s8, %s4800_s19 }
  0xb0   : > { %p4326_p3 = pnand %p4324_p7, %p4648_p10  ;;  %p4331_p4 = por %p4330_p1, %p4329_p6 }
  0xb2   : > { %p4327_p5 = pneg %p4326_p3  ;;  %p4333_p13 = por %p4332_p11, %p4331_p4 }
  0xb4   : > { %p4334_p9 = pnand %p4333_p13, %p4327_p5 }
  0xb6   : > { %4337 = shalt.err (!%p4334_p9)
}
  0xb7   : > { %s4338_s30 = scalar_lea.vmem %s4803_s25, 2048  ;;  %s4441_s1 = smov [#allocation11]  }
  0xb8   : > { %p4339_p0 = scmp.ne.s32.totalorder %s4803_s25, %s4338_s30  ;;  %s4343_s16 = sshll.u32 %s4441_s1, 4  ;;  %s4344_s16 = int_to_ptr.vmem [resolvable:$false] %s4343_s16 }
  0xb9   : > { %s4345_s22 = scalar_lea.vmem %s4344_s16, 4096  ;;  %p4346_p7 = scmp.lt.s32.totalorder %s4803_s25, %s4344_s16 }
  0xba   : > { %p4341_p12 = pnand %p4339_p0, %p4648_p10  ;;  %p4347_p3 = scmp.lt.s32.totalorder %s4345_s22, %s4338_s30 }
  0xbc   : > { %p4342_p2 = pneg %p4341_p12  ;;  %p4348_p6 = por %p4347_p3, %p4346_p7 }
  0xbe   : > { %p4349_p1 = pnand %p4348_p6, %p4342_p2 }
  0xc0   : > { %4352 = shalt.err (!%p4349_p1)
}
  0xc1   : > { %3948 = dma.hbm_to_vmem [thread:$0]  (!%p4622_p8), %s4800_s19, 2048, %s4803_s25, %s4695_s24, %s4439_s26, %s4439_s26, %s4440_s18  }
  0xc2   : > { %s5481_s17 = sld [smem:[#allocation42_spill]]  ;;  %s882_s23 = scalar_lea.vmem [#allocation12], %s4733_s13 }
  0xc3   : > { %s889_s21 = sshll.u32 %s882_s23, 4  ;;  %s879_s30 = scalar_lea.sflag [#allocation13], %s4620_s4  ;;  %s4837_s21 = int_to_ptr.vmem [resolvable:$true] %s889_s21 }
  0xc8   : > { %s4834_s3 = scalar_lea.hbm %s5481_s17, %s4760_s0  ;;  %s4358_s18 = scalar_lea.hbm %s5481_s17, 4096 }
  0xc9   : > { %s4353_s1 = scalar_lea.hbm %s4834_s3, 2048  ;;  %p4359_p13 = scmp.lt.u32.totalorder %s4834_s3, %s5481_s17 }
  0xca   : > { %p4354_p5 = scmp.ne.s32.totalorder %s4834_s3, %s4353_s1  ;;  %p4360_p9 = scmp.lt.u32.totalorder %s4358_s18, %s4353_s1 }
  0xcb   : > { %p4362_p12 = scmp.lt.u32.totalorder %s4353_s1, %s4834_s3 }
  0xcc   : > { %p4356_p4 = pnand %p4354_p5, %p4648_p10  ;;  %p4361_p0 = por %p4360_p9, %p4359_p13 }
  0xce   : > { %p4357_p11 = pneg %p4356_p4  ;;  %p4363_p2 = por %p4362_p12, %p4361_p0 }
  0xd0   : > { %p4364_p7 = pnand %p4363_p2, %p4357_p11 }
  0xd2   : > { %4367 = shalt.err (!%p4364_p7)
}
  0xd3   : > { %s4368_s13 = scalar_lea.vmem %s4837_s21, 2048  ;;  %s4442_s25 = smov [#allocation12]  }
  0xd4   : > { %p4369_p3 = scmp.ne.s32.totalorder %s4837_s21, %s4368_s13  ;;  %s4373_s16 = sshll.u32 %s4442_s25, 4  ;;  %s4374_s16 = int_to_ptr.vmem [resolvable:$false] %s4373_s16 }
  0xd5   : > { %s4375_s22 = scalar_lea.vmem %s4374_s16, 4096  ;;  %p4376_p5 = scmp.lt.s32.totalorder %s4837_s21, %s4374_s16 }
  0xd6   : > { %p4371_p6 = pnand %p4369_p3, %p4648_p10  ;;  %p4377_p4 = scmp.lt.s32.totalorder %s4375_s22, %s4368_s13 }
  0xd8   : > { %p4372_p1 = pneg %p4371_p6  ;;  %p4378_p13 = por %p4377_p4, %p4376_p5 }
  0xda   : > { %p4379_p9 = pnand %p4378_p13, %p4372_p1 }
  0xdc   : > { %4382 = shalt.err (!%p4379_p9)
}
  0xdd   : > { %3951 = dma.hbm_to_vmem [thread:$0]  (!%p4622_p8), %s4834_s3, 2048, %s4837_s21, %s879_s30, %s5477_s5, %s5477_s5, %s5476_s20  }
  0xde   : > { %p5482_p10 = scmp.ne.s32.totalorder %s5471_s9, 0 }
  0xe0   : > { %943 = sbr.rel (%p5482_p10) target bundleno = 5430 (0x1536), region = 120 }
  0xe7   : > { %s945_s29 = sand.u32 1, %s4421_s2   ;;  %p5483_p11 = scmp.ne.s32.totalorder %s5467_s27, 0 }
  0xe8   : > { %s3919_s8 = smul.u32 192, %s945_s29  ;;  %s946_s6 = scalar_lea.sflag [#allocation5], %s945_s29 }
  0xea   : > { %s4869_s23 = scalar_lea.vmem [#allocation4], %s3919_s8 }
  0xeb   : > { %4400 = dma.done.wait (%p5483_p11), %s946_s6, 3072  }
  0xec   : > { %4402 = vsyncadd (%p5483_p11), %s946_s6, 4294964224  ;;  %s954_s4 = sand.u32 1, %s4598_s7   ;;  %s3557_s28 = sshll.u32 %s945_s29, 6 }
  0xed   : > { %s955_s20 = scalar_lea.sflag [#allocation7], %s954_s4  ;;  %s4876_s5 = scalar_lea.vmem [#allocation6], %s3557_s28 }
  0xee   : > { %4404 = dma.done.wait (%p5483_p11), %s955_s20, 3072  }
  0xef   : > { %4406 = vsyncadd (%p5483_p11), %s955_s20, 4294964224  ;;  %s3558_s9 = sshll.u32 %s945_s29, 7  ;;  %s973_s21 = scalar_lea.sflag [#allocation10], %s954_s4 }
  0xf0   : > { %s4882_s3 = scalar_lea.vmem [#allocation8], %s3558_s9  ;;  %s4884_s30 = scalar_lea.vmem [#allocation9], %s3557_s28 }
  0xf1   : > { %5484 = sst [smem:[#allocation22_spill]] %s4884_s30 }
  0xf2   : > { %4408 = dma.done.wait (%p5483_p11), %s973_s21, 3072  }
  0xf3   : > { %4410 = vsyncadd (%p5483_p11), %s973_s21, 4294964224  ;;  %s4890_s1 = scalar_lea.vmem [#allocation11], %s3558_s9  ;;  %s991_s24 = scalar_lea.sflag [#allocation13], %s945_s29 }
  0xf4   : > { %5485 = sst [smem:[#allocation23_spill]] %s4890_s1  ;;  %s4892_s26 = scalar_lea.vmem [#allocation12], %s3558_s9 }
  0xf5   : > { %5486 = sst [smem:[#allocation24_spill]] %s4892_s26 }
  0xf6   : > { %4412 = dma.done.wait (%p5483_p11), %s991_s24, 2048  }
  0xf7   : > { %4414 = vsyncadd (%p5483_p11), %s991_s24, 4294965248  ;;  %p1128_p8 = scmp.lt.s32.totalorder %s4598_s7, 1  ;;  %v1176_v0 = vlaneseq  ;;  %s5487_s25 = sld [smem:[#allocation33_spill]]  ;;  %v4443_v3 = vmov 0.0   ;;  %v4444_v7 = vmov -1e+30  }
  0xf8   : > { %s5489_s20 = sld [smem:[#allocation32_spill]]  ;;  %s5491_s12 = sld [smem:[#allocation37_spill]] }
  0xf9   : > { %s4900_s18 = scalar_select %p1128_p8, %s4598_s7, 1  ;;  %v1177_v1 = vand.u32 127, %v1176_v0  ;;  %v4902_v2 = vshrl.u32 %v1176_v0, 7 }
  0xfa   : > { %s5495_s13 = sld [smem:[#allocation44_spill]]  ;;  %s5496_s26 = sld [smem:[#allocation45_spill]] }
  0xfb   : > { %s3920_s0 = smul.u32 3, %s4900_s18  ;;  %s3693_s19 = sshll.u32 %s4900_s18, 6  ;;  %vm1179_vm0 = vcmp.lt.s32.totalorder %v1177_v1, 32  ;;  %vm1182_vm1 = vcmp.ge.s32.totalorder %v1177_v1, 32  ;;  %vm1183_vm2 = vcmp.lt.s32.totalorder %v1177_v1, 64  ;;  %vm1186_vm3 = vcmp.ge.s32.totalorder %v1177_v1, 64 }
  0xfc   : > { %v4916_v4 = vsel %vm1179_vm0, 1.0, %v4443_v3  ;;  %vm1184_vm4 = vmand %vm1182_vm1, %vm1183_vm2  ;;  %vm1187_vm5 = vcmp.lt.s32.totalorder %v1177_v1, 96  ;;  %vm1190_vm6 = vcmp.ge.s32.totalorder %v1177_v1, 96  ;;  %vm1196_vm7 = vcmp.le.s32.totalorder %v1177_v1, %v4902_v2  ;;  %s3564_s27 = sshll.u32 %s4900_s18, 1  ;;  %s5500_s15 = sld [smem:[#allocation49_spill]] }
  0xfd   : > { %s4909_s16 = scalar_lea.vmem %s5487_s25, %s3693_s19  ;;  %v4929_v5 = vsel %vm1184_vm4, 1.0, %v4443_v3  ;;  %vm1188_vm8 = vmand %vm1186_vm3, %vm1187_vm5  ;;  %v4932_v6 = vsel %vm1190_vm6, 1.0, %v4443_v3  ;;  %v4934_v8 = vsel %vm1196_vm7, 0.0, %v4444_v7  ;;  %s5499_s19 = sld [smem:[#allocation48_spill]] }
  0xfe   : > { %s4922_s9 = scalar_lea.vmem %s5489_s20, %s3920_s0  ;;  %v4942_v9 = vsel %vm1188_vm8, 1.0, %v4443_v3  ;;  %s4947_s8 = scalar_lea.vmem %s5491_s12, %s3564_s27 }
  0xff   : > { %s5492_s20 = sld [smem:[#allocation41_spill]]  ;;  %s5497_s12 = sld [smem:[#allocation46_spill]] }
 0x100   : > { %s1159_s25 = scalar_lea.vmem %s5495_s13, %s4900_s18  ;;  %s1162_s14 = scalar_lea.vmem %s5496_s26, %s4900_s18 }
 0x101   : > { %p3566_p0 = scmp.ne.s32.totalorder %s4598_s7, 0 }
 0x102   : > { %s1174_s0 = scalar_lea.vmem %s5500_s15, %s4900_s18  ;;  %s5501_s26 = sld [smem:[#allocation29_spill]] (!%p3566_p0)  ;;  %v4445_v11 = vmov (!%p3566_p0), 0.0   ;;  %vm4446_vm9 = vmmov (!%p3566_p0), 0   ;;  %vm1228_vm10 = vcmask (!%p3566_p0), 261120  }
 0x103   : > { %s1171_s6 = scalar_lea.vmem %s5499_s19, %s4900_s18  ;;  %3779 = vmatprep.subr.bf16.mxu0 (!%p3566_p0), %v4445_v11  ;;  %3783 = vmatprep.mubr.msk.bf16.mxu0 (!%p3566_p0), %vm4446_vm9, %v4445_v11  ;;  %s5502_s11 = sld [smem:[#allocation26_spill]] (!%p3566_p0) }
 0x104   : > { %s5504_s15 = sld [smem:[#allocation28_spill]] (!%p3566_p0) }
 0x105   : > { %s4952_s21 = scalar_lea.vmem %s5492_s20, %s3564_s27  ;;  %s1165_s1 = scalar_lea.vmem %s5497_s12, %s4900_s18 }
 0x106   : > { %5493 = sst [smem:[#allocation25_spill]] %s4952_s21  ;;  %s5498_s27 = sld [smem:[#allocation47_spill]] }
 0x107   : > { %1201 = sbr.rel (%p3566_p0) target bundleno = 491 (0x1eb), region = 148  ;;  %s5503_s20 = sld [smem:[#allocation30_spill]] (!%p3566_p0) }
 0x108   : > { %v3997_v10 = vld [vmem:[%s5501_s26] sm:$0xff] (!%p3566_p0)   ;;  %v3998_v12 = vld [vmem:[%s5501_s26 + $0x8] sm:$0xff] (!%p3566_p0)  }
 0x109   : > { %3780 = vmatpush3.bf16.msra.mxu0 (!%p3566_p0), %v3997_v10  ;;  %v1202_v13 = vld [vmem:[%s5502_s11] sm:$0xff] (!%p3566_p0)  ;;  %v1203_v14 = vld [vmem:[%s5502_s11 + $0x8] sm:$0xff] (!%p3566_p0) }
 0x10a   : > { %3781 = vmatprep.subr.bf16.mxu0 (!%p3566_p0), %v4445_v11  ;;  %v1204_v15 = vpack.c.bf16 (!%p3566_p0), %v1203_v14, %v1202_v13  ;;  %v1273_v18 = vld [vmem:[%s5504_s15] sm:$0xff] (!%p3566_p0)  ;;  %v1274_v22 = vld [vmem:[%s5504_s15 + $0x8] sm:$0xff] (!%p3566_p0) }
 0x10c   : > { %s1168_s28 = scalar_lea.vmem %s5498_s27, %s4900_s18 }
 0x10d   : > { %3782 = vmatpush3.bf16.msra.mxu0 (!%p3566_p0), %v3998_v12  ;;  %v3567_v16 = vld [vmem:[%s5503_s20] ss:$0 sm:$0xff] (!%p3566_p0) }
 0x110   : > { %3784 = vmatmul.mubr.msk.bf16.vlgmr.msra.gmra.mrb[0].mxu0 %vm1228_vm10, %v1204_v15 }
 0x1e3   : > { %v1266_v17 = vpop.f32.mrb[0].mxu0 }
 0x1e4   : > { %v1267_v19 = vadd.f32 %v3567_v16, %v1266_v17  ;;  %v3785_v20 = vpop.f32.mrb[1].mxu0 }
 0x1e5   : > { %v1269_v21 = vpop.f32.mrb[2].mxu0 }
 0x1e6   : > { %v1275_v23 = vadd.f32 %v1273_v18, %v1267_v19  ;;  %v1270_v24 = vadd.f32 %v3567_v16, %v1269_v21  ;;  %v3786_v25 = vpop.f32.mrb[3].mxu0 }
 0x1e8   : > { %1277 = vst [vmem:[#allocation2] sm:$0xff] %v1275_v23  ;;  %v1276_v26 = vadd.f32 %v1274_v22, %v1270_v24 }
 0x1ea   : > { %1278 = vst [vmem:[#allocation2 + $0x8] sm:$0xff] %v1276_v26 }
 0x1eb PF: > { %v3999_v27 = vld [vmem:[%s4869_s23 + $0x4] ss:$12 sps:$4 sm:$0xff]   ;;  %3787 = vmatprep.subr.bf16.mxu1 %v4443_v3  ;;  %v4001_v28 = vld [vmem:[%s4869_s23] ss:$12 sps:$4 sm:$0xff]   ;;  %v4447_v29 = vmov 0   ;;  %vm4448_vm11 = vmmov 0  }
 0x1ec   : > { %1495 = vmatprep.mubr.bf16.mxu0 %v4447_v29  ;;  %3803 = vmatprep.mubr.msk.bf16.mxu1 %vm4448_vm11, %v4443_v3  ;;  %v4002_v30 = vld [vmem:[%s4869_s23 + $0x1c] ss:$12 sps:$4 sm:$0xff]   ;;  %v4004_v31 = vld [vmem:[%s4869_s23 + $0x18] ss:$12 sps:$4 sm:$0xff]   ;;  %v4005_v32 = vld [vmem:[%s4869_s23 + $0x34] ss:$12 sps:$4 sm:$0xff]  }
 0x1ed   : > { %1463 = vmatprep.subr.bf16.mxu0 %v3999_v27  ;;  %v4008_v33 = vld [vmem:[%s4869_s23 + $0x8] ss:$12 sps:$4 sm:$0xff]   ;;  %v4007_v34 = vld [vmem:[%s4869_s23 + $0x30] ss:$12 sps:$4 sm:$0xff]   ;;  %v4012_v35 = vld [vmem:[%s4869_s23 + $0x20] ss:$12 sps:$4 sm:$0xff]  }
 0x1ee   : > { %1464 = vmatpush1.bf16.msra.mxu0 %v4001_v28  ;;  %3788 = vmatpush3.bf16.msra.mxu1 %v4008_v33  ;;  %v4009_v36 = vld [vmem:[%s4869_s23 + $0x4c] ss:$12 sps:$4 sm:$0xff]   ;;  %v4011_v38 = vld [vmem:[%s4869_s23 + $0x48] ss:$12 sps:$4 sm:$0xff]   ;;  %v4013_v39 = vld [vmem:[%s4869_s23 + $0x64] ss:$12 sps:$4 sm:$0xff]  }
 0x1ef   : > { %1465 = vmatprep.subr.bf16.mxu0 %v4002_v30  ;;  %3789 = vmatprep.subr.bf16.mxu1 %v4443_v3  ;;  %v4016_v37 = vld [vmem:[%s4869_s23 + $0x38] ss:$12 sps:$4 sm:$0xff]   ;;  %v4020_v40 = vld [vmem:[%s4869_s23 + $0x50] ss:$12 sps:$4 sm:$0xff]   ;;  %v4015_v41 = vld [vmem:[%s4869_s23 + $0x60] ss:$12 sps:$4 sm:$0xff]  }
 0x1f0   : > { %v4017_v42 = vld [vmem:[%s4869_s23 + $0x7c] ss:$12 sps:$4 sm:$0xff]   ;;  %v4019_v44 = vld [vmem:[%s4869_s23 + $0x78] ss:$12 sps:$4 sm:$0xff]   ;;  %v4021_v45 = vld [vmem:[%s4869_s23 + $0x94] ss:$12 sps:$4 sm:$0xff]  }
 0x1f1   : > { %v4024_v43 = vld [vmem:[%s4869_s23 + $0x68] ss:$12 sps:$4 sm:$0xff]   ;;  %v4028_v46 = vld [vmem:[%s4869_s23 + $0x80] ss:$12 sps:$4 sm:$0xff]   ;;  %v4023_v47 = vld [vmem:[%s4869_s23 + $0x90] ss:$12 sps:$4 sm:$0xff]  }
 0x1f2   : > { %1466 = vmatpush1.bf16.msra.mxu0 %v4004_v31  ;;  %3790 = vmatpush3.bf16.msra.mxu1 %v4012_v35  ;;  %v4025_v48 = vld [vmem:[%s4869_s23 + $0xac] ss:$12 sps:$4 sm:$0xff]   ;;  %v4027_v50 = vld [vmem:[%s4869_s23 + $0xa8] ss:$12 sps:$4 sm:$0xff]   ;;  %v4030_v53 = vld [vmem:[%s4869_s23 + $0xb0] ss:$12 sps:$4 sm:$0xff]  }
 0x1f3   : > { %1467 = vmatprep.subr.bf16.mxu0 %v4005_v32  ;;  %3791 = vmatprep.subr.bf16.mxu1 %v4443_v3  ;;  %v4029_v49 = vld [vmem:[%s4869_s23 + $0x98] ss:$12 sps:$4 sm:$0xff]   ;;  %v5036_v51 = vld [vmem:[#allocation2] sm:$0xff]  ;;  %v5049_v55 = vsub.s32 0, %v4902_v2  ;;  %v5053_v57 = vsub.s32 1, %v4902_v2  ;;  %v1330_v58 = vsub.s32 2, %v4902_v2 }
 0x1f4   : > { %v5038_v52 = vld [vmem:[#allocation2 + $0x8] sm:$0xff]  ;;  %v1317_v56 = vld [vmem:[%s4922_s9] sm:$0x7]  ;;  %vm1665_vm12 = vcmask 1043456   ;;  %vm1612_vm13 = vcmask 64512   ;;  %s5505_s9 = sld [smem:[#allocation34_spill]] }
 0x1f5   : > { %v1318_v54 = vpack.c.bf16 %v5038_v52, %v5036_v51  ;;  %v1323_v59 = vrot.slane %v1317_v56, %v5049_v55  ;;  %v1327_v60 = vrot.slane %v1317_v56, %v5053_v57  ;;  %v1331_v62 = vrot.slane %v1317_v56, %v1330_v58  ;;  %s5507_s13 = sld [smem:[#allocation27_spill]]  ;;  %s5513_s21 = sld [smem:[#allocation39_spill]] }
 0x1f6   : > { %1468 = vmatpush1.bf16.msra.mxu0 %v4007_v34  ;;  %3792 = vmatpush3.bf16.msra.mxu1 %v4016_v37  ;;  %vm2398_vm14 = vcmask 130048   ;;  %s5515_s29 = sld [smem:[#allocation24_spill]]  ;;  %p3685_p12 = scmp.ne.s32.totalorder %s4598_s7, 1 }
 0x1f7   : > { %1469 = vmatprep.subr.bf16.mxu0 %v4009_v36  ;;  %3793 = vmatprep.subr.bf16.mxu1 %v4443_v3 }
 0x1fa   : > { %1470 = vmatpush1.bf16.msra.mxu0 %v4011_v38  ;;  %3794 = vmatpush3.bf16.msra.mxu1 %v4020_v40  ;;  %s5506_s12 = scalar_lea.vmem %s5505_s9, %s4900_s18  ;;  %s5512_s9 = sld [smem:[#allocation23_spill]] }
 0x1fb   : > { %1471 = vmatprep.subr.bf16.mxu0 %v4013_v39  ;;  %3795 = vmatprep.subr.bf16.mxu1 %v4443_v3  ;;  %s5514_s22 = scalar_lea.vmem %s5513_s21, %s4900_s18 }
 0x1fe   : > { %1472 = vmatpush1.bf16.msra.mxu0 %v4015_v41  ;;  %3796 = vmatpush3.bf16.msra.mxu1 %v4024_v43 }
 0x1ff   : > { %1473 = vmatprep.subr.bf16.mxu0 %v4017_v42  ;;  %3797 = vmatprep.subr.bf16.mxu1 %v4443_v3 }
 0x202   : > { %1474 = vmatpush1.bf16.msra.mxu0 %v4019_v44  ;;  %3798 = vmatpush3.bf16.msra.mxu1 %v4028_v46 }
 0x203   : > { %1475 = vmatprep.subr.bf16.mxu0 %v4021_v45  ;;  %3799 = vmatprep.subr.bf16.mxu1 %v4443_v3 }
 0x206   : > { %1476 = vmatpush1.bf16.msra.mxu0 %v4023_v47  ;;  %3800 = vmatpush3.bf16.msra.mxu1 %v4029_v49 }
 0x207   : > { %1477 = vmatprep.subr.bf16.mxu0 %v4025_v48  ;;  %3801 = vmatprep.subr.bf16.mxu1 %v4443_v3 }
 0x20a   : > { %1478 = vmatpush1.bf16.msra.mxu0 %v4027_v50  ;;  %3802 = vmatpush3.bf16.msra.mxu1 %v4030_v53 }
 0x20b   : > { %3831 = vmatprep.subr.bf16.mxu0 %v4443_v3 }
 0x20d   : > { %1496 = vmatmul.mubr.bf16.vlgmr.msra.gmra.mrb[0].mxu0 %v1318_v54  ;;  %3804 = vmatmul.mubr.bf16.vlgmr.msra.gmra.mrb[0].mxu1 %v1318_v54 }
 0x20e   : > { %3847 = vmatprep.mubr.msk.bf16.mxu0 %vm4448_vm11, %v4443_v3 }
 0x2e0   : > { %v1497_v61 = vpop.f32.mrb[0].mxu0  ;;  %v1540_v13 = vpop.f32.mrb[0].mxu1 }
 0x2e1   : > { %v1498_v63 = vadd.f32 %v1497_v61, %v1323_v59  ;;  %v1499_v0 = vpop.f32.mrb[1].mxu0  ;;  %v1541_v2 = vadd.f32 %v1540_v13, %v1331_v62  ;;  %v3805_v16 = vpop.f32.mrb[1].mxu1 }
 0x2e2   : > { %v1500_v1 = vadd.f32 %v1499_v0, %v1327_v60  ;;  %v1501_v7 = vpop.f32.mrb[2].mxu0  ;;  %v1543_v17 = vpop.f32.mrb[2].mxu1 }
 0x2e3   : > { %v5058_v10 = vadd.f32 %v1501_v7, %v1323_v59  ;;  %v1503_v11 = vpop.f32.mrb[3].mxu0  ;;  %v1549_v12 = vmul.f32 %v1498_v63, %v4916_v4  ;;  %v1550_v15 = vmul.f32 %v1498_v63, %v4929_v5  ;;  %v1548_v19 = vpack.c.bf16 %v1541_v2, %v1541_v2  ;;  %v3806_v21 = vpop.f32.mrb[3].mxu1 }
 0x2e4   : > { %v1547_v14 = vpack.c.bf16 %v1500_v1, %v1500_v1  ;;  %v5062_v20 = vadd.f32 %v1543_v17, %v1331_v62  ;;  %v1551_v22 = vmul.f32 %v1498_v63, %v4942_v9  ;;  %v1552_v23 = vmul.f32 %v1498_v63, %v4932_v6 }
 0x2e5   : > { %v1553_v18 = vpack.c.bf16 %v1550_v15, %v1549_v12  ;;  %v1504_v24 = vadd.f32 %v1503_v11, %v1327_v60  ;;  %v1667_v25 = vsel %vm1665_vm12, %v1548_v19, 0 }
 0x2e6   : > { %3807 = vmatprep.subr.bf16.mxu1 %v1547_v14  ;;  %v1554_v26 = vpack.c.bf16 %v1552_v23, %v1551_v22 }
 0x2e7   : > { %3808 = vmatpush3.bf16.xpose.msra.mxu1 %v1547_v14  ;;  %3809 = vmatprep.mubr.bf16.mxu1 %v1553_v18  ;;  %v5068_v27 = vpack.c.bf16 %v1504_v24, %v1504_v24  ;;  %v1728_v24 = vmul.f32 %v5058_v10, %v4916_v4 }
 0x2e8   : > { %3915 = vmatprep.subr.msk.bf16.mxu1 %vm1665_vm12, %v1548_v19 }
 0x2ee   : > { %3810 = vmatmul.mubr.bf16.vlgmr.msra.gmra.mrb[4].mxu1 %v1554_v26 }
 0x2ef   : > { %3814 = vmatpush3.bf16.msra.mxu1 %v1667_v25  ;;  %v1729_v25 = vmul.f32 %v5058_v10, %v4929_v5 }
 0x2f0   : > { %3819 = vmatprep.subr.bf16.mxu1 %v5068_v27 }
 0x3c1   : > { %v3811_v28 = vpop.f32.mrb[4].mxu1 }
 0x3c2   : > { %v1606_v30 = vmul.f32 0.17677669, %v3811_v28  ;;  %v1589_v31 = vpop.f32.mrb[5].mxu1 }
 0x3c3   : > { %v1604_v32 = vmul.f32 0.17677669, %v1589_v31  ;;  %v3812_v33 = vpop.f32.mrb[6].mxu1  ;;  %v1732_v31 = vpack.c.bf16 %v1729_v25, %v1728_v24 }
 0x3c4   : > { %v1610_v34 = vadd.f32 %v1606_v30, %v4934_v8  ;;  %v1607_v35 = vmul.f32 0.17677669, %v3812_v33  ;;  %v1592_v36 = vpop.f32.mrb[7].mxu1  ;;  %v1730_v33 = vmul.f32 %v5058_v10, %v4942_v9 }
 0x3c5   : > { %v1608_v37 = vadd.f32 %v1604_v32, %v4934_v8  ;;  %v1605_v38 = vmul.f32 0.17677669, %v1592_v36  ;;  %v1727_v32 = vpack.c.bf16 %v5062_v20, %v5062_v20 }
 0x3c6   : > { %v1611_v39 = vadd.f32 %v1607_v35, %v4934_v8  ;;  %v1619_v40 = vsel %vm1612_vm13, %v1610_v34, -inf }
 0x3c7   : > { %v1609_v41 = vadd.f32 %v1605_v38, %v4934_v8  ;;  %1620 = vmax.xlane.f32.xlu1 %v1619_v40  ;;  %v1613_v42 = vsel %vm1612_vm13, %v1608_v37, -inf  ;;  %v1844_v36 = vsel %vm1665_vm12, %v1727_v32, 0 }
 0x3c8   : > { %1614 = vmax.xlane.f32.xlu0 %v1613_v42  ;;  %v1622_v43 = vsel %vm1612_vm13, %v1611_v39, -inf }
 0x3c9   : > { %v1616_v44 = vsel %vm1612_vm13, %v1609_v41, -inf }
 0x3cb   : > { %1623 = vmax.xlane.f32.xlu1 %v1622_v43 }
 0x3cc   : > { %1617 = vmax.xlane.f32.xlu0 %v1616_v44 }
 0x454   : > { %v1621_v45 = vpop.xlane.xlu1 %1620 }
 0x455   : > { %v1627_v46 = vsub.f32 %v1610_v34, %v1621_v45  ;;  %v1615_v47 = vpop.xlane.xlu0 %1614  ;;  %v1731_v34 = vmul.f32 %v5058_v10, %v4932_v6 }
 0x456   : > { %v1625_v48 = vsub.f32 %v1608_v37, %v1615_v47 }
 0x457   : > { %v1633_v49 = vmul.f32 1.442695, %v1627_v46  ;;  %v1733_v35 = vpack.c.bf16 %v1731_v34, %v1730_v33  ;;  %v4034_v33 = vld [vmem:[%s4909_s16 + $0x18] sm:$0xff]   ;;  %v4035_v34 = vld [vmem:[%s4909_s16 + $0x20] sm:$0xff]  }
 0x458   : > { %v1629_v50 = vmul.f32 1.442695, %v1625_v48  ;;  %v1624_v53 = vpop.xlane.xlu1 %1623 }
 0x459   : > { %v1628_v54 = vsub.f32 %v1611_v39, %v1624_v53  ;;  %v1618_v56 = vpop.xlane.xlu0 %1617 }
 0x45a   : > { %4119 = vpow2.f32 %v1629_v50  ;;  %v1626_v58 = vsub.f32 %v1609_v41, %v1618_v56 }
 0x45b   : > { %4121 = vpow2.f32 %v1633_v49  ;;  %v1635_v59 = vmul.f32 1.442695, %v1628_v54 }
 0x45c   : > { %v1631_v60 = vmul.f32 1.442695, %v1626_v58 }
 0x45e   : > { %4123 = vpow2.f32 %v1631_v60 }
 0x45f   : > { %4125 = vpow2.f32 %v1635_v59 }
 0x464   : > { %v4120_v61 = vpop.eup %4119 }
 0x465   : > { %v1637_v62 = vsel %vm1612_vm13, %v4120_v61, 0.0  ;;  %v4122_v63 = vpop.eup %4121 }
 0x466   : > { %1638 = vadd.xlane.f32.xlu0 %v1637_v62  ;;  %v1643_v1 = vsel %vm1612_vm13, %v4122_v63, 0.0 }
 0x468   : > { %v4124_v0 = vpop.eup %4123 }
 0x469   : > { %v1640_v7 = vsel %vm1612_vm13, %v4124_v0, 0.0  ;;  %v4126_v11 = vpop.eup %4125 }
 0x46a   : > { %1644 = vadd.xlane.f32.xlu0 %v1643_v1  ;;  %1641 = vadd.xlane.f32.xlu1 %v1640_v7  ;;  %v1646_v12 = vsel %vm1612_vm13, %v4126_v11, 0.0 }
 0x46e   : > { %1647 = vadd.xlane.f32.xlu1 %v1646_v12 }
 0x4f3   : > { %v1639_v13 = vpop.xlane.xlu0 %1638 }
 0x4f4   : > { %4127 = vrcp.f32 %v1639_v13 }
 0x4f7   : > { %v1642_v14 = vpop.xlane.xlu1 %1641  ;;  %v1645_v15 = vpop.xlane.xlu0 %1644 }
 0x4f8   : > { %4129 = vrcp.f32 %v1642_v14 }
 0x4f9   : > { %4131 = vrcp.f32 %v1645_v15 }
 0x4fb   : > { %v1648_v2 = vpop.xlane.xlu1 %1647 }
 0x4fc   : > { %4133 = vrcp.f32 %v1648_v2 }
 0x4fe   : > { %v4128_v16 = vpop.eup %4127 }
 0x4ff   : > { %v1653_v18 = vmul.f32 %v4128_v16, %v4120_v61 }
 0x502   : > { %v4130_v17 = vpop.eup %4129 }
 0x503   : > { %v1654_v19 = vmul.f32 %v4130_v17, %v4124_v0  ;;  %v4132_v21 = vpop.eup %4131 }
 0x504   : > { %v1655_v26 = vmul.f32 %v4132_v21, %v4122_v63 }
 0x505   : > { %v1657_v22 = vpack.c.bf16 %v1654_v19, %v1653_v18 }
 0x506   : > { %v4134_v23 = vpop.eup %4133 }
 0x507   : > { %v1656_v28 = vmul.f32 %v4134_v23, %v4126_v11  ;;  %3815 = vmatprep.mubr.msk.bf16.mxu1 %vm1612_vm13, %v1657_v22 }
 0x509   : > { %v1658_v30 = vpack.c.bf16 %v1656_v28, %v1655_v26 }
 0x50b   : > { %3816 = vmatmul.mubr.msk.bf16.vlgmr.msra.gmra.mrb[8].mxu1 %vm1612_vm13, %v1658_v30  ;;  %v4031_v30 = vld [vmem:[%s4909_s16] sm:$0xff]  }
 0x50c   : > { %3820 = vmatpush3.bf16.xpose.msra.mxu1 %v5068_v27  ;;  %3821 = vmatprep.mubr.bf16.mxu1 %v1732_v31  ;;  %v4032_v31 = vld [vmem:[%s4909_s16 + $0x8] sm:$0xff]  }
 0x50d   : > { %3916 = vmatprep.subr.msk.bf16.mxu1 %vm1665_vm12, %v1727_v32  ;;  %3832 = vmatpush3.bf16.msra.mxu0 %v4031_v30  ;;  %v4033_v32 = vld [vmem:[%s4909_s16 + $0x10] sm:$0xff]  }
 0x50e   : > { %3833 = vmatprep.subr.bf16.mxu0 %v4443_v3 }
 0x511   : > { %3834 = vmatpush3.bf16.msra.mxu0 %v4032_v31 }
 0x512   : > { %3835 = vmatprep.subr.bf16.mxu0 %v4443_v3 }
 0x513   : > { %3822 = vmatmul.mubr.bf16.vlgmr.msra.gmra.mrb[12].mxu1 %v1733_v35 }
 0x514   : > { %3826 = vmatpush3.bf16.msra.mxu1 %v1844_v36 }
 0x515   : > { %3851 = vmatprep.subr.bf16.mxu1 %v4443_v3  ;;  %3836 = vmatpush3.bf16.msra.mxu0 %v4033_v32 }
 0x516   : > { %3837 = vmatprep.subr.bf16.mxu0 %v4443_v3 }
 0x519   : > { %3838 = vmatpush3.bf16.msra.mxu0 %v4034_v33 }
 0x51a   : > { %3839 = vmatprep.subr.bf16.mxu0 %v4443_v3 }
 0x51d   : > { %3840 = vmatpush3.bf16.msra.mxu0 %v4035_v34 }
 0x51e   : > { %3841 = vmatprep.subr.bf16.mxu0 %v4443_v3 }
 0x5de   : > { %v3817_v20 = vpop.f32.mrb[8].mxu1 }
 0x5df   : > { %v1703_v37 = vpop.f32.mrb[9].mxu1  ;;  %v1720_v41 = vmul.f32 %v3817_v20, %v4942_v9 }
 0x5e0   : > { %v3818_v38 = vpop.f32.mrb[10].mxu1  ;;  %v1718_v39 = vmul.f32 %v1703_v37, %v4916_v4 }
 0x5e1   : > { %v1706_v27 = vpop.f32.mrb[11].mxu1  ;;  %v1721_v42 = vmul.f32 %v3818_v38, %v4932_v6 }
 0x5e2   : > { %v1719_v40 = vmul.f32 %v1706_v27, %v4929_v5 }
 0x5e4   : > { %v1722_v10 = vadd.f32 %v1719_v40, %v1718_v39 }
 0x5e6   : > { %v1723_v43 = vadd.f32 %v1722_v10, %v1720_v41  ;;  %v3823_v44 = vpop.f32.mrb[12].mxu1 }
 0x5e7   : > { %v1768_v45 = vpop.f32.mrb[13].mxu1  ;;  %v1785_v47 = vmul.f32 0.17677669, %v3823_v44 }
 0x5e8   : > { %v5103_v46 = vadd.f32 %v1723_v43, %v1721_v42  ;;  %v1783_v48 = vmul.f32 0.17677669, %v1768_v45  ;;  %v3824_v49 = vpop.f32.mrb[14].mxu1 }
 0x5e9   : > { %v1771_v50 = vpop.f32.mrb[15].mxu1  ;;  %v1786_v54 = vmul.f32 0.17677669, %v3824_v49  ;;  %v1789_v58 = vadd.f32 %v1785_v47, %v4934_v8  ;;  %v4036_v47 = vld [vmem:[%s4909_s16 + $0x28] sm:$0xff]   ;;  %v4038_v49 = vld [vmem:[%s4909_s16 + $0x38] sm:$0xff]  }
 0x5ea   : > { %v1787_v53 = vadd.f32 %v1783_v48, %v4934_v8  ;;  %v1784_v56 = vmul.f32 0.17677669, %v1771_v50  ;;  %3842 = vmatpush3.bf16.msra.mxu0 %v4036_v47  ;;  %v4037_v48 = vld [vmem:[%s4909_s16 + $0x30] sm:$0xff]   ;;  %s5511_s16 = sld [smem:[#allocation22_spill]] }
 0x5eb   : > { %v1790_v61 = vadd.f32 %v1786_v54, %v4934_v8  ;;  %v1797_v63 = vsel %vm1612_vm13, %v1789_v58, -inf  ;;  %3843 = vmatprep.subr.bf16.mxu0 %v4443_v3 }
 0x5ec   : > { %v1788_v59 = vadd.f32 %v1784_v56, %v4934_v8  ;;  %v1791_v60 = vsel %vm1612_vm13, %v1787_v53, -inf }
 0x5ed   : > { %1792 = vmax.xlane.f32.xlu0 %v1791_v60  ;;  %v1800_v0 = vsel %vm1612_vm13, %v1790_v61, -inf }
 0x5ee   : > { %v1794_v62 = vsel %vm1612_vm13, %v1788_v59, -inf  ;;  %3844 = vmatpush3.bf16.msra.mxu0 %v4037_v48  ;;  %v4069_v48 = vld [vmem:[%s4876_s5 + $0x30] sm:$0xff]  }
 0x5ef   : > { %1795 = vmax.xlane.f32.xlu1 %v1794_v62  ;;  %3845 = vmatprep.subr.bf16.mxu0 %v4443_v3 }
 0x5f1   : > { %1798 = vmax.xlane.f32.xlu0 %v1797_v63 }
 0x5f2   : > { %3846 = vmatpush3.bf16.msra.mxu0 %v4038_v49  ;;  %v4070_v49 = vld [vmem:[%s4876_s5 + $0x38] sm:$0xff]  }
 0x5f3   : > { %1801 = vmax.xlane.f32.xlu1 %v1800_v0 }
 0x67a   : > { %v1793_v1 = vpop.xlane.xlu0 %1792 }
 0x67b   : > { %v1803_v7 = vsub.f32 %v1787_v53, %v1793_v1 }
 0x67c   : > { %v1796_v11 = vpop.xlane.xlu1 %1795 }
 0x67d   : > { %v1807_v12 = vmul.f32 1.442695, %v1803_v7  ;;  %v1804_v13 = vsub.f32 %v1788_v59, %v1796_v11  ;;  %v3599_v7 = vld [vmem:[%s5506_s12] ss:$0 sm:$0xff] }
 0x67e   : > { %v1799_v14 = vpop.xlane.xlu0 %1798 }
 0x67f   : > { %4135 = vpow2.f32 %v1807_v12  ;;  %v1809_v15 = vmul.f32 1.442695, %v1804_v13  ;;  %v1805_v2 = vsub.f32 %v1789_v58, %v1799_v14 }
 0x680   : > { %v1802_v16 = vpop.xlane.xlu1 %1801 }
 0x681   : > { %4137 = vpow2.f32 %v1809_v15  ;;  %v1811_v8 = vmul.f32 1.442695, %v1805_v2  ;;  %v1806_v17 = vsub.f32 %v1790_v61, %v1802_v16 }
 0x683   : > { %4139 = vpow2.f32 %v1811_v8  ;;  %v1813_v18 = vmul.f32 1.442695, %v1806_v17  ;;  %v4039_v8 = vld [vmem:[%s4882_s3] ss:$8 sps:$4 sm:$0xff]   ;;  %v4041_v17 = vld [vmem:[%s4882_s3 + $0x4] ss:$8 sps:$4 sm:$0xff]  }
 0x684   : > { %2284 = vmatprep.subr.bf16.mxu0 %v4041_v17 }
 0x685   : > { %4141 = vpow2.f32 %v1813_v18  ;;  %v4044_v18 = vld [vmem:[%s4882_s3 + $0x14] ss:$8 sps:$4 sm:$0xff]  }
 0x689   : > { %v4136_v19 = vpop.eup %4135 }
 0x68a   : > { %v1815_v21 = vsel %vm1612_vm13, %v4136_v19, 0.0 }
 0x68b   : > { %v4138_v22 = vpop.eup %4137  ;;  %1816 = vadd.xlane.f32.xlu0 %v1815_v21  ;;  %v4042_v21 = vld [vmem:[%s4882_s3 + $0x10] ss:$8 sps:$4 sm:$0xff]  }
 0x68c   : > { %v1818_v23 = vsel %vm1612_vm13, %v4138_v22, 0.0 }
 0x68d   : > { %v4140_v24 = vpop.eup %4139  ;;  %1819 = vadd.xlane.f32.xlu1 %v1818_v23  ;;  %v4051_v23 = vld [vmem:[%s4882_s3 + $0x34] ss:$8 sps:$4 sm:$0xff]  }
 0x68e   : > { %v1821_v25 = vsel %vm1612_vm13, %v4140_v24, 0.0 }
 0x68f   : > { %v4142_v26 = vpop.eup %4141  ;;  %1822 = vadd.xlane.f32.xlu0 %v1821_v25  ;;  %v4055_v25 = vld [vmem:[%s4882_s3 + $0x44] ss:$8 sps:$4 sm:$0xff]  }
 0x690   : > { %v1824_v28 = vsel %vm1612_vm13, %v4142_v26, 0.0 }
 0x691   : > { %1825 = vadd.xlane.f32.xlu1 %v1824_v28 }
 0x718   : > { %v1817_v35 = vpop.xlane.xlu0 %1816 }
 0x719   : > { %4143 = vrcp.f32 %v1817_v35 }
 0x71a   : > { %v1820_v36 = vpop.xlane.xlu1 %1819 }
 0x71b   : > { %4145 = vrcp.f32 %v1820_v36 }
 0x71c   : > { %v1823_v20 = vpop.xlane.xlu0 %1822 }
 0x71d   : > { %4147 = vrcp.f32 %v1823_v20  ;;  %v4056_v20 = vld [vmem:[%s4876_s5 + $0x10] sm:$0xff]  }
 0x71e   : > { %v1826_v37 = vpop.xlane.xlu1 %1825 }
 0x71f   : > { %4149 = vrcp.f32 %v1826_v37  ;;  %v4059_v37 = vld [vmem:[%s4882_s3 + $0x54] ss:$8 sps:$4 sm:$0xff]  }
 0x723   : > { %v4144_v38 = vpop.eup %4143 }
 0x724   : > { %v1831_v39 = vmul.f32 %v4144_v38, %v4136_v19  ;;  %v4048_v19 = vld [vmem:[%s4876_s5] sm:$0xff]   ;;  %v4057_v38 = vld [vmem:[%s4882_s3 + $0x50] ss:$8 sps:$4 sm:$0xff]  }
 0x725   : > { %v4146_v27 = vpop.eup %4145 }
 0x726   : > { %v1832_v40 = vmul.f32 %v4146_v27, %v4138_v22  ;;  %v4047_v22 = vld [vmem:[%s4882_s3 + $0x24] ss:$8 sps:$4 sm:$0xff]   ;;  %v4060_v27 = vld [vmem:[%s4876_s5 + $0x18] sm:$0xff]  }
 0x727   : > { %v4148_v41 = vpop.eup %4147 }
 0x728   : > { %v1835_v10 = vpack.c.bf16 %v1832_v40, %v1831_v39  ;;  %v1833_v43 = vmul.f32 %v4148_v41, %v4140_v24  ;;  %v4049_v24 = vld [vmem:[%s4882_s3 + $0x30] ss:$8 sps:$4 sm:$0xff]   ;;  %v4063_v39 = vld [vmem:[%s4882_s3 + $0x64] ss:$8 sps:$4 sm:$0xff]   ;;  %v4061_v40 = vld [vmem:[%s4882_s3 + $0x60] ss:$8 sps:$4 sm:$0xff]  }
 0x729   : > { %v4150_v42 = vpop.eup %4149  ;;  %v4064_v41 = vld [vmem:[%s4876_s5 + $0x20] sm:$0xff]  }
 0x72a   : > { %v1834_v44 = vmul.f32 %v4150_v42, %v4142_v26  ;;  %3827 = vmatprep.mubr.msk.bf16.mxu1 %vm1612_vm13, %v1835_v10  ;;  %v4053_v26 = vld [vmem:[%s4882_s3 + $0x40] ss:$8 sps:$4 sm:$0xff]   ;;  %v4067_v10 = vld [vmem:[%s4882_s3 + $0x74] ss:$8 sps:$4 sm:$0xff]   ;;  %v4065_v42 = vld [vmem:[%s4882_s3 + $0x70] ss:$8 sps:$4 sm:$0xff]  }
 0x72c   : > { %v1836_v45 = vpack.c.bf16 %v1834_v44, %v1833_v43  ;;  %v1281_v43 = vld [vmem:[%s5507_s13] sm:$0xff]  ;;  %v1282_v44 = vld [vmem:[%s5507_s13 + $0x8] sm:$0xff] }
 0x72d   : > { %v2191_v47 = vpack.c.bf16 %v1282_v44, %v1281_v43 }
 0x72e   : > { %3828 = vmatmul.mubr.msk.bf16.vlgmr.msra.gmra.mrb[16].mxu1 %vm1612_vm13, %v1836_v45  ;;  %v4068_v45 = vld [vmem:[%s4876_s5 + $0x28] sm:$0xff]  }
 0x72f   : > { %3867 = vmatprep.mubr.msk.bf16.mxu1 %vm4448_vm11, %v4443_v3  ;;  %3852 = vmatpush3.bf16.msra.mxu1 %v4048_v19 }
 0x730   : > { %3853 = vmatprep.subr.bf16.mxu1 %v4443_v3 }
 0x801   : > { %v3829_v50 = vpop.f32.mrb[16].mxu1 }
 0x802   : > { %v1880_v53 = vpop.f32.mrb[17].mxu1  ;;  %v1897_v60 = vmul.f32 %v3829_v50, %v4942_v9 }
 0x803   : > { %v3830_v54 = vpop.f32.mrb[18].mxu1  ;;  %v1895_v58 = vmul.f32 %v1880_v53, %v4916_v4 }
 0x804   : > { %v1883_v56 = vpop.f32.mrb[19].mxu1  ;;  %v1898_v62 = vmul.f32 %v3830_v54, %v4932_v6 }
 0x805   : > { %v1896_v59 = vmul.f32 %v1883_v56, %v4929_v5 }
 0x807   : > { %v1899_v61 = vadd.f32 %v1896_v59, %v1895_v58 }
 0x809   : > { %v1900_v63 = vadd.f32 %v1899_v61, %v1897_v60  ;;  %v3608_v61 = vld [vmem:[%s1159_s25] ss:$0 sm:$0xff]  ;;  %s5519_s25 = sld [smem:[#allocation43_spill]] }
 0x80b   : > { %v1901_v0 = vadd.f32 %v1900_v63, %v1898_v62 }
 0x80d   : > { %v1922_v1 = vpack.c.bf16 %v1901_v0, %v5103_v46 }
 0x80f   : > { %3848 = vmatmul.mubr.bf16.vlgmr.msra.gmra.mrb[4].mxu0 %v1922_v1 }
 0x810   : > { %2316 = vmatprep.mubr.bf16.mxu0 %v4447_v29  ;;  %2285 = vmatpush1.bf16.msra.mxu0 %v4039_v8 }
 0x811   : > { %2286 = vmatprep.subr.bf16.mxu0 %v4044_v18 }
 0x814   : > { %2287 = vmatpush1.bf16.msra.mxu0 %v4042_v21 }
 0x815   : > { %2288 = vmatprep.subr.bf16.mxu0 %v4047_v22 }
 0x8e2   : > { %v2011_v11 = vpop.f32.mrb[4].mxu0 }
 0x8e3   : > { %v2012_v12 = vadd.f32 %v3599_v7, %v2011_v11  ;;  %v3849_v13 = vpop.f32.mrb[5].mxu0 }
 0x8e4   : > { %v2014_v14 = vpop.f32.mrb[6].mxu0 }
 0x8e5   : > { %v2015_v15 = vadd.f32 %v3599_v7, %v2014_v14  ;;  %v3850_v2 = vpop.f32.mrb[7].mxu0  ;;  %v2018_v46 = vadd.f32 %v2012_v12, %v5036_v51  ;;  %v4052_v51 = vld [vmem:[%s4876_s5 + $0x8] sm:$0xff]   ;;  %v3609_v7 = vld [vmem:[%s1162_s14] ss:$0 sm:$0xff] }
 0x8e6   : > { %3854 = vmatpush3.bf16.msra.mxu1 %v4052_v51 }
 0x8e7   : > { %2022 = vadd.xlane.f32.xlu0 %v2018_v46  ;;  %v2019_v16 = vadd.f32 %v2015_v15, %v5038_v52  ;;  %v4045_v52 = vld [vmem:[%s4882_s3 + $0x20] ss:$8 sps:$4 sm:$0xff]   ;;  %3855 = vmatprep.subr.bf16.mxu1 %v4443_v3  ;;  %v2190_v15 = vld [vmem:[%s4947_s8] sm:$0x3]  ;;  %s5510_s8 = scalar_lea.vmem %s5398_s10, %s4900_s18 }
 0x8e8   : > { %2289 = vmatpush1.bf16.msra.mxu0 %v4045_v52  ;;  %v5206_v2 = vrot.slane %v2190_v15, %v5049_v55 }
 0x8e9   : > { %2024 = vadd.xlane.f32.xlu1 %v2019_v16  ;;  %2290 = vmatprep.subr.bf16.mxu0 %v4051_v23 }
 0x8ea   : > { %3856 = vmatpush3.bf16.msra.mxu1 %v4056_v20 }
 0x8eb   : > { %3857 = vmatprep.subr.bf16.mxu1 %v4443_v3 }
 0x8ec   : > { %2291 = vmatpush1.bf16.msra.mxu0 %v4049_v24  ;;  %v3610_v24 = vld [vmem:[%s5510_s8] ss:$0 sm:$0xff]  ;;  %s5520_s8 = scalar_lea.vmem %s5519_s25, %s4900_s18 }
 0x8ed   : > { %2292 = vmatprep.subr.bf16.mxu0 %v4055_v25 }
 0x8ee   : > { %3858 = vmatpush3.bf16.msra.mxu1 %v4060_v27  ;;  %v1284_v27 = vld [vmem:[%s5507_s13 + $0x18] sm:$0xff] }
 0x8ef   : > { %3859 = vmatprep.subr.bf16.mxu1 %v4443_v3 }
 0x8f0   : > { %2293 = vmatpush1.bf16.msra.mxu0 %v4053_v26 }
 0x8f1   : > { %2294 = vmatprep.subr.bf16.mxu0 %v4059_v37 }
 0x8f2   : > { %3860 = vmatpush3.bf16.msra.mxu1 %v4064_v41 }
 0x8f3   : > { %3861 = vmatprep.subr.bf16.mxu1 %v4443_v3 }
 0x8f4   : > { %2295 = vmatpush1.bf16.msra.mxu0 %v4057_v38  ;;  %v1283_v38 = vld [vmem:[%s5507_s13 + $0x10] sm:$0xff] }
 0x8f5   : > { %2296 = vmatprep.subr.bf16.mxu0 %v4063_v39  ;;  %v2192_v39 = vpack.c.bf16 %v1284_v27, %v1283_v38 }
 0x8f6   : > { %3862 = vmatpush3.bf16.msra.mxu1 %v4068_v45 }
 0x8f7   : > { %3863 = vmatprep.subr.bf16.mxu1 %v4443_v3 }
 0x8f8   : > { %2297 = vmatpush1.bf16.msra.mxu0 %v4061_v40 }
 0x8f9   : > { %2298 = vmatprep.subr.bf16.mxu0 %v4067_v10 }
 0x8fa   : > { %3864 = vmatpush3.bf16.msra.mxu1 %v4069_v48 }
 0x8fb   : > { %3865 = vmatprep.subr.bf16.mxu1 %v4443_v3 }
 0x8fc   : > { %2299 = vmatpush1.bf16.msra.mxu0 %v4065_v42 }
 0x8fd   : > { %3895 = vmatprep.subr.bf16.mxu0 %v4443_v3 }
 0x8fe   : > { %3866 = vmatpush3.bf16.msra.mxu1 %v4070_v49 }
 0x8ff   : > { %2317 = vmatmul.mubr.bf16.vlgmr.msra.gmra.mrb[8].mxu0 %v2191_v47 }
 0x900   : > { %2326 = vmatprep.mubr.bf16.mxu0 %v4447_v29 }
 0x907   : > { %2327 = vmatmul.mubr.bf16.gmra.mrb[12].mxu0 %v2192_v39 }
 0x908   : > { %3911 = vmatprep.mubr.msk.bf16.mxu0 %vm4448_vm11, %v4443_v3 }
 0x974   : > { %v2023_v28 = vpop.xlane.xlu0 %2022 }
 0x975   : > { %v2027_v30 = vmul.f32 0.0078125, %v2023_v28 }
 0x976   : > { %v2025_v31 = vpop.xlane.xlu1 %2024 }
 0x977   : > { %v2029_v32 = vsub.f32 %v2018_v46, %v2027_v30  ;;  %v2028_v33 = vmul.f32 0.0078125, %v2025_v31  ;;  %v5209_v46 = vrot.slane %v2190_v15, %v5053_v57 }
 0x979   : > { %v2030_v34 = vsub.f32 %v2019_v16, %v2028_v33  ;;  %v2031_v35 = vmul.f32 %v2029_v32, %v2029_v32 }
 0x97b   : > { %2033 = vadd.xlane.f32.xlu0 %v2031_v35  ;;  %v2032_v36 = vmul.f32 %v2030_v34, %v2030_v34 }
 0x97d   : > { %2035 = vadd.xlane.f32.xlu1 %v2032_v36 }
 0x9d2   : > { %v2318_v16 = vpop.f32.mrb[8].mxu0 }
 0x9d3   : > { %v2319_v8 = vadd.f32 %v2318_v16, %v5206_v2  ;;  %v2320_v17 = vpop.f32.mrb[9].mxu0 }
 0x9d4   : > { %v2321_v18 = vadd.f32 %v2320_v17, %v5209_v46  ;;  %v2322_v19 = vpop.f32.mrb[10].mxu0 }
 0x9d5   : > { %v2323_v21 = vadd.f32 %v2322_v19, %v5206_v2  ;;  %v2324_v22 = vpop.f32.mrb[11].mxu0 }
 0x9d6   : > { %v2325_v51 = vadd.f32 %v2324_v22, %v5209_v46 }
 0x9d7   : > { %v2337_v52 = vpack.c.bf16 %v2323_v21, %v2319_v8 }
 0x9d8   : > { %v2338_v23 = vpack.c.bf16 %v2325_v51, %v2321_v18 }
 0x9d9   : > { %3871 = vmatprep.subr.bf16.mxu1 %v2337_v52 }
 0x9da   : > { %v2328_v22 = vpop.f32.mrb[12].mxu0 }
 0x9db   : > { %v2330_v51 = vpop.f32.mrb[13].mxu0 }
 0xa08   : > { %v2034_v50 = vpop.xlane.xlu0 %2033 }
 0xa09   : > { %v2037_v53 = vmul.f32 0.0078125, %v2034_v50 }
 0xa0a   : > { %v2036_v54 = vpop.xlane.xlu1 %2035 }
 0xa0b   : > { %v2039_v56 = vadd.f32 1e-05, %v2037_v53  ;;  %v2038_v58 = vmul.f32 0.0078125, %v2036_v54 }
 0xa0d   : > { %4151 = vrsqrt.f32 %v2039_v56  ;;  %v2040_v59 = vadd.f32 1e-05, %v2038_v58 }
 0xa0f   : > { %4153 = vrsqrt.f32 %v2040_v59 }
 0xa17   : > { %v4152_v60 = vpop.eup %4151 }
 0xa18   : > { %v2043_v62 = vmul.f32 %v4152_v60, %v2029_v32 }
 0xa19   : > { %v4154_v63 = vpop.eup %4153 }
 0xa1a   : > { %v2044_v0 = vmul.f32 %v4154_v63, %v2030_v34  ;;  %v2051_v1 = vmul.f32 %v3608_v61, %v2043_v62 }
 0xa1c   : > { %v2052_v11 = vmul.f32 %v3608_v61, %v2044_v0  ;;  %v5198_v12 = vadd.f32 %v3609_v7, %v2051_v1 }
 0xa1e   : > { %v5200_v13 = vadd.f32 %v3609_v7, %v2052_v11 }
 0xa20   : > { %v2078_v14 = vpack.c.bf16 %v5200_v13, %v5198_v12 }
 0xa22   : > { %3868 = vmatmul.mubr.bf16.vlgmr.msra.gmra.mrb[20].mxu1 %v2078_v14 }
 0xa23   : > { %3872 = vmatpush3.bf16.xpose.msra.mxu1 %v2337_v52  ;;  %v2332_v52 = vpop.f32.mrb[14].mxu0 }
 0xa24   : > { %3877 = vmatprep.subr.bf16.mxu1 %v2338_v23 }
 0xaf5   : > { %v2167_v25 = vpop.f32.mrb[20].mxu1 }
 0xaf6   : > { %v2168_v26 = vadd.f32 %v3610_v24, %v2167_v25  ;;  %v3869_v28 = vpop.f32.mrb[21].mxu1  ;;  %v2331_v25 = vadd.f32 %v2330_v51, %v5209_v46 }
 0xaf7   : > { %v2170_v30 = vpop.f32.mrb[22].mxu1 }
 0xaf8   : > { %v2341_v31 = vmul.f32 %v2168_v26, %v4942_v9  ;;  %v2342_v32 = vmul.f32 %v2168_v26, %v4932_v6  ;;  %v5222_v33 = vadd.f32 %v3610_v24, %v2170_v30  ;;  %v3870_v34 = vpop.f32.mrb[23].mxu1  ;;  %v2339_v35 = vmul.f32 %v2168_v26, %v4916_v4 }
 0xaf9   : > { %v2340_v36 = vmul.f32 %v2168_v26, %v4929_v5  ;;  %v2329_v24 = vadd.f32 %v2328_v22, %v5206_v2  ;;  %v2333_v26 = vadd.f32 %v2332_v52, %v5206_v2 }
 0xafa   : > { %v2344_v20 = vpack.c.bf16 %v2342_v32, %v2341_v31 }
 0xafb   : > { %v2343_v37 = vpack.c.bf16 %v2340_v36, %v2339_v35  ;;  %v2508_v30 = vpack.c.bf16 %v2333_v26, %v2329_v24 }
 0xafd   : > { %3873 = vmatprep.mubr.bf16.mxu1 %v2343_v37 }
 0xafe   : > { %3874 = vmatmul.mubr.bf16.vlgmr.msra.gmra.mrb[24].mxu1 %v2344_v20 }
 0xaff   : > { %3878 = vmatpush3.bf16.msra.mxu1 %v2338_v23  ;;  %v2334_v23 = vpop.f32.mrb[15].mxu0 }
 0xb00   : > { %v2335_v28 = vadd.f32 %v2334_v23, %v5209_v46  ;;  %3883 = vmatprep.subr.bf16.mxu1 %v2508_v30  ;;  %v2510_v46 = vmul.f32 %v5222_v33, %v4916_v4 }
 0xb02   : > { %v2509_v31 = vpack.c.bf16 %v2335_v28, %v2331_v25 }
 0xbd1   : > { %v3875_v40 = vpop.f32.mrb[24].mxu1 }
 0xbd2   : > { %v2379_v41 = vpop.f32.mrb[25].mxu1  ;;  %v2396_v44 = vmul.f32 0.17677669, %v3875_v40 }
 0xbd3   : > { %v2394_v10 = vmul.f32 0.17677669, %v2379_v41  ;;  %v3876_v42 = vpop.f32.mrb[26].mxu1  ;;  %v2511_v41 = vmul.f32 %v5222_v33, %v4929_v5 }
 0xbd4   : > { %v2382_v43 = vpop.f32.mrb[27].mxu1  ;;  %v2397_v48 = vmul.f32 0.17677669, %v3876_v42  ;;  %v2405_v50 = vsel %vm2398_vm14, %v2396_v44, -inf }
 0xbd5   : > { %v2395_v45 = vmul.f32 0.17677669, %v2382_v43  ;;  %v2399_v47 = vsel %vm2398_vm14, %v2394_v10, -inf }
 0xbd6   : > { %2400 = vmax.xlane.f32.xlu0 %v2399_v47  ;;  %v2408_v53 = vsel %vm2398_vm14, %v2397_v48, -inf  ;;  %v2513_v47 = vmul.f32 %v5222_v33, %v4932_v6 }
 0xbd7   : > { %v2402_v49 = vsel %vm2398_vm14, %v2395_v45, -inf }
 0xbd8   : > { %2403 = vmax.xlane.f32.xlu1 %v2402_v49 }
 0xbda   : > { %2406 = vmax.xlane.f32.xlu0 %v2405_v50 }
 0xbdc   : > { %2409 = vmax.xlane.f32.xlu1 %v2408_v53 }
 0xc63   : > { %v2401_v54 = vpop.xlane.xlu0 %2400 }
 0xc64   : > { %v2411_v56 = vsub.f32 %v2394_v10, %v2401_v54 }
 0xc65   : > { %v2404_v58 = vpop.xlane.xlu1 %2403 }
 0xc66   : > { %v2415_v59 = vmul.f32 1.442695, %v2411_v56  ;;  %v2412_v60 = vsub.f32 %v2395_v45, %v2404_v58  ;;  %v2512_v45 = vmul.f32 %v5222_v33, %v4942_v9 }
 0xc67   : > { %v2407_v61 = vpop.xlane.xlu0 %2406 }
 0xc68   : > { %4155 = vpow2.f32 %v2415_v59  ;;  %v2417_v62 = vmul.f32 1.442695, %v2412_v60  ;;  %v2413_v63 = vsub.f32 %v2396_v44, %v2407_v61  ;;  %v2514_v44 = vpack.c.bf16 %v2511_v41, %v2510_v46  ;;  %v4073_v46 = vld [vmem:[%s5511_s16 + $0x10] sm:$0xff]   ;;  %v4074_v41 = vld [vmem:[%s5511_s16 + $0x18] sm:$0xff]  }
 0xc69   : > { %v2410_v0 = vpop.xlane.xlu1 %2409 }
 0xc6a   : > { %4157 = vpow2.f32 %v2417_v62  ;;  %v2419_v1 = vmul.f32 1.442695, %v2413_v63  ;;  %v2414_v7 = vsub.f32 %v2397_v48, %v2410_v0  ;;  %v2515_v48 = vpack.c.bf16 %v2513_v47, %v2512_v45 }
 0xc6c   : > { %4159 = vpow2.f32 %v2419_v1  ;;  %v2421_v11 = vmul.f32 1.442695, %v2414_v7 }
 0xc6e   : > { %4161 = vpow2.f32 %v2421_v11 }
 0xc72   : > { %v4156_v14 = vpop.eup %4155 }
 0xc73   : > { %v2423_v15 = vsel %vm2398_vm14, %v4156_v14, 0.0 }
 0xc74   : > { %v4158_v16 = vpop.eup %4157  ;;  %2424 = vadd.xlane.f32.xlu0 %v2423_v15 }
 0xc75   : > { %v2426_v8 = vsel %vm2398_vm14, %v4158_v16, 0.0 }
 0xc76   : > { %v4160_v17 = vpop.eup %4159  ;;  %2427 = vadd.xlane.f32.xlu1 %v2426_v8 }
 0xc77   : > { %v2429_v18 = vsel %vm2398_vm14, %v4160_v17, 0.0 }
 0xc78   : > { %v4162_v19 = vpop.eup %4161  ;;  %2430 = vadd.xlane.f32.xlu0 %v2429_v18 }
 0xc79   : > { %v2432_v21 = vsel %vm2398_vm14, %v4162_v19, 0.0 }
 0xc7a   : > { %2433 = vadd.xlane.f32.xlu1 %v2432_v21 }
 0xd01   : > { %v2425_v32 = vpop.xlane.xlu0 %2424 }
 0xd02   : > { %4163 = vrcp.f32 %v2425_v32 }
 0xd03   : > { %v2428_v34 = vpop.xlane.xlu1 %2427 }
 0xd04   : > { %4165 = vrcp.f32 %v2428_v34 }
 0xd05   : > { %v2431_v35 = vpop.xlane.xlu0 %2430 }
 0xd06   : > { %4167 = vrcp.f32 %v2431_v35 }
 0xd07   : > { %v2434_v36 = vpop.xlane.xlu1 %2433 }
 0xd08   : > { %4169 = vrcp.f32 %v2434_v36 }
 0xd0c   : > { %v4164_v20 = vpop.eup %4163 }
 0xd0d   : > { %v2439_v38 = vmul.f32 %v4164_v20, %v4156_v14 }
 0xd0e   : > { %v4166_v37 = vpop.eup %4165 }
 0xd0f   : > { %v2440_v27 = vmul.f32 %v4166_v37, %v4158_v16 }
 0xd10   : > { %v4168_v39 = vpop.eup %4167 }
 0xd11   : > { %v2443_v40 = vpack.c.bf16 %v2440_v27, %v2439_v38  ;;  %v2441_v10 = vmul.f32 %v4168_v39, %v4160_v17 }
 0xd12   : > { %v4170_v2 = vpop.eup %4169 }
 0xd13   : > { %v2442_v42 = vmul.f32 %v4170_v2, %v4162_v19  ;;  %3879 = vmatprep.mubr.msk.bf16.mxu1 %vm2398_vm14, %v2443_v40  ;;  %v4071_v40 = vld [vmem:[%s5511_s16] sm:$0xff]   ;;  %v4072_v2 = vld [vmem:[%s5511_s16 + $0x8] sm:$0xff]  }
 0xd14   : > { %3896 = vmatpush3.bf16.msra.mxu0 %v4071_v40  ;;  %v4094_v40 = vld [vmem:[%s5512_s9 + $0x50] ss:$8 sps:$4 sm:$0xff]  }
 0xd15   : > { %v2444_v43 = vpack.c.bf16 %v2442_v42, %v2441_v10  ;;  %3897 = vmatprep.subr.bf16.mxu0 %v4443_v3  ;;  %v4075_v10 = vld [vmem:[%s5511_s16 + $0x20] sm:$0xff]  }
 0xd17   : > { %3880 = vmatmul.mubr.msk.bf16.vlgmr.msra.gmra.mrb[28].mxu1 %vm2398_vm14, %v2444_v43 }
 0xd18   : > { %3884 = vmatpush3.bf16.xpose.msra.mxu1 %v2508_v30  ;;  %3885 = vmatprep.mubr.bf16.mxu1 %v2514_v44 }
 0xd19   : > { %3889 = vmatprep.subr.bf16.mxu1 %v2509_v31  ;;  %3898 = vmatpush3.bf16.msra.mxu0 %v4072_v2  ;;  %v4099_v2 = vld [vmem:[%s5512_s9 + $0x64] ss:$8 sps:$4 sm:$0xff]  }
 0xd1a   : > { %3899 = vmatprep.subr.bf16.mxu0 %v4443_v3 }
 0xd1d   : > { %3900 = vmatpush3.bf16.msra.mxu0 %v4073_v46  ;;  %v4097_v46 = vld [vmem:[%s5512_s9 + $0x60] ss:$8 sps:$4 sm:$0xff]  }
 0xd1e   : > { %3901 = vmatprep.subr.bf16.mxu0 %v4443_v3 }
 0xd1f   : > { %3886 = vmatmul.mubr.bf16.vlgmr.msra.gmra.mrb[32].mxu1 %v2515_v48 }
 0xd20   : > { %3890 = vmatpush3.bf16.msra.mxu1 %v2509_v31 }
 0xd21   : > { %3902 = vmatpush3.bf16.msra.mxu0 %v4074_v41  ;;  %v4102_v41 = vld [vmem:[%s5512_s9 + $0x74] ss:$8 sps:$4 sm:$0xff]  }
 0xd22   : > { %3903 = vmatprep.subr.bf16.mxu0 %v4443_v3 }
 0xd25   : > { %3904 = vmatpush3.bf16.msra.mxu0 %v4075_v10  ;;  %v4100_v10 = vld [vmem:[%s5512_s9 + $0x70] ss:$8 sps:$4 sm:$0xff]  }
 0xd26   : > { %3905 = vmatprep.subr.bf16.mxu0 %v4443_v3 }
 0xdea   : > { %v3881_v49 = vpop.f32.mrb[28].mxu1 }
 0xdeb   : > { %v2485_v50 = vpop.f32.mrb[29].mxu1  ;;  %v2502_v59 = vmul.f32 %v3881_v49, %v4942_v9 }
 0xdec   : > { %v3882_v53 = vpop.f32.mrb[30].mxu1  ;;  %v2500_v56 = vmul.f32 %v2485_v50, %v4916_v4 }
 0xded   : > { %v2488_v54 = vpop.f32.mrb[31].mxu1  ;;  %v2503_v61 = vmul.f32 %v3882_v53, %v4932_v6 }
 0xdee   : > { %v2501_v58 = vmul.f32 %v2488_v54, %v4929_v5 }
 0xdf0   : > { %v2504_v60 = vadd.f32 %v2501_v58, %v2500_v56 }
 0xdf2   : > { %v2505_v62 = vadd.f32 %v2504_v60, %v2502_v59  ;;  %v3887_v63 = vpop.f32.mrb[32].mxu1 }
 0xdf3   : > { %v2550_v33 = vpop.f32.mrb[33].mxu1  ;;  %v2567_v14 = vmul.f32 0.17677669, %v3887_v63  ;;  %v4078_v63 = vld [vmem:[%s5511_s16 + $0x38] sm:$0xff]  }
 0xdf4   : > { %v5260_v0 = vadd.f32 %v2505_v62, %v2503_v61  ;;  %v2565_v1 = vmul.f32 0.17677669, %v2550_v33  ;;  %v3888_v7 = vpop.f32.mrb[34].mxu1  ;;  %v4076_v61 = vld [vmem:[%s5511_s16 + $0x28] sm:$0xff]   ;;  %v4077_v62 = vld [vmem:[%s5511_s16 + $0x30] sm:$0xff]  }
 0xdf5   : > { %v2553_v11 = vpop.f32.mrb[35].mxu1  ;;  %v2568_v8 = vmul.f32 0.17677669, %v3888_v7  ;;  %v2575_v18 = vsel %vm2398_vm14, %v2567_v14, -inf  ;;  %3906 = vmatpush3.bf16.msra.mxu0 %v4076_v61 }
 0xdf6   : > { %v2566_v15 = vmul.f32 0.17677669, %v2553_v11  ;;  %v2569_v16 = vsel %vm2398_vm14, %v2565_v1, -inf  ;;  %3907 = vmatprep.subr.bf16.mxu0 %v4443_v3 }
 0xdf7   : > { %2570 = vmax.xlane.f32.xlu0 %v2569_v16  ;;  %v2578_v19 = vsel %vm2398_vm14, %v2568_v8, -inf }
 0xdf8   : > { %v2572_v17 = vsel %vm2398_vm14, %v2566_v15, -inf }
 0xdf9   : > { %2573 = vmax.xlane.f32.xlu1 %v2572_v17  ;;  %3908 = vmatpush3.bf16.msra.mxu0 %v4077_v62 }
 0xdfa   : > { %3909 = vmatprep.subr.bf16.mxu0 %v4443_v3 }
 0xdfb   : > { %2576 = vmax.xlane.f32.xlu0 %v2575_v18 }
 0xdfd   : > { %2579 = vmax.xlane.f32.xlu1 %v2578_v19  ;;  %3910 = vmatpush3.bf16.msra.mxu0 %v4078_v63 }
 0xe84   : > { %v2571_v21 = vpop.xlane.xlu0 %2570 }
 0xe85   : > { %v2581_v22 = vsub.f32 %v2565_v1, %v2571_v21 }
 0xe86   : > { %v2574_v51 = vpop.xlane.xlu1 %2573 }
 0xe87   : > { %v2585_v52 = vmul.f32 1.442695, %v2581_v22  ;;  %v2582_v23 = vsub.f32 %v2566_v15, %v2574_v51 }
 0xe88   : > { %v2577_v24 = vpop.xlane.xlu0 %2576 }
 0xe89   : > { %4171 = vpow2.f32 %v2585_v52  ;;  %v2587_v25 = vmul.f32 1.442695, %v2582_v23  ;;  %v2583_v26 = vsub.f32 %v2567_v14, %v2577_v24  ;;  %v4081_v23 = vld [vmem:[%s5512_s9 + $0x4] ss:$8 sps:$4 sm:$0xff]   ;;  %v4084_v24 = vld [vmem:[%s5512_s9 + $0x14] ss:$8 sps:$4 sm:$0xff]  }
 0xe8a   : > { %v2580_v28 = vpop.xlane.xlu1 %2579  ;;  %2944 = vmatprep.subr.bf16.mxu1 %v4081_v23 }
 0xe8b   : > { %4173 = vpow2.f32 %v2587_v25  ;;  %v2589_v30 = vmul.f32 1.442695, %v2583_v26  ;;  %v2584_v31 = vsub.f32 %v2568_v8, %v2580_v28  ;;  %v4082_v25 = vld [vmem:[%s5512_s9 + $0x10] ss:$8 sps:$4 sm:$0xff]  }
 0xe8d   : > { %4175 = vpow2.f32 %v2589_v30  ;;  %v2591_v32 = vmul.f32 1.442695, %v2584_v31 }
 0xe8f   : > { %4177 = vpow2.f32 %v2591_v32 }
 0xe93   : > { %v4172_v34 = vpop.eup %4171 }
 0xe94   : > { %v2593_v35 = vsel %vm2398_vm14, %v4172_v34, 0.0 }
 0xe95   : > { %v4174_v36 = vpop.eup %4173  ;;  %2594 = vadd.xlane.f32.xlu0 %v2593_v35  ;;  %v4087_v35 = vld [vmem:[%s5512_s9 + $0x24] ss:$8 sps:$4 sm:$0xff]  }
 0xe96   : > { %v2596_v20 = vsel %vm2398_vm14, %v4174_v36, 0.0 }
 0xe97   : > { %v4176_v37 = vpop.eup %4175  ;;  %2597 = vadd.xlane.f32.xlu1 %v2596_v20  ;;  %v4090_v20 = vld [vmem:[%s5512_s9 + $0x34] ss:$8 sps:$4 sm:$0xff]  }
 0xe98   : > { %v2599_v38 = vsel %vm2398_vm14, %v4176_v37, 0.0 }
 0xe99   : > { %v4178_v27 = vpop.eup %4177  ;;  %2600 = vadd.xlane.f32.xlu0 %v2599_v38  ;;  %v4093_v38 = vld [vmem:[%s5512_s9 + $0x44] ss:$8 sps:$4 sm:$0xff]  }
 0xe9a   : > { %v2602_v39 = vsel %vm2398_vm14, %v4178_v27, 0.0 }
 0xe9b   : > { %2603 = vadd.xlane.f32.xlu1 %v2602_v39  ;;  %v4096_v39 = vld [vmem:[%s5512_s9 + $0x54] ss:$8 sps:$4 sm:$0xff]  }
 0xf22   : > { %v2595_v42 = vpop.xlane.xlu0 %2594 }
 0xf23   : > { %4179 = vrcp.f32 %v2595_v42 }
 0xf24   : > { %v2598_v43 = vpop.xlane.xlu1 %2597 }
 0xf25   : > { %4181 = vrcp.f32 %v2598_v43 }
 0xf26   : > { %v2601_v44 = vpop.xlane.xlu0 %2600 }
 0xf27   : > { %4183 = vrcp.f32 %v2601_v44 }
 0xf28   : > { %v2604_v45 = vpop.xlane.xlu1 %2603 }
 0xf29   : > { %4185 = vrcp.f32 %v2604_v45 }
 0xf2d   : > { %v4180_v47 = vpop.eup %4179 }
 0xf2e   : > { %v2609_v49 = vmul.f32 %v4180_v47, %v4172_v34 }
 0xf2f   : > { %v4182_v48 = vpop.eup %4181 }
 0xf30   : > { %v2610_v50 = vmul.f32 %v4182_v48, %v4174_v36  ;;  %v4085_v36 = vld [vmem:[%s5512_s9 + $0x20] ss:$8 sps:$4 sm:$0xff]  }
 0xf31   : > { %v4184_v53 = vpop.eup %4183 }
 0xf32   : > { %v2613_v54 = vpack.c.bf16 %v2610_v50, %v2609_v49  ;;  %v2611_v58 = vmul.f32 %v4184_v53, %v4176_v37  ;;  %v4088_v37 = vld [vmem:[%s5512_s9 + $0x30] ss:$8 sps:$4 sm:$0xff]   ;;  %v3648_v50 = vld [vmem:[%s1165_s1] ss:$0 sm:$0xff]  ;;  %s5518_s1 = sld [smem:[#allocation25_spill]] }
 0xf33   : > { %v4186_v56 = vpop.eup %4185 }
 0xf34   : > { %v2612_v59 = vmul.f32 %v4186_v56, %v4178_v27  ;;  %3891 = vmatprep.mubr.msk.bf16.mxu1 %vm2398_vm14, %v2613_v54  ;;  %v4091_v27 = vld [vmem:[%s5512_s9 + $0x40] ss:$8 sps:$4 sm:$0xff]  }
 0xf36   : > { %v2614_v60 = vpack.c.bf16 %v2612_v59, %v2611_v58  ;;  %v3649_v59 = vld [vmem:[%s1168_s28] ss:$0 sm:$0xff] }
 0xf38   : > { %3892 = vmatmul.mubr.msk.bf16.vlgmr.msra.gmra.mrb[36].mxu1 %vm2398_vm14, %v2614_v60 }
 0xf39   : > { %2976 = vmatprep.mubr.bf16.mxu1 %v4447_v29 }
0x100b   : > { %v3893_v33 = vpop.f32.mrb[36].mxu1 }
0x100c   : > { %v2655_v1 = vpop.f32.mrb[37].mxu1  ;;  %v2672_v29 = vmul.f32 %v3893_v33, %v4942_v9  ;;  %v4103_v33 = vld [vmem:[%s5515_s29 + $0x40] sm:$0xff]  }
0x100d   : > { %v3894_v7 = vpop.f32.mrb[38].mxu1  ;;  %v2670_v14 = vmul.f32 %v2655_v1, %v4916_v4  ;;  %v3639_v4 = vld [vmem:[%s5514_s22] ss:$0 sm:$0xff]  ;;  %3757 = vmatprep.subr.bf16.mxu0 %v4103_v33 }
0x100e   : > { %v2658_v11 = vpop.f32.mrb[39].mxu1  ;;  %v2673_v8 = vmul.f32 %v3894_v7, %v4932_v6  ;;  %v4104_v1 = vld [vmem:[%s5515_s29] sm:$0xff]   ;;  %v4105_v7 = vld [vmem:[%s5515_s29 + $0x48] sm:$0xff]  }
0x100f   : > { %v2671_v15 = vmul.f32 %v2658_v11, %v4929_v5  ;;  %v4106_v11 = vld [vmem:[%s5515_s29 + $0x8] sm:$0xff]  }
0x1011   : > { %v2674_v16 = vadd.f32 %v2671_v15, %v2670_v14  ;;  %v4107_v14 = vld [vmem:[%s5515_s29 + $0x50] sm:$0xff]  }
0x1012   : > { %v4108_v15 = vld [vmem:[%s5515_s29 + $0x10] sm:$0xff]  }
0x1013   : > { %v2675_v17 = vadd.f32 %v2674_v16, %v2672_v29  ;;  %v4109_v29 = vld [vmem:[%s5515_s29 + $0x58] sm:$0xff]  }
0x1014   : > { %v4110_v16 = vld [vmem:[%s5515_s29 + $0x18] sm:$0xff]  }
0x1015   : > { %v2676_v3 = vadd.f32 %v2675_v17, %v2673_v8  ;;  %v4111_v8 = vld [vmem:[%s5515_s29 + $0x60] sm:$0xff]  }
0x1016   : > { %v4112_v17 = vld [vmem:[%s5515_s29 + $0x20] sm:$0xff]  }
0x1017   : > { %v2697_v18 = vpack.c.bf16 %v2676_v3, %v5260_v0  ;;  %v4079_v0 = vld [vmem:[%s5512_s9] ss:$8 sps:$4 sm:$0xff]  }
0x1018   : > { %2945 = vmatpush1.bf16.msra.mxu1 %v4079_v0  ;;  %v4113_v3 = vld [vmem:[%s5515_s29 + $0x68] sm:$0xff]  }
0x1019   : > { %3912 = vmatmul.mubr.bf16.vlgmr.msra.gmra.mrb[16].mxu0 %v2697_v18  ;;  %2946 = vmatprep.subr.bf16.mxu1 %v4084_v24  ;;  %v4114_v18 = vld [vmem:[%s5515_s29 + $0x28] sm:$0xff]  }
0x101a   : > { %3758 = vmatpush3.bf16.msra.mxu0 %v4104_v1 }
0x101b   : > { %3759 = vmatprep.subr.bf16.mxu0 %v4105_v7 }
0x101c   : > { %2947 = vmatpush1.bf16.msra.mxu1 %v4082_v25 }
0x101d   : > { %2948 = vmatprep.subr.bf16.mxu1 %v4087_v35 }
0x101e   : > { %3760 = vmatpush3.bf16.msra.mxu0 %v4106_v11 }
0x101f   : > { %3761 = vmatprep.subr.bf16.mxu0 %v4107_v14  ;;  %v3666_v14 = vld [vmem:[%s5520_s8] ss:$0 sm:$0xff] }
0x1020   : > { %2949 = vmatpush1.bf16.msra.mxu1 %v4085_v36 }
0x1021   : > { %2950 = vmatprep.subr.bf16.mxu1 %v4090_v20 }
0x1022   : > { %3762 = vmatpush3.bf16.msra.mxu0 %v4108_v15 }
0x1023   : > { %3763 = vmatprep.subr.bf16.mxu0 %v4109_v29 }
0x1024   : > { %2951 = vmatpush1.bf16.msra.mxu1 %v4088_v37 }
0x1025   : > { %2952 = vmatprep.subr.bf16.mxu1 %v4093_v38 }
0x1026   : > { %3764 = vmatpush3.bf16.msra.mxu0 %v4110_v16 }
0x1027   : > { %3765 = vmatprep.subr.bf16.mxu0 %v4111_v8 }
0x1028   : > { %2953 = vmatpush1.bf16.msra.mxu1 %v4091_v27 }
0x1029   : > { %2954 = vmatprep.subr.bf16.mxu1 %v4096_v39 }
0x102a   : > { %3766 = vmatpush3.bf16.msra.mxu0 %v4112_v17 }
0x102b   : > { %3767 = vmatprep.subr.bf16.mxu0 %v4113_v3 }
0x102c   : > { %2955 = vmatpush1.bf16.msra.mxu1 %v4094_v40 }
0x102d   : > { %2956 = vmatprep.subr.bf16.mxu1 %v4099_v2 }
0x102e   : > { %3768 = vmatpush3.bf16.msra.mxu0 %v4114_v18 }
0x1030   : > { %2957 = vmatpush1.bf16.msra.mxu1 %v4097_v46 }
0x1031   : > { %2958 = vmatprep.subr.bf16.mxu1 %v4102_v41 }
0x1034   : > { %2959 = vmatpush1.bf16.msra.mxu1 %v4100_v10 }
0x10ec   : > { %v2786_v5 = vpop.f32.mrb[16].mxu0 }
0x10ed   : > { %v2787_v19 = vadd.f32 %v3639_v4, %v2786_v5  ;;  %v3913_v9 = vpop.f32.mrb[17].mxu0  ;;  %v4116_v5 = vld [vmem:[%s5515_s29 + $0x30] sm:$0xff]  }
0x10ee   : > { %v2789_v21 = vpop.f32.mrb[18].mxu0  ;;  %v4118_v9 = vld [vmem:[%s5515_s29 + $0x38] sm:$0xff]  }
0x10ef   : > { %v2790_v22 = vadd.f32 %v3639_v4, %v2789_v21  ;;  %v3914_v6 = vpop.f32.mrb[19].mxu0  ;;  %v2793_v51 = vadd.f32 %v2787_v19, %v5198_v12  ;;  %v4115_v4 = vld [vmem:[%s5515_s29 + $0x70] sm:$0xff]   ;;  %v4117_v19 = vld [vmem:[%s5515_s29 + $0x78] sm:$0xff]   ;;  %v2851_v21 = vld [vmem:[%s5518_s1] sm:$0x3] }
0x10f0   : > { %3769 = vmatprep.subr.bf16.mxu0 %v4115_v4  ;;  %v2861_v6 = vrot.slane %v2851_v21, %v5053_v57 }
0x10f1   : > { %2797 = vadd.xlane.f32.xlu0 %v2793_v51  ;;  %v2794_v52 = vadd.f32 %v2790_v22, %v5200_v13  ;;  %3770 = vmatpush3.bf16.msra.mxu0 %v4116_v5  ;;  %v2857_v22 = vrot.slane %v2851_v21, %v5049_v55 }
0x10f2   : > { %3771 = vmatprep.subr.bf16.mxu0 %v4117_v19 }
0x10f3   : > { %2799 = vadd.xlane.f32.xlu1 %v2794_v52 }
0x10f5   : > { %3772 = vmatpush3.bf16.msra.mxu0 %v4118_v9 }
0x117e   : > { %v2798_v26 = vpop.xlane.xlu0 %2797 }
0x117f   : > { %v2801_v28 = vmul.f32 0.0078125, %v2798_v26 }
0x1180   : > { %v2800_v30 = vpop.xlane.xlu1 %2799 }
0x1181   : > { %v2803_v12 = vsub.f32 %v2793_v51, %v2801_v28  ;;  %v2802_v13 = vmul.f32 0.0078125, %v2800_v30 }
0x1183   : > { %v2804_v31 = vsub.f32 %v2794_v52, %v2802_v13  ;;  %v2805_v32 = vmul.f32 %v2803_v12, %v2803_v12 }
0x1185   : > { %2807 = vadd.xlane.f32.xlu0 %v2805_v32  ;;  %v2806_v34 = vmul.f32 %v2804_v31, %v2804_v31 }
0x1187   : > { %2809 = vadd.xlane.f32.xlu1 %v2806_v34 }
0x1212   : > { %v2808_v42 = vpop.xlane.xlu0 %2807 }
0x1213   : > { %v2811_v43 = vmul.f32 0.0078125, %v2808_v42 }
0x1214   : > { %v2810_v44 = vpop.xlane.xlu1 %2809 }
0x1215   : > { %v2813_v45 = vadd.f32 1e-05, %v2811_v43  ;;  %v2812_v47 = vmul.f32 0.0078125, %v2810_v44 }
0x1217   : > { %4187 = vrsqrt.f32 %v2813_v45  ;;  %v2814_v48 = vadd.f32 1e-05, %v2812_v47 }
0x1219   : > { %4189 = vrsqrt.f32 %v2814_v48 }
0x1221   : > { %v4188_v49 = vpop.eup %4187 }
0x1222   : > { %v2817_v53 = vmul.f32 %v4188_v49, %v2803_v12 }
0x1223   : > { %v4190_v54 = vpop.eup %4189 }
0x1224   : > { %v2818_v56 = vmul.f32 %v4190_v54, %v2804_v31  ;;  %v2825_v58 = vmul.f32 %v3648_v50, %v2817_v53 }
0x1226   : > { %v2826_v60 = vmul.f32 %v3648_v50, %v2818_v56  ;;  %v5326_v61 = vadd.f32 %v3649_v59, %v2825_v58 }
0x1228   : > { %v5328_v62 = vadd.f32 %v3649_v59, %v2826_v60 }
0x122a   : > { %v2852_v63 = vpack.c.bf16 %v5328_v62, %v5326_v61 }
0x122c   : > { %2977 = vmatmul.mubr.bf16.vlgmr.msra.gmra.mrb[40].mxu1 %v2852_v63 }
0x12ff   : > { %v2978_v51 = vpop.f32.mrb[40].mxu1 }
0x1300   : > { %v2979_v52 = vadd.f32 %v2978_v51, %v2857_v22  ;;  %v2980_v0 = vpop.f32.mrb[41].mxu1 }
0x1301   : > { %v2981_v23 = vadd.f32 %v2980_v0, %v2861_v6  ;;  %v2982_v24 = vpop.f32.mrb[42].mxu1 }
0x1302   : > { %v2991_v25 = vmul.f32 0.044715, %v2979_v52  ;;  %v2983_v26 = vadd.f32 %v2982_v24, %v2857_v22  ;;  %v2984_v28 = vpop.f32.mrb[43].mxu1  ;;  %v2987_v49 = vmul.f32 0.5, %v2979_v52 }
0x1303   : > { %v2992_v30 = vmul.f32 0.044715, %v2981_v23  ;;  %v2985_v12 = vadd.f32 %v2984_v28, %v2861_v6  ;;  %v2988_v54 = vmul.f32 0.5, %v2981_v23 }
0x1304   : > { %v2995_v13 = vmul.f32 %v2991_v25, %v2979_v52  ;;  %v2993_v31 = vmul.f32 0.044715, %v2983_v26  ;;  %v2989_v50 = vmul.f32 0.5, %v2983_v26 }
0x1305   : > { %v2996_v32 = vmul.f32 %v2992_v30, %v2981_v23  ;;  %v2994_v34 = vmul.f32 0.044715, %v2985_v12  ;;  %v2990_v56 = vmul.f32 0.5, %v2985_v12  ;;  %v3683_v30 = vld [vmem:[%s1171_s6] ss:$0 sm:$0xff]  ;;  %s5523_s6 = sld [smem:[#allocation50_spill]] (!%p3685_p12) }
0x1306   : > { %v2999_v35 = vmul.f32 %v2995_v13, %v2979_v52  ;;  %v2997_v36 = vmul.f32 %v2993_v31, %v2983_v26  ;;  %v3684_v31 = vld [vmem:[%s1174_s0] ss:$0 sm:$0xff] }
0x1307   : > { %v3000_v20 = vmul.f32 %v2996_v32, %v2981_v23  ;;  %v2998_v55 = vmul.f32 %v2994_v34, %v2985_v12 }
0x1308   : > { %v3003_v37 = vadd.f32 %v2999_v35, %v2979_v52  ;;  %v3001_v57 = vmul.f32 %v2997_v36, %v2983_v26 }
0x1309   : > { %v3002_v38 = vmul.f32 %v2998_v55, %v2985_v12  ;;  %v3004_v27 = vadd.f32 %v3000_v20, %v2981_v23 }
0x130a   : > { %v3007_v39 = vmul.f32 0.7978846, %v3003_v37  ;;  %v3005_v40 = vadd.f32 %v3001_v57, %v2983_v26 }
0x130b   : > { %v3006_v2 = vadd.f32 %v3002_v38, %v2985_v12  ;;  %v3008_v46 = vmul.f32 0.7978846, %v3004_v27  ;;  %s5524_s21 = smov (!%p3685_p12), %s5523_s6 }
0x130c   : > { %4191 = vtanh.f32 %v3007_v39  ;;  %v3009_v41 = vmul.f32 0.7978846, %v3005_v40 }
0x130d   : > { %v3010_v10 = vmul.f32 0.7978846, %v3006_v2  ;;  %4193 = vtanh.f32 %v3008_v46 }
0x130e   : > { %4195 = vtanh.f32 %v3009_v41 }
0x130f   : > { %4197 = vtanh.f32 %v3010_v10 }
0x1316   : > { %v4192_v42 = vpop.eup %4191 }
0x1317   : > { %v4194_v43 = vpop.eup %4193  ;;  %v3015_v44 = vadd.f32 1.0, %v4192_v42 }
0x1318   : > { %v4196_v45 = vpop.eup %4195  ;;  %v3016_v47 = vadd.f32 1.0, %v4194_v43 }
0x1319   : > { %v4198_v48 = vpop.eup %4197  ;;  %v3017_v53 = vadd.f32 1.0, %v4196_v45  ;;  %v3019_v59 = vmul.f32 %v3015_v44, %v2987_v49 }
0x131a   : > { %v3018_v58 = vadd.f32 1.0, %v4198_v48  ;;  %v3020_v63 = vmul.f32 %v3016_v47, %v2988_v54 }
0x131b   : > { %v3021_v60 = vmul.f32 %v3017_v53, %v2989_v50 }
0x131c   : > { %v3022_v33 = vmul.f32 %v3018_v58, %v2990_v56 }
0x131d   : > { %v3056_v1 = vpack.c.bf16 %v3021_v60, %v3019_v59 }
0x131e   : > { %v3057_v7 = vpack.c.bf16 %v3022_v33, %v3020_v63 }
0x1320   : > { %3192 = vmatprep.mubr.bf16.mxu0 %v3057_v7 }
0x1321   : > { %3193 = vmatmul.mubr.bf16.vlgmr.msra.gmra.mrb[20].mxu0 %v3056_v1 }
0x13f4   : > { %v3773_v11 = vpop.f32.mrb[20].mxu0 }
0x13f5   : > { %v3774_v15 = vpop.f32.mrb[21].mxu0 }
0x13f6   : > { %v3775_v29 = vadd.f32 %v3774_v15, %v3773_v11  ;;  %v3776_v16 = vpop.f32.mrb[22].mxu0 }
0x13f7   : > { %v3777_v8 = vpop.f32.mrb[23].mxu0 }
0x13f8   : > { %v3195_v17 = vadd.f32 %v3775_v29, %v3666_v14  ;;  %v3778_v3 = vadd.f32 %v3777_v8, %v3776_v16 }
0x13fa   : > { %v3198_v18 = vadd.f32 %v3778_v3, %v3666_v14  ;;  %v3201_v4 = vadd.f32 %v3195_v17, %v5326_v61 }
0x13fc   : > { %3205 = vadd.xlane.f32.xlu0 %v3201_v4  ;;  %v3202_v5 = vadd.f32 %v3198_v18, %v5328_v62 }
0x13fe   : > { %3207 = vadd.xlane.f32.xlu1 %v3202_v5 }
0x1489   : > { %v3206_v19 = vpop.xlane.xlu0 %3205 }
0x148a   : > { %v3209_v9 = vmul.f32 0.0078125, %v3206_v19 }
0x148b   : > { %v3208_v21 = vpop.xlane.xlu1 %3207 }
0x148c   : > { %v3211_v22 = vsub.f32 %v3201_v4, %v3209_v9  ;;  %v3210_v6 = vmul.f32 0.0078125, %v3208_v21 }
0x148e   : > { %v3212_v51 = vsub.f32 %v3202_v5, %v3210_v6  ;;  %v3213_v52 = vmul.f32 %v3211_v22, %v3211_v22 }
0x1490   : > { %3215 = vadd.xlane.f32.xlu0 %v3213_v52  ;;  %v3214_v0 = vmul.f32 %v3212_v51, %v3212_v51 }
0x1492   : > { %3217 = vadd.xlane.f32.xlu1 %v3214_v0 }
0x151d   : > { %v3216_v23 = vpop.xlane.xlu0 %3215 }
0x151e   : > { %v3219_v24 = vmul.f32 0.0078125, %v3216_v23 }
0x151f   : > { %v3218_v25 = vpop.xlane.xlu1 %3217 }
0x1520   : > { %v3221_v61 = vadd.f32 1e-05, %v3219_v24  ;;  %v3220_v26 = vmul.f32 0.0078125, %v3218_v25 }
0x1522   : > { %4199 = vrsqrt.f32 %v3221_v61  ;;  %v3222_v62 = vadd.f32 1e-05, %v3220_v26 }
0x1524   : > { %4201 = vrsqrt.f32 %v3222_v62 }
0x152c   : > { %v4200_v28 = vpop.eup %4199 }
0x152d   : > { %v3225_v12 = vmul.f32 %v4200_v28, %v3211_v22 }
0x152e   : > { %v4202_v13 = vpop.eup %4201 }
0x152f   : > { %v3233_v32 = vmul.f32 %v3683_v30, %v3225_v12  ;;  %v3226_v34 = vmul.f32 %v4202_v13, %v3212_v51  ;;  %3248 = sbr.rel (%p3685_p12) target bundleno = 5430 (0x1536), region = 152 }
0x1531   : > { %v3241_v35 = vadd.f32 %v3684_v31, %v3233_v32  ;;  %v3234_v36 = vmul.f32 %v3683_v30, %v3226_v34 }
0x1533   : > { %3243 = vst [vmem:[#allocation2] sm:$0xff] %v3241_v35  ;;  %v3242_v20 = vadd.f32 %v3684_v31, %v3234_v36  ;;  %3249 = vst [vmem:[%s5523_s6] sm:$0xff] (!%p3685_p12), %v3241_v35 }
0x1535   : > { %3244 = vst [vmem:[#allocation2 + $0x8] sm:$0xff] %v3242_v20  ;;  %3250 = vst [vmem:[%s5524_s21 + $0x8] sm:$0xff] (!%p3685_p12), %v3242_v20 }
0x1536 PF: > { %s5525_s30 = sld [smem:[#allocation20_spill]]  ;;  %s5526_s29 = sld [smem:[#allocation18_spill]] }
0x1537   : > { %s5527_s2 = sld [smem:[#allocation19_spill]]  ;;  %s5528_s6 = sld [smem:[#allocation21_spill]] }
0x153c   : > { %p44_p2 = scmp.ge.s32.totalorder %s5525_s30, 4  }
0x153e   :  { %46 = sbr.rel (!%p44_p2) target bundleno = 35 (0x23), region = 267 }
0x1545   :  { %3262 = vsyncpa [#allocation5], 1 }
0x1546   :  { %3264 = vsyncpa [#allocation5 + $0x1], 1 }
0x1547   :  { %3265 = vsyncpa [#allocation7], 1 }
0x1548   :  { %3267 = vsyncpa [#allocation7 + $0x1], 1 }
0x1549   :  { %3268 = vsyncpa [#allocation10], 1 }
0x154a   :  { %3270 = vsyncpa [#allocation10 + $0x1], 1 }
0x154b   :  { %3271 = vsyncpa [#allocation13], 1 }
0x154c   :  { %3273 = vsyncpa [#allocation13 + $0x1], 1 }

</bundles_post_ra>
